<compile_context>
chip_gen: v5e
topology: v5e:2x2
jax: 0.10.0
libtpu: 0.0.40
codegen_flags: <defaults>
</compile_context>

<pallas_src>
import math
import functools

import jax
import jax.numpy as jnp
from jax import lax
from jax.experimental import pallas as pl
from jax.experimental.pallas import tpu as pltpu

NUM_HEADS = 4

# Conservative (v7x-safe, 64 MiB physical VMEM) budgets.  v5e/v6e (128 MiB
# physical) can raise these (e.g. 96 MiB limit, max_tile=1024) when sweeping.
_VMEM_BUDGET_BYTES = 40 * 1024 * 1024
_VMEM_LIMIT_BYTES = 48 * 1024 * 1024
_MAX_ROW_TILE = 512


def _mha_kernel(*refs, d_k, num_heads, inv_sqrt_dk, l_valid, l_pad, has_mask):
    # refs (has_mask=True):  xq, xk, wq_t, bq, wk_t, bk, mask, out, k_scratch
    # refs (has_mask=False): xq, xk, wq_t, bq, wk_t, bk, out, k_scratch
    if has_mask:
        (xq_ref, xk_ref, wq_ref, bq_ref, wk_ref, bk_ref, mask_ref,
         out_ref, k_scratch) = refs
    else:
        (xq_ref, xk_ref, wq_ref, bq_ref, wk_ref, bk_ref,
         out_ref, k_scratch) = refs
        mask_ref = None

    rt = pl.program_id(1)

    # Project ALL key rows once per batch (row-tile 0); reuse for later tiles.
    @pl.when(rt == 0)
    def _():
        k_scratch[...] = (
            jnp.dot(xk_ref[0], wk_ref[...], preferred_element_type=jnp.float32)
            + bk_ref[...])

    # Fused query projection for this row tile (one MXU-shaped matmul, all
    # heads).  Scale by 1/sqrt(d_k) ONCE here (tq*d_model elems) instead of
    # scaling each (tq, L) score matrix per head.
    q_all = (jnp.dot(xq_ref[0], wq_ref[...], preferred_element_type=jnp.float32)
             + bq_ref[...]) * inv_sqrt_dk                     # (tq, d_model)
    k_all = k_scratch[...]                                    # (L_pad, d_model)

    # Mask predicate / fill value computed ONCE (hoisted out of the head loop).
    # jnp.where(keep, scores, fill) reproduces masked_fill(mask==0, -1e9)
    # exactly; padded key columns get a strictly lower fill (-2e9) so that even
    # fully-masked real rows normalize over the real L columns like the module.
    keep = None
    fill = jnp.float32(-1e9)
    if has_mask:
        keep = mask_ref[0] != 0                               # (tq, L_pad) bool
        if l_pad > l_valid:
            col = lax.broadcasted_iota(jnp.int32, (1, l_pad), 1)
            fill = jnp.where(col >= l_valid, jnp.float32(-2e9), fill)
    elif l_pad > l_valid:
        col = lax.broadcasted_iota(jnp.int32, (1, l_pad), 1)
        keep = col < l_valid                                  # (1, L_pad) bool

    for h in range(num_heads):                                # static unroll
        q_h = q_all[:, h * d_k:(h + 1) * d_k]                 # (tq, d_k)
        k_h = k_all[:, h * d_k:(h + 1) * d_k]                 # (L_pad, d_k)
        # Contract last dims directly (no explicit transpose through the XLU).
        scores = lax.dot_general(
            q_h, k_h, (((1,), (1,)), ((), ())),
            preferred_element_type=jnp.float32)               # (tq, L_pad)
        if keep is not None:
            scores = jnp.where(keep, scores, fill)

        # softmax over keys (all math in f32)
        mx = jnp.max(scores, axis=-1, keepdims=True)
        e = jnp.exp(scores - mx)
        denom = jnp.sum(e, axis=-1, keepdims=True)
        # Exact normalization: approx EUP reciprocal broke row-sum parity.
        p = e * (1.0 / denom)

        out_ref[0, h] = p.astype(out_ref.dtype)               # lane-dense store


def _vmem_bytes(tq, l_pad, d_model, num_heads, out_bytes, has_mask):
    """Rough per-grid-step VMEM footprint estimate (double-buffered tiles)."""
    b = 2 * num_heads * tq * l_pad * out_bytes      # output tile (dominant)
    if has_mask:
        b += 2 * tq * l_pad                         # int8 mask tile
    b += 2 * tq * d_model * 4                       # xq tile
    b += 2 * l_pad * d_model * 4                    # xk block
    b += l_pad * d_model * 4                        # k_scratch
    b += 2 * 2 * d_model * d_model * 4              # Wq^T, Wk^T
    b += 2 * 2 * d_model * 4                        # biases
    b += 4 * tq * l_pad * 4                         # f32 temporaries headroom
    return b


def _pick_tq(l_pad, d_model, num_heads, out_bytes, has_mask,
             max_tile=_MAX_ROW_TILE, budget=_VMEM_BUDGET_BYTES):
    """Largest multiple-of-32 divisor of l_pad within the VMEM budget."""
    cap = min(l_pad, max_tile)
    cap -= cap % 32
    t = cap
    while t >= 32:
        if (l_pad % t == 0 and
                _vmem_bytes(t, l_pad, d_model, num_heads, out_bytes,
                            has_mask) <= budget):
            return t
        t -= 32
    return 32   # l_pad is a multiple of 128, so 32 always divides it


def multi_head_attention(query, key, wq, bq, wk, bk, mask=None,
                         num_heads=NUM_HEADS, out_dtype=jnp.bfloat16):
    """query, key: (B, L, d_model); wq/wk: (d_model, d_model) torch-style
    (y = x @ W.T + b); bq/bk: (d_model,).  Returns attention probs (B,H,L,L)
    in `out_dtype` (bf16 by default; softmax math is f32)."""
    B, L, d_model = query.shape
    H = num_heads
    assert d_model % H == 0
    d_k = d_model // H
    out_bytes = jnp.dtype(out_dtype).itemsize

    # Pad the sequence dim to a multiple of 128: lane-dense output stores and
    # robust (8,128)-aligned tiling for awkward L.
    L_pad = max(128, ((L + 127) // 128) * 128)
    pad = L_pad - L

    # torch Linear: y = x @ W.T + b.  Transpose once; head h owns output
    # columns [h*d_k : (h+1)*d_k] of W.T.
    wq_t = wq.T
    wk_t = wk.T
    bq2 = bq.reshape(1, d_model)
    bk2 = bk.reshape(1, d_model)

    q_in, k_in = query, key
    if pad:
        q_in = jnp.pad(query, ((0, 0), (0, pad), (0, 0)))
        k_in = jnp.pad(key, ((0, 0), (0, pad), (0, 0)))

    has_mask = mask is not None
    if has_mask:
        mask_i8 = (mask != 0).astype(jnp.int8)
        if pad:
            # zero padding == masked out
            mask_i8 = jnp.pad(mask_i8, ((0, 0), (0, pad), (0, pad)))

    tq = _pick_tq(L_pad, d_model, H, out_bytes, has_mask)
    n_rt = L_pad // tq

    kernel = functools.partial(
        _mha_kernel, d_k=d_k, num_heads=H,
        inv_sqrt_dk=1.0 / math.sqrt(d_k),
        l_valid=L, l_pad=L_pad, has_mask=has_mask)

    in_specs = [
        pl.BlockSpec((1, tq, L_pad and d_model), lambda b, r: (b, r, 0)),  # xq rows
        pl.BlockSpec((1, L_pad, d_model), lambda b, r: (b, 0, 0)),         # all keys
        pl.BlockSpec((d_model, d_model), lambda b, r: (0, 0)),             # Wq^T
        pl.BlockSpec((1, d_model), lambda b, r: (0, 0)),                   # bq
        pl.BlockSpec((d_model, d_model), lambda b, r: (0, 0)),             # Wk^T
        pl.BlockSpec((1, d_model), lambda b, r: (0, 0)),                   # bk
    ]
    inputs = [q_in, k_in, wq_t, bq2, wk_t, bk2]
    if has_mask:
        in_specs.append(pl.BlockSpec((1, tq, L_pad), lambda b, r: (b, r, 0)))
        inputs.append(mask_i8)

    # Advisory cost estimate so XLA can schedule around the call.
    flops = 4 * B * L_pad * d_model * d_model + 2 * B * H * L_pad * L_pad * d_k
    bytes_accessed = (2 * B * L_pad * d_model * 4          # xq, xk
                      + 2 * d_model * d_model * 4          # Wq, Wk
                      + 2 * d_model * 4                    # biases
                      + (B * L_pad * L_pad if has_mask else 0)   # int8 mask
                      + B * H * L_pad * L_pad * out_bytes)       # output
    cost = pl.CostEstimate(flops=flops,
                           transcendentals=B * H * L_pad * L_pad,
                           bytes_accessed=bytes_accessed)

    grid_spec = pltpu.PrefetchScalarGridSpec(
        num_scalar_prefetch=0,
        grid=(B, n_rt),
        in_specs=in_specs,
        out_specs=pl.BlockSpec((1, H, tq, L_pad), lambda b, r: (b, 0, r, 0)),
        scratch_shapes=[pltpu.VMEM((L_pad, d_model), jnp.float32)],  # K proj
    )

    out = pl.pallas_call(
        kernel,
        out_shape=jax.ShapeDtypeStruct((B, H, L_pad, L_pad), out_dtype),
        grid_spec=grid_spec,
        compiler_params=pltpu.CompilerParams(
            # batch axis parallel (megacore); row-tile axis sequential because
            # of the K-projection scratch dependency.
            dimension_semantics=("parallel", "arbitrary"),
            vmem_limit_bytes=_VMEM_LIMIT_BYTES),
        cost_estimate=cost,
    )(*inputs)

    if pad:
        out = out[:, :, :L, :L]
    return out


# ---- reference (plain JAX) for a sanity check ----------------------------
def _reference(query, key, wq, bq, wk, bk, mask=None, num_heads=NUM_HEADS):
    B, L, d_model = query.shape
    H = num_heads
    d_k = d_model // H
    q = query @ wq.T + bq
    k = key @ wk.T + bk
    q = q.reshape(B, L, H, d_k).transpose(0, 2, 1, 3)
    k = k.reshape(B, L, H, d_k).transpose(0, 2, 1, 3)
    scores = jnp.einsum("bhqd,bhkd->bhqk", q, k) / math.sqrt(d_k)
    if mask is not None:
        scores = jnp.where(mask[:, None, :, :] == 0, -1e9, scores)
    return jax.nn.softmax(scores, axis=-1)


if __name__ == "__main__":
    B, L, d_model = 2, 8, 32
    H = NUM_HEADS

    key0 = jax.random.PRNGKey(0)
    k1, k2, k3, k4, k5, k6, k7 = jax.random.split(key0, 7)

    query = jax.random.normal(k1, (B, L, d_model), jnp.float32)
    keyx = jax.random.normal(k2, (B, L, d_model), jnp.float32)

    # Deterministic "Linear" params (torch nn.Linear shapes: W (out,in), b (out,))
    bound = 1.0 / math.sqrt(d_model)
    wq = jax.random.uniform(k3, (d_model, d_model), jnp.float32, -bound, bound)
    bq = jax.random.uniform(k4, (d_model,), jnp.float32, -bound, bound)
    wk = jax.random.uniform(k5, (d_model, d_model), jnp.float32, -bound, bound)
    bk = jax.random.uniform(k6, (d_model,), jnp.float32, -bound, bound)

    # Random 0/1 mask (B, L, L), as the module expects pre-unsqueeze(1)
    mask = (jax.random.uniform(k7, (B, L, L)) > 0.2).astype(jnp.int32)

    # --- masked path (bf16 output) ---
    attn = multi_head_attention(query, keyx, wq, bq, wk, bk, mask=mask)
    attn = jax.block_until_ready(attn)
    ref = _reference(query, keyx, wq, bq, wk, bk, mask=mask)

    assert attn.shape == (B, H, L, L)
    attn32 = attn.astype(jnp.float32)
    # Tolerances account for the bf16 output cast (~2^-9 relative on probs <= 1);
    # softmax math itself is exact f32 (no approximate reciprocal anymore).
    assert jnp.allclose(attn32, ref, atol=1e-2, rtol=1e-2)
    assert jnp.allclose(attn32.sum(-1), jnp.ones((B, H, L)), atol=1e-2)

    # --- no-mask fast path ---
    attn_nm = multi_head_attention(query, keyx, wq, bq, wk, bk, mask=None)
    attn_nm = jax.block_until_ready(attn_nm)
    ref_nm = _reference(query, keyx, wq, bq, wk, bk, mask=None)

    attn_nm32 = attn_nm.astype(jnp.float32)
    assert attn_nm.shape == (B, H, L, L)
    assert jnp.allclose(attn_nm32, ref_nm, atol=1e-2, rtol=1e-2)
    assert jnp.allclose(attn_nm32.sum(-1), jnp.ones((B, H, L)), atol=1e-2)

    print("KERNEL_OK")
</pallas_src>

<mosaic_0001>
module attributes {stable_mosaic.version = 11 : i64} {
  func.func @_mha_kernel(%arg0: i32, %arg1: i32, %arg2: memref<1x128x32xf32, #tpu.memory_space<vmem>>, %arg3: memref<1x128x32xf32, #tpu.memory_space<vmem>>, %arg4: memref<32x32xf32, #tpu.memory_space<vmem>>, %arg5: memref<1x32xf32, #tpu.memory_space<vmem>>, %arg6: memref<32x32xf32, #tpu.memory_space<vmem>>, %arg7: memref<1x32xf32, #tpu.memory_space<vmem>>, %arg8: memref<1x128x128xi8, #tpu.memory_space<vmem>>, %arg9: memref<1x4x128x128xbf16, #tpu.memory_space<vmem>>, %arg10: memref<128x32xf32, #tpu.memory_space<vmem>>) attributes {dimension_semantics = [#tpu.dimension_semantics<parallel>, #tpu.dimension_semantics<arbitrary>], iteration_bounds = array<i64: 2, 1>, scalar_prefetch = 0 : i64, scratch_operands = 1 : i64, tpu.core_type = #tpu.core_type<tc>, window_params = [{transform_indices = @transform_0, window_bounds = array<i64: 1, 128, 32>}, {transform_indices = @transform_1, window_bounds = array<i64: 1, 128, 32>}, {pipeline_mode = #tpu.pipeline_mode<synchronous>, transform_indices = @transform_2, window_bounds = array<i64: 32, 32>}, {pipeline_mode = #tpu.pipeline_mode<synchronous>, transform_indices = @transform_3, window_bounds = array<i64: 1, 32>}, {pipeline_mode = #tpu.pipeline_mode<synchronous>, transform_indices = @transform_4, window_bounds = array<i64: 32, 32>}, {pipeline_mode = #tpu.pipeline_mode<synchronous>, transform_indices = @transform_5, window_bounds = array<i64: 1, 32>}, {transform_indices = @transform_6, window_bounds = array<i64: 1, 128, 128>}, {transform_indices = @transform_7, window_bounds = array<i64: 1, 4, 128, 128>}]} {
    %c0_i32 = arith.constant 0 : i32
    %0 = arith.cmpi eq, %arg1, %c0_i32 : i32
    %1 = arith.extui %0 : i1 to i32
    %c0_i32_0 = arith.constant 0 : i32
    %2 = arith.cmpi ne, %1, %c0_i32_0 : i32
    scf.if %2 {
      %c0_44 = arith.constant 0 : index
      %c0_45 = arith.constant 0 : index
      %c0_46 = arith.constant 0 : index
      %107 = vector.load %arg3[%c0_44, %c0_45, %c0_46] : memref<1x128x32xf32, #tpu.memory_space<vmem>>, vector<1x128x32xf32>
      %108 = vector.shape_cast %107 : vector<1x128x32xf32> to vector<128x32xf32>
      %c0_47 = arith.constant 0 : index
      %c0_48 = arith.constant 0 : index
      %109 = vector.load %arg6[%c0_47, %c0_48] : memref<32x32xf32, #tpu.memory_space<vmem>>, vector<32x32xf32>
      %cst_49 = arith.constant dense<0.000000e+00> : vector<128x32xf32>
      %110 = tpu.matmul %108, %109, %cst_49 {dimension_numbers = #tpu.dot_dimension_numbers<[1], [0], [0], [1], [0, 0, 1, 1], [], []>} : vector<128x32xf32>, vector<32x32xf32>, vector<128x32xf32> -> vector<128x32xf32>
      %c0_50 = arith.constant 0 : index
      %c0_51 = arith.constant 0 : index
      %111 = vector.load %arg7[%c0_50, %c0_51] : memref<1x32xf32, #tpu.memory_space<vmem>>, vector<1x32xf32>
      %112 = vector.broadcast %111 : vector<1x32xf32> to vector<128x32xf32>
      %113 = arith.addf %110, %112 : vector<128x32xf32>
      %c0_52 = arith.constant 0 : index
      %c0_53 = arith.constant 0 : index
      %114 = vector.load %arg10[%c0_52, %c0_53] : memref<128x32xf32, #tpu.memory_space<vmem>>, vector<128x32xf32>
      tpu.vector_store %arg10[%c0_52, %c0_53], %113 {strides = array<i32>} : memref<128x32xf32, #tpu.memory_space<vmem>>, vector<128x32xf32>,
    } else {
    }
    %c0 = arith.constant 0 : index
    %c0_1 = arith.constant 0 : index
    %c0_2 = arith.constant 0 : index
    %3 = vector.load %arg2[%c0, %c0_1, %c0_2] : memref<1x128x32xf32, #tpu.memory_space<vmem>>, vector<1x128x32xf32>
    %4 = vector.shape_cast %3 : vector<1x128x32xf32> to vector<128x32xf32>
    %c0_3 = arith.constant 0 : index
    %c0_4 = arith.constant 0 : index
    %5 = vector.load %arg4[%c0_3, %c0_4] : memref<32x32xf32, #tpu.memory_space<vmem>>, vector<32x32xf32>
    %cst = arith.constant dense<0.000000e+00> : vector<128x32xf32>
    %6 = tpu.matmul %4, %5, %cst {dimension_numbers = #tpu.dot_dimension_numbers<[1], [0], [0], [1], [0, 0, 1, 1], [], []>} : vector<128x32xf32>, vector<32x32xf32>, vector<128x32xf32> -> vector<128x32xf32>
    %c0_5 = arith.constant 0 : index
    %c0_6 = arith.constant 0 : index
    %7 = vector.load %arg5[%c0_5, %c0_6] : memref<1x32xf32, #tpu.memory_space<vmem>>, vector<1x32xf32>
    %8 = vector.broadcast %7 : vector<1x32xf32> to vector<128x32xf32>
    %9 = arith.addf %6, %8 : vector<128x32xf32>
    %cst_7 = arith.constant 0.353553385 : f32
    %10 = vector.broadcast %cst_7 : f32 to vector<128x32xf32>
    %11 = arith.mulf %9, %10 : vector<128x32xf32>
    %c0_8 = arith.constant 0 : index
    %c0_9 = arith.constant 0 : index
    %12 = vector.load %arg10[%c0_8, %c0_9] : memref<128x32xf32, #tpu.memory_space<vmem>>, vector<128x32xf32>
    %c0_10 = arith.constant 0 : index
    %c0_11 = arith.constant 0 : index
    %c0_12 = arith.constant 0 : index
    %13 = vector.load %arg8[%c0_10, %c0_11, %c0_12] : memref<1x128x128xi8, #tpu.memory_space<vmem>>, vector<1x128x128xi8>
    %14 = vector.shape_cast %13 : vector<1x128x128xi8> to vector<128x128xi8>
    %c0_i8 = arith.constant 0 : i8
    %15 = vector.broadcast %c0_i8 : i8 to vector<128x128xi8>
    %16 = arith.cmpi ne, %14, %15 : vector<128x128xi8>
    %17 = tpu.iota {dimensions = array<i32: 1>} : vector<1x128xi32>
    %c8_i32 = arith.constant 8 : i32
    %18 = vector.broadcast %c8_i32 : i32 to vector<1x128xi32>
    %19 = arith.cmpi sge, %17, %18 : vector<1x128xi32>
    %cst_13 = arith.constant -2.000000e+09 : f32
    %cst_14 = arith.constant -1.000000e+09 : f32
    %20 = vector.broadcast %cst_13 : f32 to vector<1x128xf32>
    %21 = vector.broadcast %cst_14 : f32 to vector<1x128xf32>
    %22 = arith.select %19, %20, %21 : vector<1x128xi1>, vector<1x128xf32>
    %23 = vector.extract_strided_slice %11 {offsets = [0, 0], sizes = [128, 8], strides = [1, 1]} : vector<128x32xf32> to vector<128x8xf32>
    %24 = vector.extract_strided_slice %12 {offsets = [0, 0], sizes = [128, 8], strides = [1, 1]} : vector<128x32xf32> to vector<128x8xf32>
    %cst_15 = arith.constant dense<0.000000e+00> : vector<128x128xf32>
    %25 = tpu.matmul %23, %24, %cst_15 {dimension_numbers = #tpu.dot_dimension_numbers<[1], [1], [0], [0], [0, 0, 1, 0], [], []>} : vector<128x8xf32>, vector<128x8xf32>, vector<128x128xf32> -> vector<128x128xf32>
    %26 = vector.shape_cast %22 : vector<1x128xf32> to vector<1x128xf32>
    %27 = vector.broadcast %26 : vector<1x128xf32> to vector<128x128xf32>
    %28 = arith.select %16, %25, %27 : vector<128x128xi1>, vector<128x128xf32>
    %cst_16 = arith.constant dense<0xFF800000> : vector<128xf32>
    %29 = vector.multi_reduction <maximumf>, %28, %cst_16 [1] : vector<128x128xf32> to vector<128xf32>
    %30 = vector.shape_cast %29 : vector<128xf32> to vector<128x1xf32>
    %31 = vector.broadcast %30 : vector<128x1xf32> to vector<128x128xf32>
    %32 = arith.subf %28, %31 : vector<128x128xf32>
    %33 = math.exp %32 : vector<128x128xf32>
    %cst_17 = arith.constant dense<0.000000e+00> : vector<128xf32>
    %34 = vector.multi_reduction <add>, %33, %cst_17 [1] : vector<128x128xf32> to vector<128xf32>
    %35 = vector.shape_cast %34 : vector<128xf32> to vector<128x1xf32>
    %cst_18 = arith.constant 1.000000e+00 : f32
    %36 = vector.broadcast %cst_18 : f32 to vector<128x1xf32>
    %37 = arith.divf %36, %35 : vector<128x1xf32>
    %38 = vector.broadcast %37 : vector<128x1xf32> to vector<128x128xf32>
    %39 = arith.mulf %33, %38 : vector<128x128xf32>
    %40 = arith.truncf %39 : vector<128x128xf32> to vector<128x128xbf16>
    %c0_19 = arith.constant 0 : index
    %c0_20 = arith.constant 0 : index
    %c0_21 = arith.constant 0 : index
    %c0_22 = arith.constant 0 : index
    %41 = vector.load %arg9[%c0_19, %c0_20, %c0_21, %c0_22] : memref<1x4x128x128xbf16, #tpu.memory_space<vmem>>, vector<1x1x128x128xbf16>
    %42 = vector.shape_cast %41 : vector<1x1x128x128xbf16> to vector<128x128xbf16>
    %43 = vector.shape_cast %40 : vector<128x128xbf16> to vector<1x1x128x128xbf16>
    tpu.vector_store %arg9[%c0_19, %c0_20, %c0_21, %c0_22], %43 {strides = array<i32>} : memref<1x4x128x128xbf16, #tpu.memory_space<vmem>>, vector<1x1x128x128xbf16>,
    %44 = vector.extract_strided_slice %11 {offsets = [0, 8], sizes = [128, 8], strides = [1, 1]} : vector<128x32xf32> to vector<128x8xf32>
    %45 = vector.extract_strided_slice %12 {offsets = [0, 8], sizes = [128, 8], strides = [1, 1]} : vector<128x32xf32> to vector<128x8xf32>
    %cst_23 = arith.constant dense<0.000000e+00> : vector<128x128xf32>
    %46 = tpu.matmul %44, %45, %cst_23 {dimension_numbers = #tpu.dot_dimension_numbers<[1], [1], [0], [0], [0, 0, 1, 0], [], []>} : vector<128x8xf32>, vector<128x8xf32>, vector<128x128xf32> -> vector<128x128xf32>
    %47 = vector.shape_cast %22 : vector<1x128xf32> to vector<1x128xf32>
    %48 = vector.broadcast %47 : vector<1x128xf32> to vector<128x128xf32>
    %49 = arith.select %16, %46, %48 : vector<128x128xi1>, vector<128x128xf32>
    %cst_24 = arith.constant dense<0xFF800000> : vector<128xf32>
    %50 = vector.multi_reduction <maximumf>, %49, %cst_24 [1] : vector<128x128xf32> to vector<128xf32>
    %51 = vector.shape_cast %50 : vector<128xf32> to vector<128x1xf32>
    %52 = vector.broadcast %51 : vector<128x1xf32> to vector<128x128xf32>
    %53 = arith.subf %49, %52 : vector<128x128xf32>
    %54 = math.exp %53 : vector<128x128xf32>
    %cst_25 = arith.constant dense<0.000000e+00> : vector<128xf32>
    %55 = vector.multi_reduction <add>, %54, %cst_25 [1] : vector<128x128xf32> to vector<128xf32>
    %56 = vector.shape_cast %55 : vector<128xf32> to vector<128x1xf32>
    %cst_26 = arith.constant 1.000000e+00 : f32
    %57 = vector.broadcast %cst_26 : f32 to vector<128x1xf32>
    %58 = arith.divf %57, %56 : vector<128x1xf32>
    %59 = vector.broadcast %58 : vector<128x1xf32> to vector<128x128xf32>
    %60 = arith.mulf %54, %59 : vector<128x128xf32>
    %61 = arith.truncf %60 : vector<128x128xf32> to vector<128x128xbf16>
    %c0_27 = arith.constant 0 : index
    %c1 = arith.constant 1 : index
    %c0_28 = arith.constant 0 : index
    %c0_29 = arith.constant 0 : index
    %62 = vector.load %arg9[%c0_27, %c1, %c0_28, %c0_29] : memref<1x4x128x128xbf16, #tpu.memory_space<vmem>>, vector<1x1x128x128xbf16>
    %63 = vector.shape_cast %62 : vector<1x1x128x128xbf16> to vector<128x128xbf16>
    %64 = vector.shape_cast %61 : vector<128x128xbf16> to vector<1x1x128x128xbf16>
    tpu.vector_store %arg9[%c0_27, %c1, %c0_28, %c0_29], %64 {strides = array<i32>} : memref<1x4x128x128xbf16, #tpu.memory_space<vmem>>, vector<1x1x128x128xbf16>,
    %65 = vector.extract_strided_slice %11 {offsets = [0, 16], sizes = [128, 8], strides = [1, 1]} : vector<128x32xf32> to vector<128x8xf32>
    %66 = vector.extract_strided_slice %12 {offsets = [0, 16], sizes = [128, 8], strides = [1, 1]} : vector<128x32xf32> to vector<128x8xf32>
    %cst_30 = arith.constant dense<0.000000e+00> : vector<128x128xf32>
    %67 = tpu.matmul %65, %66, %cst_30 {dimension_numbers = #tpu.dot_dimension_numbers<[1], [1], [0], [0], [0, 0, 1, 0], [], []>} : vector<128x8xf32>, vector<128x8xf32>, vector<128x128xf32> -> vector<128x128xf32>
    %68 = vector.shape_cast %22 : vector<1x128xf32> to vector<1x128xf32>
    %69 = vector.broadcast %68 : vector<1x128xf32> to vector<128x128xf32>
    %70 = arith.select %16, %67, %69 : vector<128x128xi1>, vector<128x128xf32>
    %cst_31 = arith.constant dense<0xFF800000> : vector<128xf32>
    %71 = vector.multi_reduction <maximumf>, %70, %cst_31 [1] : vector<128x128xf32> to vector<128xf32>
    %72 = vector.shape_cast %71 : vector<128xf32> to vector<128x1xf32>
    %73 = vector.broadcast %72 : vector<128x1xf32> to vector<128x128xf32>
    %74 = arith.subf %70, %73 : vector<128x128xf32>
    %75 = math.exp %74 : vector<128x128xf32>
    %cst_32 = arith.constant dense<0.000000e+00> : vector<128xf32>
    %76 = vector.multi_reduction <add>, %75, %cst_32 [1] : vector<128x128xf32> to vector<128xf32>
    %77 = vector.shape_cast %76 : vector<128xf32> to vector<128x1xf32>
    %cst_33 = arith.constant 1.000000e+00 : f32
    %78 = vector.broadcast %cst_33 : f32 to vector<128x1xf32>
    %79 = arith.divf %78, %77 : vector<128x1xf32>
    %80 = vector.broadcast %79 : vector<128x1xf32> to vector<128x128xf32>
    %81 = arith.mulf %75, %80 : vector<128x128xf32>
    %82 = arith.truncf %81 : vector<128x128xf32> to vector<128x128xbf16>
    %c0_34 = arith.constant 0 : index
    %c2 = arith.constant 2 : index
    %c0_35 = arith.constant 0 : index
    %c0_36 = arith.constant 0 : index
    %83 = vector.load %arg9[%c0_34, %c2, %c0_35, %c0_36] : memref<1x4x128x128xbf16, #tpu.memory_space<vmem>>, vector<1x1x128x128xbf16>
    %84 = vector.shape_cast %83 : vector<1x1x128x128xbf16> to vector<128x128xbf16>
    %85 = vector.shape_cast %82 : vector<128x128xbf16> to vector<1x1x128x128xbf16>
    tpu.vector_store %arg9[%c0_34, %c2, %c0_35, %c0_36], %85 {strides = array<i32>} : memref<1x4x128x128xbf16, #tpu.memory_space<vmem>>, vector<1x1x128x128xbf16>,
    %86 = vector.extract_strided_slice %11 {offsets = [0, 24], sizes = [128, 8], strides = [1, 1]} : vector<128x32xf32> to vector<128x8xf32>
    %87 = vector.extract_strided_slice %12 {offsets = [0, 24], sizes = [128, 8], strides = [1, 1]} : vector<128x32xf32> to vector<128x8xf32>
    %cst_37 = arith.constant dense<0.000000e+00> : vector<128x128xf32>
    %88 = tpu.matmul %86, %87, %cst_37 {dimension_numbers = #tpu.dot_dimension_numbers<[1], [1], [0], [0], [0, 0, 1, 0], [], []>} : vector<128x8xf32>, vector<128x8xf32>, vector<128x128xf32> -> vector<128x128xf32>
    %89 = vector.shape_cast %22 : vector<1x128xf32> to vector<1x128xf32>
    %90 = vector.broadcast %89 : vector<1x128xf32> to vector<128x128xf32>
    %91 = arith.select %16, %88, %90 : vector<128x128xi1>, vector<128x128xf32>
    %cst_38 = arith.constant dense<0xFF800000> : vector<128xf32>
    %92 = vector.multi_reduction <maximumf>, %91, %cst_38 [1] : vector<128x128xf32> to vector<128xf32>
    %93 = vector.shape_cast %92 : vector<128xf32> to vector<128x1xf32>
    %94 = vector.broadcast %93 : vector<128x1xf32> to vector<128x128xf32>
    %95 = arith.subf %91, %94 : vector<128x128xf32>
    %96 = math.exp %95 : vector<128x128xf32>
    %cst_39 = arith.constant dense<0.000000e+00> : vector<128xf32>
    %97 = vector.multi_reduction <add>, %96, %cst_39 [1] : vector<128x128xf32> to vector<128xf32>
    %98 = vector.shape_cast %97 : vector<128xf32> to vector<128x1xf32>
    %cst_40 = arith.constant 1.000000e+00 : f32
    %99 = vector.broadcast %cst_40 : f32 to vector<128x1xf32>
    %100 = arith.divf %99, %98 : vector<128x1xf32>
    %101 = vector.broadcast %100 : vector<128x1xf32> to vector<128x128xf32>
    %102 = arith.mulf %96, %101 : vector<128x128xf32>
    %103 = arith.truncf %102 : vector<128x128xf32> to vector<128x128xbf16>
    %c0_41 = arith.constant 0 : index
    %c3 = arith.constant 3 : index
    %c0_42 = arith.constant 0 : index
    %c0_43 = arith.constant 0 : index
    %104 = vector.load %arg9[%c0_41, %c3, %c0_42, %c0_43] : memref<1x4x128x128xbf16, #tpu.memory_space<vmem>>, vector<1x1x128x128xbf16>
    %105 = vector.shape_cast %104 : vector<1x1x128x128xbf16> to vector<128x128xbf16>
    %106 = vector.shape_cast %103 : vector<128x128xbf16> to vector<1x1x128x128xbf16>
    tpu.vector_store %arg9[%c0_41, %c3, %c0_42, %c0_43], %106 {strides = array<i32>} : memref<1x4x128x128xbf16, #tpu.memory_space<vmem>>, vector<1x1x128x128xbf16>,
    return
  }
  func.func @transform_0(%arg0: i32, %arg1: i32) -> (i32, i32, i32) {
    %c0_i32 = arith.constant 0 : i32
    %c0_i32_0 = arith.constant 0 : i32
    return %arg0, %arg1, %c0_i32 : i32, i32, i32
  }
  func.func @transform_1(%arg0: i32, %arg1: i32) -> (i32, i32, i32) {
    %c0_i32 = arith.constant 0 : i32
    %c0_i32_0 = arith.constant 0 : i32
    %c0_i32_1 = arith.constant 0 : i32
    return %arg0, %c0_i32, %c0_i32_0 : i32, i32, i32
  }
  func.func @transform_2(%arg0: i32, %arg1: i32) -> (i32, i32) {
    %c0_i32 = arith.constant 0 : i32
    %c0_i32_0 = arith.constant 0 : i32
    %c0_i32_1 = arith.constant 0 : i32
    return %c0_i32, %c0_i32_0 : i32, i32
  }
  func.func @transform_3(%arg0: i32, %arg1: i32) -> (i32, i32) {
    %c0_i32 = arith.constant 0 : i32
    %c0_i32_0 = arith.constant 0 : i32
    %c0_i32_1 = arith.constant 0 : i32
    return %c0_i32, %c0_i32_0 : i32, i32
  }
  func.func @transform_4(%arg0: i32, %arg1: i32) -> (i32, i32) {
    %c0_i32 = arith.constant 0 : i32
    %c0_i32_0 = arith.constant 0 : i32
    %c0_i32_1 = arith.constant 0 : i32
    return %c0_i32, %c0_i32_0 : i32, i32
  }
  func.func @transform_5(%arg0: i32, %arg1: i32) -> (i32, i32) {
    %c0_i32 = arith.constant 0 : i32
    %c0_i32_0 = arith.constant 0 : i32
    %c0_i32_1 = arith.constant 0 : i32
    return %c0_i32, %c0_i32_0 : i32, i32
  }
  func.func @transform_6(%arg0: i32, %arg1: i32) -> (i32, i32, i32) {
    %c0_i32 = arith.constant 0 : i32
    %c0_i32_0 = arith.constant 0 : i32
    return %arg0, %arg1, %c0_i32 : i32, i32, i32
  }
  func.func @transform_7(%arg0: i32, %arg1: i32) -> (i32, i32, i32, i32) {
    %c0_i32 = arith.constant 0 : i32
    %c0_i32_0 = arith.constant 0 : i32
    %c0_i32_1 = arith.constant 0 : i32
    return %arg0, %c0_i32, %arg1, %c0_i32_0 : i32, i32, i32, i32
  }
}

</mosaic_0001>

<bundles_post_ra>
// kernel: tpu_custom_call.1
= control target key start
LH: loop header
LB: loop body
LE: loop exit
PB: predicated region body
PF: predicated region fallthrough
CT: control target
= control target key end

     0   :  { %12 = vsyncpa [#allocation4], 0  ;;  %s7129_s0 = inlined_call_operand.vmem [shape: f32[2,128,32], index: 0, kind: input, shape index: {}]   ;;  %s7130_s1 = inlined_call_operand.vmem [shape: f32[2,128,32], index: 1, kind: input, shape index: {}]   ;;  %s7131_s2 = inlined_call_operand.vmem [shape: f32[32,32], index: 2, kind: input, shape index: {}]   ;;  %s7132_s3 = inlined_call_operand.vmem [shape: f32[1,32], index: 3, kind: input, shape index: {}]   ;;  %s7133_s4 = inlined_call_operand.vmem [shape: f32[32,32], index: 4, kind: input, shape index: {}]   ;;  %s7134_s5 = inlined_call_operand.vmem [shape: f32[1,32], index: 5, kind: input, shape index: {}]   ;;  %s7135_s6 = inlined_call_operand.vmem [shape: s8[2,128,128], index: 6, kind: input, shape index: {}]   ;;  %s7136_s7 = inlined_call_operand.hbm [shape: bf16[2,4,128,128], index: 7, kind: output, shape index: {}]  }
   0x1   :  { %14 = vsyncpa [#allocation4 + $0x1], 0  ;;  %s4232_s24 = smov 0   ;;  %s4234_s25 = smov 0  }
   0x2   :  { %s4236_s26 = smov 0   ;;  %s4238_s27 = smov 0  }
   0x3   :  { %s4240_s28 = smov 0   ;;  %s4242_s29 = smov 0  }
   0x4 LB: > { %s3357_s30 = sadd.s32 4294967295, %s4183_s29   ;;  %s3358_s8 = sadd.s32 4294967294, %s4183_s29   ;;  %s4183_s29 = sphi %s4242_s29, %s20_s29   ;;  %s4179_s28 = sphi %s4240_s28, %s7482_s28   ;;  %s4175_s27 = sphi %s4238_s27, %s7481_s27   ;;  %s4171_s26 = sphi %s4236_s26, %s7480_s26   ;;  %s4167_s25 = sphi %s4234_s25, %s7479_s25   ;;  %s4163_s24 = sphi %s4232_s24, %s7478_s24  }
   0x5   : > { %s32_s9 = sadd.s32 1, %s4179_s28  ;;  %s207_s10 = sadd.s32 1, %s4171_s26 }
   0x6   : > { %p34_p0 = scmp.ge.s32.totalorder %s32_s9, 2  ;;  %p217_p1 = scmp.ne.s32.totalorder %s4171_s26, %s4167_s25 }
   0x7   : > { %p218_p2 = scmp.eq.s32.totalorder %s3357_s30, 1  ;;  %p223_p3 = scmp.ne.s32.totalorder %s4167_s25, %s4163_s24 }
   0x8   : > { %s7484_s9 = smov (%p34_p0, %s32_s9), 0  ;;  %p224_p5 = scmp.eq.s32.totalorder %s3358_s8, 1 }
   0x9   : > { %p4272_p4 = por %p218_p2, %p217_p1  ;;  %s202_s12 = ssub.s32 %s4179_s28, %s7484_s9 }
   0xa   : > { %p3361_p6 = scmp.ge.s32.totalorder %s4183_s29, 1  ;;  %p205_p7 = scmp.eq.s32.totalorder %s202_s12, 0 }
   0xb   : > { %p4279_p8 = por %p224_p5, %p223_p3  ;;  %p288_p9 = scmp.lt.s32.totalorder %s4183_s29, 3 }
   0xc   : > { %s4285_s14 = scalar_select %p205_p7, %s4171_s26, %s207_s10  }
   0xd   : > { %p289_p10 = pnand %p3361_p6, %p288_p9 }
   0xf   : > { %292 = sbr.rel (%p289_p10) target bundleno = 1120 (0x460), region = 48 }
  0x14   : > { %v389_v0 = vld [vmem:[%s7133_s4 + $0x18] sm:$0xff]  ;;  %v388_v2 = vld [vmem:[%s7133_s4 + $0x10] sm:$0xff]  ;;  %p339_p11 = scmp.lt.s32.totalorder %s4175_s27, 1  ;;  %v387_v4 = vld [vmem:[%s7133_s4 + $0x8] sm:$0xff]  ;;  %vm394_vm0 = vcmask 261120   ;;  %s4185_s18 = smov 120  }
  0x15   : > { %v543_v1 = vld [vmem:[%s7131_s2 + $0x18] sm:$0xff]  ;;  %455 = vmatpush.msra.mxu0 %v389_v0  ;;  %3777 = vmatpush.msra.mxu2 %v389_v0  ;;  %v542_v3 = vld [vmem:[%s7131_s2 + $0x10] sm:$0xff]  ;;  %v541_v5 = vld [vmem:[%s7131_s2 + $0x8] sm:$0xff]  ;;  %s4186_s19 = smov 104   ;;  %s4187_s20 = smov 112   ;;  %vm706_vm1 = vcmask 64512  }
  0x16   : > { %609 = vmatpush.msra.mxu1 %v543_v1  ;;  %3781 = vmatpush.msra.mxu3 %v543_v1  ;;  %s4304_s8 = scalar_select %p339_p11, %s4175_s27, 1  ;;  %v386_v6 = vld [vmem:[%s7133_s4] sm:$0xff] }
  0x17   : > { %456 = vmatpush.msra.mxu0 %v388_v2  ;;  %3778 = vmatpush.msra.mxu2 %v388_v2  ;;  %v540_v7 = vld [vmem:[%s7131_s2] sm:$0xff]  ;;  %s3585_s15 = sshll.u32 %s4175_s27, 8 }
  0x18   : > { %610 = vmatpush.msra.mxu1 %v542_v3  ;;  %3782 = vmatpush.msra.mxu3 %v542_v3  ;;  %s3582_s17 = sshll.u32 %s4304_s8, 7  ;;  %v4393_v40 = vld [vmem:[%s7134_s5] ss:$0 sm:$0xff]  ;;  %s3584_s21 = sshll.u32 %s4304_s8, 5 }
  0x19   : > { %457 = vmatpush.msra.mxu0 %v387_v4  ;;  %3779 = vmatpush.msra.mxu2 %v387_v4  ;;  %s4319_s22 = scalar_lea.vmem %s7130_s1, %s3582_s17  ;;  %s4324_s10 = scalar_lea.vmem %s7129_s0, %s3582_s17  ;;  %v4398_v41 = vld [vmem:[%s7132_s3] ss:$0 sm:$0xff] }
  0x1a   : > { %611 = vmatpush.msra.mxu1 %v541_v5  ;;  %3783 = vmatpush.msra.mxu3 %v541_v5  ;;  %v370_v8 = vld [vmem:[%s4319_s22] sm:$0xff]  ;;  %v371_v12 = vld [vmem:[%s4319_s22 + $0x8] sm:$0xff]  ;;  %v372_v16 = vld [vmem:[%s4319_s22 + $0x10] sm:$0xff]  ;;  %s4818_s30 = scalar_lea.vmem %s7135_s6, %s3584_s21  ;;  %s335_s8 = sand.u32 1, %s4167_s25  }
  0x1b   : > { %v378_v9 = vld [vmem:[%s4319_s22 + $0x40] sm:$0xff]  ;;  %458 = vmatpush.msra.mxu0 %v386_v6  ;;  %3780 = vmatpush.msra.mxu2 %v386_v6  ;;  %v379_v13 = vld [vmem:[%s4319_s22 + $0x48] sm:$0xff]  ;;  %v380_v17 = vld [vmem:[%s4319_s22 + $0x50] sm:$0xff] }
  0x1c   : > { %v524_v10 = vld [vmem:[%s4324_s10] sm:$0xff]  ;;  %612 = vmatpush.msra.mxu1 %v540_v7  ;;  %3369 = vmatmul.msk.f32.vlgmr.msra.gmra.mxu0 %vm394_vm0, %v370_v8  ;;  %v525_v14 = vld [vmem:[%s4324_s10 + $0x8] sm:$0xff]  ;;  %v526_v18 = vld [vmem:[%s4324_s10 + $0x10] sm:$0xff] }
  0x1d   : > { %v532_v11 = vld [vmem:[%s4324_s10 + $0x40] sm:$0xff]  ;;  %3377 = vmatmul.msk.f32.vlgmr.msra.gmra.mxu2 %vm394_vm0, %v378_v9  ;;  %3385 = vmatmul.msk.f32.vlgmr.msra.gmra.mxu1 %vm394_vm0, %v524_v10  ;;  %v533_v15 = vld [vmem:[%s4324_s10 + $0x48] sm:$0xff]  ;;  %v534_v19 = vld [vmem:[%s4324_s10 + $0x50] sm:$0xff] }
  0x1e   : > { %3784 = vmatpush.msra.mxu3 %v540_v7  ;;  %v381_v20 = vld [vmem:[%s4319_s22 + $0x58] sm:$0xff]  ;;  %v382_v24 = vld [vmem:[%s4319_s22 + $0x60] sm:$0xff]  ;;  %v383_v28 = vld [vmem:[%s4319_s22 + $0x68] sm:$0xff] }
  0x1f   : > { %3393 = vmatmul.msk.f32.vlgmr.msra.gmra.mxu3 %vm394_vm0, %v532_v11  ;;  %v527_v21 = vld [vmem:[%s4324_s10 + $0x18] sm:$0xff]  ;;  %v528_v25 = vld [vmem:[%s4324_s10 + $0x20] sm:$0xff]  ;;  %v529_v29 = vld [vmem:[%s4324_s10 + $0x28] sm:$0xff] }
  0x20   : > { %v373_v22 = vld [vmem:[%s4319_s22 + $0x18] sm:$0xff]  ;;  %v374_v26 = vld [vmem:[%s4319_s22 + $0x20] sm:$0xff]  ;;  %v375_v30 = vld [vmem:[%s4319_s22 + $0x28] sm:$0xff] }
  0x21   : > { %v535_v23 = vld [vmem:[%s4324_s10 + $0x58] sm:$0xff]  ;;  %v536_v27 = vld [vmem:[%s4324_s10 + $0x60] sm:$0xff]  ;;  %v537_v31 = vld [vmem:[%s4324_s10 + $0x68] sm:$0xff] }
  0x22   : > { %v384_v32 = vld [vmem:[%s4319_s22 + $0x70] sm:$0xff]  ;;  %v385_v35 = vld [vmem:[%s4319_s22 + $0x78] sm:$0xff] }
  0x23   : > { %v530_v33 = vld [vmem:[%s4324_s10 + $0x30] sm:$0xff]  ;;  %v377_v36 = vld [vmem:[%s4319_s22 + $0x38] sm:$0xff] }
  0x24   : > { %3370 = vmatmul.msk.f32.gmra.mxu0 %vm394_vm0, %v371_v12  ;;  %v376_v34 = vld [vmem:[%s4319_s22 + $0x30] sm:$0xff]  ;;  %v539_v38 = vld [vmem:[%s4324_s10 + $0x78] sm:$0xff] }
  0x25   : > { %3378 = vmatmul.msk.f32.gmra.mxu2 %vm394_vm0, %v379_v13  ;;  %3386 = vmatmul.msk.f32.gmra.mxu1 %vm394_vm0, %v525_v14  ;;  %v538_v37 = vld [vmem:[%s4324_s10 + $0x70] sm:$0xff]  ;;  %v531_v39 = vld [vmem:[%s4324_s10 + $0x38] sm:$0xff]  ;;  %s3362_s10 = sshll.u32 %s335_s8, 8 }
  0x26   : > { %s5641_s12 = scalar_lea.vmem [#allocation3], %s3362_s10  ;;  %s4125_s10 = scalar_lea.hbm %s7136_s7, 512 }
  0x27   : > { %3394 = vmatmul.msk.f32.gmra.mxu3 %vm394_vm0, %v533_v15  ;;  %s3245_s27 = sshll.u32 %s5641_s12, 4  ;;  %s3246_s27 = int_to_ptr.vmem [resolvable:$true] %s3245_s27 }
  0x2c   : > { %3371 = vmatmul.msk.f32.gmra.mxu0 %vm394_vm0, %v372_v16 }
  0x2d   : > { %3379 = vmatmul.msk.f32.gmra.mxu2 %vm394_vm0, %v380_v17  ;;  %3387 = vmatmul.msk.f32.gmra.mxu1 %vm394_vm0, %v526_v18 }
  0x2f   : > { %3395 = vmatmul.msk.f32.gmra.mxu3 %vm394_vm0, %v534_v19 }
  0x34   : > { %3372 = vmatmul.msk.f32.gmra.mxu0 %vm394_vm0, %v373_v22 }
  0x35   : > { %3380 = vmatmul.msk.f32.gmra.mxu2 %vm394_vm0, %v381_v20  ;;  %3388 = vmatmul.msk.f32.gmra.mxu1 %vm394_vm0, %v527_v21 }
  0x37   : > { %3396 = vmatmul.msk.f32.gmra.mxu3 %vm394_vm0, %v535_v23 }
  0x3c   : > { %3373 = vmatmul.msk.f32.gmra.mxu0 %vm394_vm0, %v374_v26 }
  0x3d   : > { %3381 = vmatmul.msk.f32.gmra.mxu2 %vm394_vm0, %v382_v24  ;;  %3389 = vmatmul.msk.f32.gmra.mxu1 %vm394_vm0, %v528_v25 }
  0x3f   : > { %3397 = vmatmul.msk.f32.gmra.mxu3 %vm394_vm0, %v536_v27 }
  0x44   : > { %3374 = vmatmul.msk.f32.gmra.mxu0 %vm394_vm0, %v375_v30 }
  0x45   : > { %3382 = vmatmul.msk.f32.gmra.mxu2 %vm394_vm0, %v383_v28  ;;  %3390 = vmatmul.msk.f32.gmra.mxu1 %vm394_vm0, %v529_v29 }
  0x47   : > { %3398 = vmatmul.msk.f32.gmra.mxu3 %vm394_vm0, %v537_v31 }
  0x4c   : > { %3375 = vmatmul.msk.f32.gmra.mxu0 %vm394_vm0, %v376_v34 }
  0x4d   : > { %3383 = vmatmul.msk.f32.gmra.mxu2 %vm394_vm0, %v384_v32  ;;  %3391 = vmatmul.msk.f32.gmra.mxu1 %vm394_vm0, %v530_v33 }
  0x4f   : > { %3399 = vmatmul.msk.f32.gmra.mxu3 %vm394_vm0, %v538_v37 }
  0x54   : > { %3376 = vmatmul.msk.f32.gmra.mxu0 %vm394_vm0, %v377_v36 }
  0x55   : > { %3384 = vmatmul.msk.f32.gmra.mxu2 %vm394_vm0, %v385_v35  ;;  %3392 = vmatmul.msk.f32.gmra.mxu1 %vm394_vm0, %v531_v39 }
  0x57   : > { %3400 = vmatmul.msk.f32.gmra.mxu3 %vm394_vm0, %v539_v38 }
  0x99   : > { %v460_v42 = vpop.f32.mrf.mxu0 }
  0x9a   : > { %v461_v43 = vadd.f32 %v4393_v40, %v460_v42  ;;  %v614_v44 = vpop.f32.mrf.mxu1 }
  0x9b   : > { %v615_v45 = vadd.f32 %v4398_v41, %v614_v44 }
  0x9c   : > { %508 = vst.msk [vmem:[#allocation2] sm:$0xff] %vm394_vm0, %v461_v43 }
  0x9d   : > { %v4403_v46 = vmul.f32 0.35355338, %v615_v45 }
  0x9f   : > { %1400 = vrot.lane.b32.xlu2 %v4403_v46, %s4185_s18 }
  0xa0   : > { %v484_v47 = vpop.f32.mrf.mxu2 }
  0xa1   : > { %v485_v48 = vadd.f32 %v4393_v40, %v484_v47  ;;  %v463_v49 = vpop.f32.mrf.mxu0 }
  0xa2   : > { %v638_v50 = vpop.f32.mrf.mxu3  ;;  %v464_v51 = vadd.f32 %v4393_v40, %v463_v49  ;;  %v617_v57 = vpop.f32.mrf.mxu1 }
  0xa3   : > { %516 = vst.msk [vmem:[#allocation2 + $0x40] sm:$0xff] %vm394_vm0, %v485_v48  ;;  %v639_v52 = vadd.f32 %v4398_v41, %v638_v50  ;;  %v4411_v53 = vld [vmem:[#allocation2] sm:$0xff]  ;;  %v618_v62 = vadd.f32 %v4398_v41, %v617_v57 }
  0xa4   : > { %2652 = vrot.lane.b32.xlu1 %v4411_v53, %s4186_s19  ;;  %1432 = vrot.lane.b32.xlu0 %v4411_v53, %s4185_s18  ;;  %509 = vst.msk [vmem:[#allocation2 + $0x8] sm:$0xff] %vm394_vm0, %v464_v51 }
  0xa5   : > { %v4418_v54 = vmul.f32 0.35355338, %v639_v52  ;;  %v4436_v1 = vmul.f32 0.35355338, %v618_v62 }
  0xa7   : > { %1416 = vrot.lane.b32.xlu2 %v4418_v54, %s4185_s18 }
  0xa8   : > { %v487_v55 = vpop.f32.mrf.mxu2 }
  0xa9   : > { %v488_v56 = vadd.f32 %v4393_v40, %v487_v55  ;;  %v466_v58 = vpop.f32.mrf.mxu0 }
  0xaa   : > { %v4423_v59 = vld [vmem:[#allocation2 + $0x40] sm:$0xff]  ;;  %v641_v60 = vpop.f32.mrf.mxu3  ;;  %v467_v61 = vadd.f32 %v4393_v40, %v466_v58  ;;  %v620_v9 = vpop.f32.mrf.mxu1 }
  0xab   : > { %517 = vst.msk [vmem:[#allocation2 + $0x48] sm:$0xff] %vm394_vm0, %v488_v56  ;;  %v642_v63 = vadd.f32 %v4398_v41, %v641_v60  ;;  %v4446_v4 = vld [vmem:[#allocation2 + $0x8] sm:$0xff]  ;;  %v621_v10 = vadd.f32 %v4398_v41, %v620_v9 }
  0xac   : > { %1448 = vrot.lane.b32.xlu1 %v4423_v59, %s4185_s18  ;;  %2042 = vrot.lane.b32.xlu0 %v4411_v53, %s4187_s20  ;;  %510 = vst.msk [vmem:[#allocation2 + $0x10] sm:$0xff] %vm394_vm0, %v467_v61 }
  0xad   : > { %v4438_v2 = vmul.f32 0.35355338, %v642_v63  ;;  %v4461_v13 = vmul.f32 0.35355338, %v621_v10 }
  0xaf   : > { %2058 = vrot.lane.b32.xlu2 %v4423_v59, %s4187_s20 }
  0xb0   : > { %v490_v0 = vpop.f32.mrf.mxu2 }
  0xb1   : > { %v491_v3 = vadd.f32 %v4393_v40, %v490_v0  ;;  %v469_v5 = vpop.f32.mrf.mxu0 }
  0xb2   : > { %v470_v7 = vadd.f32 %v4393_v40, %v469_v5  ;;  %v4465_v16 = vld [vmem:[#allocation2 + $0x48] sm:$0xff]  ;;  %v623_v18 = vpop.f32.mrf.mxu1  ;;  %v644_v24 = vpop.f32.mrf.mxu3 }
  0xb3   : > { %518 = vst.msk [vmem:[#allocation2 + $0x50] sm:$0xff] %vm394_vm0, %v491_v3  ;;  %v4473_v17 = vld [vmem:[#allocation2 + $0x10] sm:$0xff]  ;;  %v624_v19 = vadd.f32 %v4398_v41, %v623_v18  ;;  %v645_v26 = vadd.f32 %v4398_v41, %v644_v24 }
  0xb4   : > { %1418 = vrot.lane.b32.xlu1 %v4438_v2, %s4185_s18  ;;  %1402 = vrot.lane.b32.xlu0 %v4436_v1, %s4185_s18  ;;  %511 = vst.msk [vmem:[#allocation2 + $0x18] sm:$0xff] %vm394_vm0, %v470_v7 }
  0xb5   : > { %v4482_v25 = vmul.f32 0.35355338, %v624_v19  ;;  %v4491_v29 = vmul.f32 0.35355338, %v645_v26 }
  0xb7   : > { %1434 = vrot.lane.b32.xlu2 %v4446_v4, %s4185_s18 }
  0xb8   : > { %v493_v6 = vpop.f32.mrf.mxu2 }
  0xb9   : > { %v494_v8 = vadd.f32 %v4393_v40, %v493_v6  ;;  %v472_v11 = vpop.f32.mrf.mxu0 }
  0xba   : > { %v473_v14 = vadd.f32 %v4393_v40, %v472_v11  ;;  %v688_v32 = vld [vmem:[#allocation2 + $0x50] sm:$0xff]  ;;  %v647_v37 = vpop.f32.mrf.mxu3  ;;  %v626_v47 = vpop.f32.mrf.mxu1 }
  0xbb   : > { %519 = vst.msk [vmem:[#allocation2 + $0x58] sm:$0xff] %vm394_vm0, %v494_v8  ;;  %v648_v38 = vadd.f32 %v4398_v41, %v647_v37  ;;  %v681_v39 = vld [vmem:[#allocation2 + $0x18] sm:$0xff]  ;;  %v627_v50 = vadd.f32 %v4398_v41, %v626_v47 }
  0xbc   : > { %2044 = vrot.lane.b32.xlu1 %v4446_v4, %s4187_s20  ;;  %2668 = vrot.lane.b32.xlu0 %v4423_v59, %s4186_s19  ;;  %512 = vst.msk [vmem:[#allocation2 + $0x20] sm:$0xff] %vm394_vm0, %v473_v14 }
  0xbd   : > { %v4513_v43 = vmul.f32 0.35355338, %v648_v38  ;;  %v4535_v52 = vmul.f32 0.35355338, %v627_v50 }
  0xbf   : > { %2654 = vrot.lane.b32.xlu2 %v4446_v4, %s4186_s19 }
  0xc0   : > { %v496_v12 = vpop.f32.mrf.mxu2 }
  0xc1   : > { %v497_v15 = vadd.f32 %v4393_v40, %v496_v12  ;;  %v475_v20 = vpop.f32.mrf.mxu0 }
  0xc2   : > { %v476_v22 = vadd.f32 %v4393_v40, %v475_v20  ;;  %v689_v45 = vld [vmem:[#allocation2 + $0x58] sm:$0xff]  ;;  %v650_v48 = vpop.f32.mrf.mxu3  ;;  %v629_v57 = vpop.f32.mrf.mxu1 }
  0xc3   : > { %520 = vst.msk [vmem:[#allocation2 + $0x60] sm:$0xff] %vm394_vm0, %v497_v15  ;;  %v651_v51 = vadd.f32 %v4398_v41, %v650_v48  ;;  %v682_v56 = vld [vmem:[#allocation2 + $0x20] sm:$0xff]  ;;  %v630_v58 = vadd.f32 %v4398_v41, %v629_v57 }
  0xc4   : > { %1404 = vrot.lane.b32.xlu1 %v4461_v13, %s4185_s18  ;;  %1450 = vrot.lane.b32.xlu0 %v4465_v16, %s4185_s18  ;;  %513 = vst.msk [vmem:[#allocation2 + $0x28] sm:$0xff] %vm394_vm0, %v476_v22 }
  0xc5   : > { %v4537_v55 = vmul.f32 0.35355338, %v651_v51  ;;  %v4556_v61 = vmul.f32 0.35355338, %v630_v58 }
  0xc7   : > { %2046 = vrot.lane.b32.xlu2 %v4473_v17, %s4187_s20 }
  0xc8   : > { %v499_v21 = vpop.f32.mrf.mxu2 }
  0xc9   : > { %v500_v23 = vadd.f32 %v4393_v40, %v499_v21  ;;  %v478_v27 = vpop.f32.mrf.mxu0 }
  0xca   : > { %v479_v30 = vadd.f32 %v4393_v40, %v478_v27  ;;  %v690_v49 = vld [vmem:[#allocation2 + $0x60] sm:$0xff]  ;;  %v632_v0 = vpop.f32.mrf.mxu1  ;;  %v653_v3 = vpop.f32.mrf.mxu3 }
  0xcb   : > { %521 = vst.msk [vmem:[#allocation2 + $0x68] sm:$0xff] %vm394_vm0, %v500_v23  ;;  %v633_v5 = vadd.f32 %v4398_v41, %v632_v0  ;;  %v654_v6 = vadd.f32 %v4398_v41, %v653_v3 }
  0xcc   : > { %2670 = vrot.lane.b32.xlu1 %v4465_v16, %s4186_s19  ;;  %2060 = vrot.lane.b32.xlu0 %v4465_v16, %s4187_s20  ;;  %514 = vst.msk [vmem:[#allocation2 + $0x30] sm:$0xff] %vm394_vm0, %v479_v30 }
  0xcd   : > { %v4576_v8 = vmul.f32 0.35355338, %v633_v5  ;;  %v4578_v9 = vmul.f32 0.35355338, %v654_v6 }
  0xcf   : > { %1406 = vrot.lane.b32.xlu2 %v4482_v25, %s4185_s18 }
  0xd0   : > { %v502_v28 = vpop.f32.mrf.mxu2 }
  0xd1   : > { %v503_v31 = vadd.f32 %v4393_v40, %v502_v28  ;;  %v481_v33 = vpop.f32.mrf.mxu0 }
  0xd2   : > { %v482_v35 = vadd.f32 %v4393_v40, %v481_v33  ;;  %v4525_v44 = vld [vmem:[#allocation2 + $0x68] sm:$0xff]  ;;  %v656_v14 = vpop.f32.mrf.mxu3 }
  0xd3   : > { %522 = vst.msk [vmem:[#allocation2 + $0x70] sm:$0xff] %vm394_vm0, %v503_v31  ;;  %v684_v62 = vld [vmem:[#allocation2 + $0x30] sm:$0xff] }
  0xd4   : > { %1436 = vrot.lane.b32.xlu1 %v4473_v17, %s4185_s18  ;;  %1420 = vrot.lane.b32.xlu0 %v4491_v29, %s4185_s18  ;;  %515 = vst.msk [vmem:[#allocation2 + $0x38] sm:$0xff] %vm394_vm0, %v482_v35 }
  0xd7   : > { %1452 = vrot.lane.b32.xlu2 %v688_v32, %s4185_s18 }
  0xd8   : > { %v505_v34 = vpop.f32.mrf.mxu2 }
  0xd9   : > { %v506_v36 = vadd.f32 %v4393_v40, %v505_v34 }
  0xda   : > { %v4519_v40 = vld [vmem:[#allocation2 + $0x70] sm:$0xff]  ;;  %v659_v21 = vpop.f32.mrf.mxu3 }
  0xdb   : > { %523 = vst.msk [vmem:[#allocation2 + $0x78] sm:$0xff] %vm394_vm0, %v506_v36  ;;  %v4554_v60 = vld [vmem:[#allocation2 + $0x38] sm:$0xff]  ;;  %v660_v23 = vadd.f32 %v4398_v41, %v659_v21 }
  0xdc   : > { %2062 = vrot.lane.b32.xlu1 %v688_v32, %s4187_s20  ;;  %2656 = vrot.lane.b32.xlu0 %v4473_v17, %s4186_s19 }
  0xdd   : > { %v4638_v30 = vmul.f32 0.35355338, %v660_v23 }
  0xdf   : > { %2672 = vrot.lane.b32.xlu2 %v688_v32, %s4186_s19 }
  0xe2   : > { %v4511_v42 = vld [vmem:[#allocation2 + $0x78] sm:$0xff] }
  0xe3   : > { %3401 = vmatpush.xpose.msk.msrb.mxu2 %vm706_vm1, %v4511_v42 }
  0xe4   : > { %2658 = vrot.lane.b32.xlu1 %v681_v39, %s4186_s19  ;;  %1438 = vrot.lane.b32.xlu0 %v681_v39, %s4185_s18 }
  0xe7   : > { %3402 = vmatpush.xpose.msk.msrb.mxu2 %vm706_vm1, %v4519_v40  ;;  %1422 = vrot.lane.b32.xlu2 %v4513_v43, %s4185_s18 }
  0xeb   : > { %3403 = vmatpush.xpose.msk.msrb.mxu2 %vm706_vm1, %v4525_v44 }
  0xec   : > { %1454 = vrot.lane.b32.xlu1 %v689_v45, %s4185_s18  ;;  %2048 = vrot.lane.b32.xlu0 %v681_v39, %s4187_s20 }
  0xef   : > { %3404 = vmatpush.xpose.msk.msrb.mxu2 %vm706_vm1, %v690_v49  ;;  %2064 = vrot.lane.b32.xlu2 %v689_v45, %s4187_s20 }
  0xf3   : > { %3405 = vmatpush.xpose.msk.msrb.mxu2 %vm706_vm1, %v689_v45 }
  0xf4   : > { %1424 = vrot.lane.b32.xlu1 %v4537_v55, %s4185_s18  ;;  %1408 = vrot.lane.b32.xlu0 %v4535_v52, %s4185_s18 }
  0xf7   : > { %3406 = vmatpush.xpose.msk.msrb.mxu2 %vm706_vm1, %v688_v32  ;;  %1440 = vrot.lane.b32.xlu2 %v682_v56, %s4185_s18 }
  0xf9   : > { %v4562_v63 = vpop.permute.xlu2 %1400 }
  0xfb   : > { %3407 = vmatpush.xpose.msk.msrb.mxu2 %vm706_vm1, %v4465_v16 }
  0xfc   : > { %2050 = vrot.lane.b32.xlu1 %v682_v56, %s4187_s20  ;;  %2674 = vrot.lane.b32.xlu0 %v689_v45, %s4186_s19 }
  0xff   : > { %3408 = vmatpush.xpose.msk.msrb.mxu2 %vm706_vm1, %v4423_v59  ;;  %2660 = vrot.lane.b32.xlu2 %v682_v56, %s4186_s19  ;;  %v683_v59 = vld [vmem:[#allocation2 + $0x28] sm:$0xff] }
 0x101   : > { %v4572_v7 = vpop.permute.xlu2 %1416 }
 0x102   : > { %7192 = vst [vmem:[#allocation6_spill] sm:$0xff] %v4572_v7  ;;  %v702_v7 = vlaneseq }
 0x103   : > { %3409 = vmatpush.xpose.msk.msrb.mxu2 %vm706_vm1, %v4554_v60 }
 0x104   : > { %2676 = vrot.lane.b32.xlu1 %v690_v49, %s4186_s19  ;;  %1456 = vrot.lane.b32.xlu0 %v690_v49, %s4185_s18 }
 0x107   : > { %3410 = vmatpush.xpose.msk.msrb.mxu2 %vm706_vm1, %v684_v62  ;;  %1410 = vrot.lane.b32.xlu2 %v4556_v61, %s4185_s18 }
 0x109   : > { %v4593_v12 = vpop.permute.xlu2 %2058 }
 0x10b   : > { %3411 = vmatpush.xpose.msk.msrb.mxu2 %vm706_vm1, %v683_v59 }
 0x10c   : > { %1442 = vrot.lane.b32.xlu1 %v683_v59, %s4185_s18  ;;  %2066 = vrot.lane.b32.xlu0 %v690_v49, %s4187_s20 }
 0x10f   : > { %3412 = vmatpush.xpose.msk.msrb.mxu2 %vm706_vm1, %v682_v56  ;;  %2052 = vrot.lane.b32.xlu2 %v683_v59, %s4187_s20 }
 0x113   : > { %3413 = vmatpush.xpose.msk.msrb.mxu2 %vm706_vm1, %v681_v39 }
 0x114   : > { %1412 = vrot.lane.b32.xlu1 %v4576_v8, %s4185_s18  ;;  %1426 = vrot.lane.b32.xlu0 %v4578_v9, %s4185_s18 }
 0x116   : > { %v4585_v10 = vpop.permute.xlu1 %2652  ;;  %v4587_v11 = vpop.permute.xlu0 %1432 }
 0x117   : > { %7193 = vst [vmem:[#allocation7_spill] sm:$0xff] %v4585_v10  ;;  %3414 = vmatpush.xpose.msk.msrb.mxu2 %vm706_vm1, %v4473_v17  ;;  %1458 = vrot.lane.b32.xlu2 %v4525_v44, %s4185_s18  ;;  %v657_v17 = vadd.f32 %v4398_v41, %v656_v14 }
 0x119   : > { %v4613_v18 = vmul.f32 0.35355338, %v657_v17  ;;  %v695_v17 = vld [vmem:[%s4818_s30 + $0x8] sm:$0xff] }
 0x11a   : > { %vm699_vm3 = vnez %v695_v17 }
 0x11b   : > { %3415 = vmatpush.xpose.msk.msrb.mxu2 %vm706_vm1, %v4446_v4  ;;  %v4611_v4 = vpop.permute.xlu2 %1434 }
 0x11c   : > { %2068 = vrot.lane.b32.xlu1 %v4525_v44, %s4187_s20  ;;  %2662 = vrot.lane.b32.xlu0 %v683_v59, %s4186_s19 }
 0x11e   : > { %v4600_v15 = vpop.permute.xlu1 %1448  ;;  %v4602_v16 = vpop.permute.xlu0 %2042 }
 0x11f   : > { %3416 = vmatpush.xpose.msk.msrb.mxu2 %vm706_vm1, %v4411_v53  ;;  %2678 = vrot.lane.b32.xlu2 %v4525_v44, %s4186_s19  ;;  %v635_v53 = vpop.f32.mrf.mxu1 }
 0x120   : > { %v636_v22 = vadd.f32 %v4398_v41, %v635_v53 }
 0x122   : > { %3417 = vmatmul.msk.f32.vlgmr.msrb.gmra.mxu2 %vm706_vm1, %v4403_v46  ;;  %v669_v28 = vmul.f32 0.35355338, %v636_v22 }
 0x123   : > { %v4630_v24 = vpop.permute.xlu2 %2654 }
 0x124   : > { %2664 = vrot.lane.b32.xlu1 %v684_v62, %s4186_s19  ;;  %1444 = vrot.lane.b32.xlu0 %v684_v62, %s4185_s18 }
 0x126   : > { %v4617_v19 = vpop.permute.xlu1 %1418  ;;  %v4619_v20 = vpop.permute.xlu0 %1402 }
 0x127   : > { %7194 = vst [vmem:[#allocation8_spill] sm:$0xff] %v4617_v19  ;;  %1428 = vrot.lane.b32.xlu2 %v4613_v18, %s4185_s18 }
 0x128   : > { %7195 = vst [vmem:[#allocation9_spill] sm:$0xff] %v4619_v20 }
 0x12a   : > { %3418 = vmatmul.msk.f32.gmra.mxu2 %vm706_vm1, %v4436_v1 }
 0x12b   : > { %v4649_v32 = vpop.permute.xlu2 %2046 }
 0x12c   : > { %1460 = vrot.lane.b32.xlu1 %v4519_v40, %s4185_s18  ;;  %2054 = vrot.lane.b32.xlu0 %v684_v62, %s4187_s20 }
 0x12e   : > { %v4632_v26 = vpop.permute.xlu1 %2044  ;;  %v4634_v27 = vpop.permute.xlu0 %2668 }
 0x12f   : > { %2070 = vrot.lane.b32.xlu2 %v4519_v40, %s4187_s20 }
 0x132   : > { %3419 = vmatmul.msk.f32.gmra.mxu2 %vm706_vm1, %v4461_v13 }
 0x133   : > { %v4665_v35 = vpop.permute.xlu2 %1406 }
 0x134   : > { %1430 = vrot.lane.b32.xlu1 %v4638_v30, %s4185_s18  ;;  %1414 = vrot.lane.b32.xlu0 %v669_v28, %s4185_s18  ;;  %7197 = vst [vmem:[#allocation11_spill] sm:$0xff] %v4665_v35 }
 0x136   : > { %v4645_v41 = vpop.permute.xlu1 %1404  ;;  %v4647_v31 = vpop.permute.xlu0 %1450 }
 0x137   : > { %7196 = vst [vmem:[#allocation10_spill] sm:$0xff] %v4645_v41  ;;  %1446 = vrot.lane.b32.xlu2 %v4554_v60, %s4185_s18 }
 0x13a   : > { %3420 = vmatmul.msk.f32.gmra.mxu2 %vm706_vm1, %v4482_v25 }
 0x13b   : > { %v4681_v38 = vpop.permute.xlu2 %1452 }
 0x13c   : > { %2056 = vrot.lane.b32.xlu1 %v4554_v60, %s4187_s20  ;;  %2680 = vrot.lane.b32.xlu0 %v4519_v40, %s4186_s19 }
 0x13e   : > { %v4659_v33 = vpop.permute.xlu1 %2670  ;;  %v4661_v34 = vpop.permute.xlu0 %2060 }
 0x13f   : > { %2666 = vrot.lane.b32.xlu2 %v4554_v60, %s4186_s19 }
 0x142   : > { %3421 = vmatmul.msk.f32.gmra.mxu2 %vm706_vm1, %v4535_v52 }
 0x143   : > { %v4699_v44 = vpop.permute.xlu2 %2672 }
 0x144   : > { %2072 = vrot.lane.b32.xlu1 %v4511_v42, %s4187_s20  ;;  %1462 = vrot.lane.b32.xlu0 %v4511_v42, %s4185_s18  ;;  %s3244_s18 = scalar_lea.hbm %s7136_s7, %s3585_s15 }
 0x146   : > { %v4673_v36 = vpop.permute.xlu1 %1436  ;;  %v4675_v37 = vpop.permute.xlu0 %1420 }
 0x147   : > { %7198 = vst [vmem:[#allocation12_spill] sm:$0xff] %v4675_v37  ;;  %2010 = vrot.lane.b32.xlu2 %v4403_v46, %s4187_s20 }
 0x14a   : > { %3422 = vmatmul.msk.f32.gmra.mxu2 %vm706_vm1, %v4556_v61 }
 0x14b   : > { %v4716_v47 = vpop.permute.xlu2 %1422 }
 0x14c   : > { %2012 = vrot.lane.b32.xlu1 %v4436_v1, %s4187_s20  ;;  %2682 = vrot.lane.b32.xlu0 %v4511_v42, %s4186_s19  ;;  %7199 = vst [vmem:[#allocation13_spill] sm:$0xff] %v4716_v47 }
 0x14e   : > { %v4687_v39 = vpop.permute.xlu1 %2062  ;;  %v4689_v40 = vpop.permute.xlu0 %2656 }
 0x14f   : > { %2622 = vrot.lane.b32.xlu2 %v4436_v1, %s4186_s19 }
 0x152   : > { %3423 = vmatmul.msk.f32.gmra.mxu2 %vm706_vm1, %v4576_v8 }
 0x153   : > { %v4732_v49 = vpop.permute.xlu2 %2064 }
 0x154   : > { %2624 = vrot.lane.b32.xlu1 %v4461_v13, %s4186_s19  ;;  %2620 = vrot.lane.b32.xlu0 %v4403_v46, %s4186_s19 }
 0x156   : > { %v4701_v45 = vpop.permute.xlu1 %2658  ;;  %v4703_v42 = vpop.permute.xlu0 %1438 }
 0x157   : > { %2016 = vrot.lane.b32.xlu2 %v4482_v25, %s4187_s20 }
 0x15a   : > { %3424 = vmatmul.msk.f32.gmra.mxu2 %vm706_vm1, %v669_v28 }
 0x15b   : > { %v4746_v51 = vpop.permute.xlu2 %1440 }
 0x15c   : > { %2018 = vrot.lane.b32.xlu1 %v4535_v52, %s4187_s20  ;;  %2014 = vrot.lane.b32.xlu0 %v4461_v13, %s4187_s20 }
 0x15e   : > { %v4712_v1 = vpop.permute.xlu1 %1454  ;;  %v4714_v46 = vpop.permute.xlu0 %2048 }
 0x15f   : > { %2628 = vrot.lane.b32.xlu2 %v4535_v52, %s4186_s19 }
 0x162   : > { %3425 = vmatmul.msk.f32.gmra.mxu2 %vm706_vm1, %v4418_v54 }
 0x163   : > { %v4764_v57 = vpop.permute.xlu2 %2660 }
 0x164   : > { %2630 = vrot.lane.b32.xlu1 %v4556_v61, %s4186_s19  ;;  %2626 = vrot.lane.b32.xlu0 %v4482_v25, %s4186_s19 }
 0x166   : > { %v4726_v48 = vpop.permute.xlu1 %1424  ;;  %v4728_v13 = vpop.permute.xlu0 %1408 }
 0x167   : > { %7200 = vst [vmem:[#allocation14_spill] sm:$0xff] %v4726_v48  ;;  %2022 = vrot.lane.b32.xlu2 %v4576_v8, %s4187_s20 }
 0x168   : > { %7201 = vst [vmem:[#allocation15_spill] sm:$0xff] %v4728_v13 }
 0x16a   : > { %3426 = vmatmul.msk.f32.gmra.mxu2 %vm706_vm1, %v4438_v2 }
 0x16b   : > { %v4782_v62 = vpop.permute.xlu2 %1410 }
 0x16c   : > { %2024 = vrot.lane.b32.xlu1 %v669_v28, %s4187_s20  ;;  %2020 = vrot.lane.b32.xlu0 %v4556_v61, %s4187_s20  ;;  %7204 = vst [vmem:[#allocation18_spill] sm:$0xff] %v4782_v62 }
 0x16e   : > { %v4739_v50 = vpop.permute.xlu1 %2050  ;;  %v4741_v25 = vpop.permute.xlu0 %2674 }
 0x16f   : > { %2634 = vrot.lane.b32.xlu2 %v669_v28, %s4186_s19 }
 0x172   : > { %3427 = vmatmul.msk.f32.gmra.mxu2 %vm706_vm1, %v4491_v29 }
 0x173   : > { %v4798_v59 = vpop.permute.xlu2 %2052 }
 0x174   : > { %2636 = vrot.lane.b32.xlu1 %v4418_v54, %s4186_s19  ;;  %2632 = vrot.lane.b32.xlu0 %v4576_v8, %s4186_s19  ;;  %v4188_v8 = vmov 0  }
 0x175   : > { %v4838_v28 = vsel %vm699_vm3, 16843009, %v4188_v8 }
 0x176   : > { %v4752_v52 = vpop.permute.xlu1 %2676  ;;  %v4754_v56 = vpop.permute.xlu0 %1456  ;;  %v877_v35 = vunpack.c.1.s8 %v4838_v28 }
 0x177   : > { %2028 = vrot.lane.b32.xlu2 %v4438_v2, %s4187_s20 }
 0x17a   : > { %3428 = vmatmul.msk.f32.gmra.mxu2 %vm706_vm1, %v4513_v43 }
 0x17b   : > { %v1459_v3 = vpop.permute.xlu2 %1458 }
 0x17c   : > { %2030 = vrot.lane.b32.xlu1 %v4491_v29, %s4187_s20  ;;  %2026 = vrot.lane.b32.xlu0 %v4418_v54, %s4187_s20 }
 0x17e   : > { %v4766_v58 = vpop.permute.xlu1 %1442  ;;  %v4768_v60 = vpop.permute.xlu0 %2066 }
 0x17f   : > { %2640 = vrot.lane.b32.xlu2 %v4491_v29, %s4186_s19 }
 0x182   : > { %3429 = vmatmul.msk.f32.gmra.mxu2 %vm706_vm1, %v4537_v55 }
 0x183   : > { %v4829_v53 = vpop.permute.xlu2 %2678 }
 0x184   : > { %2642 = vrot.lane.b32.xlu1 %v4513_v43, %s4186_s19  ;;  %2638 = vrot.lane.b32.xlu0 %v4438_v2, %s4186_s19 }
 0x186   : > { %v4778_v61 = vpop.permute.xlu1 %1412  ;;  %v4780_v54 = vpop.permute.xlu0 %1426 }
 0x187   : > { %7202 = vst [vmem:[#allocation16_spill] sm:$0xff] %v4778_v61  ;;  %2034 = vrot.lane.b32.xlu2 %v4537_v55, %s4187_s20 }
 0x188   : > { %7203 = vst [vmem:[#allocation17_spill] sm:$0xff] %v4780_v54 }
 0x18a   : > { %3430 = vmatmul.msk.f32.gmra.mxu2 %vm706_vm1, %v4578_v9 }
 0x18b   : > { %v4845_v19 = vpop.permute.xlu2 %1428 }
 0x18c   : > { %2036 = vrot.lane.b32.xlu1 %v4578_v9, %s4187_s20  ;;  %2032 = vrot.lane.b32.xlu0 %v4513_v43, %s4187_s20 }
 0x18e   : > { %v4792_v2 = vpop.permute.xlu1 %2068  ;;  %v4794_v29 = vpop.permute.xlu0 %2662 }
 0x18f   : > { %2646 = vrot.lane.b32.xlu2 %v4578_v9, %s4186_s19 }
 0x192   : > { %3431 = vmatmul.msk.f32.gmra.mxu2 %vm706_vm1, %v4613_v18 }
 0x194   : > { %2648 = vrot.lane.b32.xlu1 %v4613_v18, %s4186_s19  ;;  %2644 = vrot.lane.b32.xlu0 %v4537_v55, %s4186_s19  ;;  %v694_v55 = vld [vmem:[%s4818_s30] sm:$0xff] }
 0x195   : > { %vm698_vm2 = vnez %v694_v55 }
 0x196   : > { %v4806_v0 = vpop.permute.xlu1 %2664  ;;  %v4808_v43 = vpop.permute.xlu0 %1444  ;;  %v868_v9 = vsel %vm698_vm2, 16843009, %v4188_v8 }
 0x197   : > { %2040 = vrot.lane.b32.xlu2 %v4638_v30, %s4187_s20  ;;  %v874_v14 = vunpack.c.2.s8 %v868_v9  ;;  %v875_v54 = vunpack.c.3.s8 %v868_v9  ;;  %v872_v61 = vunpack.c.0.s8 %v868_v9 }
 0x199   : > { %v892_v23 = vpack.c.b16 %v874_v14, %v874_v14 }
 0x19a   : > { %3432 = vmatmul.msk.f32.gmra.mxu2 %vm706_vm1, %v4638_v30 }
 0x19b   : > { %v893_v55 = vpack.c.b8 %v892_v23, %v892_v23  ;;  %v703_v23 = vand.u32 127, %v702_v7 }
 0x19c   : > { %2038 = vrot.lane.b32.xlu0 %v4613_v18, %s4187_s20  ;;  %s3231_s20 = scalar_lea.sflag [#allocation4], %s335_s8 }
 0x19d   : > { %vm922_vm4 = vnez %v893_v55  ;;  %vm704_vm6 = vcmp.ge.s32.totalorder %v703_v23, 8  ;;  %v898_v55 = vpack.c.b16 %v877_v35, %v877_v35 }
 0x19e   : > { %v1461_v5 = vpop.permute.xlu1 %1460  ;;  %v4823_v6 = vpop.permute.xlu0 %2054  ;;  %v938_v14 = vsel %vm922_vm4, 16843009, %v4188_v8 }
 0x19f   : > { %v954_v10 = vunpack.c.0.s8 %v938_v14  ;;  %v873_v14 = vunpack.c.1.s8 %v868_v9  ;;  %v899_v35 = vpack.c.b8 %v898_v55, %v898_v55 }
 0x1a1   : > { %vm4851_vm8 = vcmp.ne.s32.totalorder %v954_v10, 0  ;;  %v890_v9 = vpack.c.b16 %v873_v14, %v873_v14  ;;  %vm925_vm10 = vnez %v899_v35 }
 0x1a3   : > { %v891_v55 = vpack.c.b8 %v890_v9, %v890_v9 }
 0x1a4   : > { %2650 = vrot.lane.b32.xlu0 %v4638_v30, %s4186_s19  ;;  %v876_v30 = vunpack.c.0.s8 %v4838_v28  ;;  %s3247_s19 = sshll.u32 %s3244_s18, 4  ;;  %s3248_s19 = int_to_ptr.hbm [resolvable:$true] %s3247_s19 }
 0x1a5   : > { %v4831_v21 = vpop.f32.mrf.mxu2  ;;  %vm921_vm14 = vnez %v891_v55  ;;  %s4119_s21 = sshra.s32 %s3248_s19, 4  ;;  %s4120_s21 = int_to_ptr.hbm [resolvable:$true] %s4119_s21 }
 0x1a6   : > { %v4833_v22 = vpop.permute.xlu1 %1430  ;;  %v4835_v18 = vpop.permute.xlu0 %1414  ;;  %s4121_s22 = scalar_lea.hbm %s4120_s21, 256  ;;  %p4126_p1 = scmp.lt.s32.totalorder %s4120_s21, %s7136_s7 }
 0x1a7   : > { %7205 = vst [vmem:[#allocation19_spill] sm:$0xff] %v4833_v22  ;;  %v894_v22 = vpack.c.b16 %v875_v54, %v875_v54  ;;  %v888_v54 = vpack.c.b16 %v872_v61, %v872_v61  ;;  %p4122_p12 = scmp.ne.s32.totalorder %s4120_s21, %s4121_s22  ;;  %p4127_p2 = scmp.lt.s32.totalorder %s4125_s10, %s4121_s22 }
 0x1a8   : > { %7206 = vst [vmem:[#allocation20_spill] sm:$0xff] %v4835_v18  ;;  %v896_v18 = vpack.c.b16 %v876_v30, %v876_v30  ;;  %v2071_v30 = vpop.permute.xlu2 %2070 }
 0x1a9   : > { %v895_v17 = vpack.c.b8 %v894_v22, %v894_v22  ;;  %v889_v61 = vpack.c.b8 %v888_v54, %v888_v54  ;;  %v941_v54 = vsel %vm925_vm10, 16843009, %v4188_v8  ;;  %p4123_p13 = pnand %p4122_p12, %p4272_p4  ;;  %p4128_p3 = por %p4127_p2, %p4126_p1 }
 0x1aa   : > { %v897_v13 = vpack.c.b8 %v896_v18, %v896_v18  ;;  %v4189_v18 = vmov -1e+09  }
 0x1ab   : > { %vm923_vm5 = vnez %v895_v17  ;;  %vm920_vm9 = vnez %v889_v61  ;;  %v957_v61 = vunpack.c.0.s8 %v941_v54  ;;  %p4124_p0 = pneg %p4123_p13 }
 0x1ac   : > { %vm924_vm7 = vnez %v897_v13  ;;  %v939_v7 = vsel %vm923_vm5, 16843009, %v4188_v8 }
 0x1ad   : > { %v4840_v48 = vpop.f32.mrf.mxu2  ;;  %vm4916_vm0 = vcmp.ne.s32.totalorder %v957_v61, 0  ;;  %p4129_p5 = pnand %p4128_p3, %p4124_p0 }
 0x1ae   : > { %v4843_v47 = vpop.permute.xlu1 %2056  ;;  %v2681_v37 = vpop.permute.xlu0 %2680 }
 0x1b5   : > { %v826_v62 = vpop.f32.mrf.mxu2 }
 0x1b6   : > { %v2073_v41 = vpop.permute.xlu1 %2072  ;;  %v1463_v20 = vpop.permute.xlu0 %1462 }
 0x1b7   : > { %3433 = vmatpush.xpose.msk.msrb.mxu3 %vm706_vm1, %v1463_v20  ;;  %3481 = vmatpush.xpose.msk.msrb.mxu0 %vm706_vm1, %v2073_v41  ;;  %v4858_v20 = vsel %vm704_vm6, -2e+09, %v4189_v18  ;;  %v940_v41 = vsel %vm924_vm7, 16843009, %v4188_v8 }
 0x1b8   : > { %v4864_v10 = vsel %vm4851_vm8, %v826_v62, %v4858_v20  ;;  %v956_v23 = vunpack.c.0.s8 %v940_v41 }
 0x1ba   : > { %vm4879_vm12 = vcmp.ne.s32.totalorder %v956_v23, 0 }
 0x1bb   : > { %3434 = vmatpush.xpose.msk.msrb.mxu3 %vm706_vm1, %v1461_v5  ;;  %3482 = vmatpush.xpose.msk.msrb.mxu0 %vm706_vm1, %v2071_v30  ;;  %v955_v5 = vunpack.c.0.s8 %v939_v7  ;;  %v878_v30 = vunpack.c.2.s8 %v4838_v28  ;;  %v696_v7 = vld [vmem:[%s4818_s30 + $0x10] sm:$0xff] }
 0x1bc   : > { %vm700_vm13 = vnez %v696_v7 }
 0x1bd   : > { %v829_v13 = vpop.f32.mrf.mxu2  ;;  %vm4871_vm11 = vcmp.ne.s32.totalorder %v955_v5, 0  ;;  %v4912_v35 = vsel %vm700_vm13, 16843009, %v4188_v8 }
 0x1be   : > { %v2683_v17 = vpop.permute.xlu0 %2682  ;;  %1004 = vmax.xlane.f32.xlu1 %v4864_v10  ;;  %v880_v23 = vunpack.c.0.s8 %v4912_v35 }
 0x1bf   : > { %3435 = vmatpush.xpose.msk.msrb.mxu3 %vm706_vm1, %v1459_v3  ;;  %3483 = vmatpush.xpose.msk.msrb.mxu0 %vm706_vm1, %v4792_v2  ;;  %v936_v2 = vsel %vm920_vm9, 16843009, %v4188_v8 }
 0x1c0   : > { %3529 = vmatpush.xpose.msk.msrb.mxu1 %vm706_vm1, %v2683_v17  ;;  %v952_v41 = vunpack.c.0.s8 %v936_v2 }
 0x1c2   : > { %vm4907_vm15 = vcmp.ne.s32.totalorder %v952_v41, 0 }
 0x1c3   : > { %3436 = vmatpush.xpose.msk.msrb.mxu3 %vm706_vm1, %v4754_v56  ;;  %3484 = vmatpush.xpose.msk.msrb.mxu0 %vm706_vm1, %v4768_v60  ;;  %v4891_v56 = vsel %vm4871_vm11, %v829_v13, %v4858_v20  ;;  %v879_v60 = vunpack.c.3.s8 %v4838_v28  ;;  %v900_v28 = vpack.c.b16 %v878_v30, %v878_v30  ;;  %v4929_v5 = vsel %vm4907_vm15, %v4831_v21, %v4858_v20 }
 0x1c4   : > { %3530 = vmatpush.xpose.msk.msrb.mxu1 %vm706_vm1, %v2681_v37 }
 0x1c5   : > { %v832_v18 = vpop.f32.mrf.mxu2  ;;  %v902_v14 = vpack.c.b16 %v879_v60, %v879_v60 }
 0x1c6   : > { %1006 = vmax.xlane.f32.xlu1 %v4891_v56  ;;  %v4898_v37 = vsel %vm4879_vm12, %v832_v18, %v4858_v20 }
 0x1c7   : > { %1008 = vmax.xlane.f32.xlu2 %v4898_v37  ;;  %3437 = vmatpush.xpose.msk.msrb.mxu3 %vm706_vm1, %v4712_v1 }
 0x1c8   : > { %3485 = vmatpush.xpose.msk.msrb.mxu0 %vm706_vm1, %v4732_v49  ;;  %3531 = vmatpush.xpose.msk.msrb.mxu1 %vm706_vm1, %v4829_v53  ;;  %v937_v49 = vsel %vm921_vm14, 16843009, %v4188_v8  ;;  %v901_v53 = vpack.c.b8 %v900_v28, %v900_v28 }
 0x1c9   : > { %v953_v9 = vunpack.c.0.s8 %v937_v49 }
 0x1ca   : > { %vm926_vm2 = vnez %v901_v53  ;;  %v883_v53 = vunpack.c.3.s8 %v4912_v35 }
 0x1cb   : > { %3438 = vmatpush.xpose.msk.msrb.mxu3 %vm706_vm1, %v4681_v38  ;;  %v903_v38 = vpack.c.b8 %v902_v14, %v902_v14  ;;  %vm4945_vm4 = vcmp.ne.s32.totalorder %v953_v9, 0  ;;  %v942_v2 = vsel %vm926_vm2, 16843009, %v4188_v8 }
 0x1cc   : > { %3486 = vmatpush.xpose.msk.msrb.mxu0 %vm706_vm1, %v4687_v39  ;;  %3532 = vmatpush.xpose.msk.msrb.mxu1 %vm706_vm1, %v4752_v52  ;;  %v904_v52 = vpack.c.b16 %v880_v23, %v880_v23  ;;  %v4961_v54 = vsel %vm4945_vm4, %v4840_v48, %v4858_v20  ;;  %v958_v30 = vunpack.c.0.s8 %v942_v2 }
 0x1cd   : > { %v835_v17 = vpop.f32.mrf.mxu2  ;;  %vm927_vm3 = vnez %v903_v38 }
 0x1ce   : > { %1000 = vmax.xlane.f32.xlu0 %v4929_v5  ;;  %v4936_v39 = vsel %vm4916_vm0, %v835_v17, %v4858_v20  ;;  %v905_v55 = vpack.c.b8 %v904_v52, %v904_v52  ;;  %vm4970_vm6 = vcmp.ne.s32.totalorder %v958_v30, 0  ;;  %v7232_v30 = vld [vmem:[#allocation9_spill] sm:$0xff] }
 0x1cf   : > { %1010 = vmax.xlane.f32.xlu2 %v4936_v39  ;;  %3439 = vmatpush.xpose.msk.msrb.mxu3 %vm706_vm1, %v4647_v31  ;;  %v943_v31 = vsel %vm927_vm3, 16843009, %v4188_v8 }
 0x1d0   : > { %3487 = vmatpush.xpose.msk.msrb.mxu0 %vm706_vm1, %v4661_v34  ;;  %3533 = vmatpush.xpose.msk.msrb.mxu1 %vm706_vm1, %v4741_v25  ;;  %v1447_v34 = vpop.permute.xlu2 %1446  ;;  %vm928_vm5 = vnez %v905_v55 }
 0x1d3   : > { %3440 = vmatpush.xpose.msk.msrb.mxu3 %vm706_vm1, %v4600_v15  ;;  %v881_v15 = vunpack.c.1.s8 %v4912_v35 }
 0x1d4   : > { %3488 = vmatpush.xpose.msk.msrb.mxu0 %vm706_vm1, %v4593_v12  ;;  %3534 = vmatpush.xpose.msk.msrb.mxu1 %vm706_vm1, %v4699_v44  ;;  %v959_v12 = vunpack.c.0.s8 %v943_v31  ;;  %v7231_v31 = vld [vmem:[#allocation7_spill] sm:$0xff] }
 0x1d5   : > { %v838_v25 = vpop.f32.mrf.mxu2  ;;  %v906_v44 = vpack.c.b16 %v881_v15, %v881_v15  ;;  %v2013_v15 = vpop.permute.xlu1 %2012 }
 0x1d6   : > { %1002 = vmax.xlane.f32.xlu0 %v4961_v54  ;;  %vm4976_vm7 = vcmp.ne.s32.totalorder %v959_v12, 0  ;;  %v4988_v18 = vsel %vm4970_vm6, %v838_v25, %v4858_v20 }
 0x1d7   : > { %3441 = vmatpush.xpose.msk.msrb.mxu3 %vm706_vm1, %v1447_v34  ;;  %v907_v60 = vpack.c.b8 %v906_v44, %v906_v44  ;;  %v7233_v44 = vmov 0 }
 0x1d8   : > { %3489 = vmatpush.xpose.msk.msrb.mxu0 %vm706_vm1, %v4843_v47  ;;  %3535 = vmatpush.xpose.msk.msrb.mxu1 %vm706_vm1, %v4659_v33  ;;  %v944_v33 = vsel %vm928_vm5, 16843009, %v4188_v8 }
 0x1d9   : > { %v960_v41 = vunpack.c.0.s8 %v944_v33  ;;  %vm929_vm9 = vnez %v907_v60 }
 0x1db   : > { %3442 = vmatpush.xpose.msk.msrb.mxu3 %vm706_vm1, %v4808_v43  ;;  %v882_v43 = vunpack.c.2.s8 %v4912_v35  ;;  %vm5005_vm10 = vcmp.ne.s32.totalorder %v960_v41, 0 }
 0x1dc   : > { %3490 = vmatpush.xpose.msk.msrb.mxu0 %vm706_vm1, %v4823_v6  ;;  %3536 = vmatpush.xpose.msk.msrb.mxu1 %vm706_vm1, %v4634_v27  ;;  %v2667_v27 = vpop.permute.xlu2 %2666 }
 0x1dd   : > { %v841_v47 = vpop.f32.mrf.mxu2  ;;  %v908_v61 = vpack.c.b16 %v882_v43, %v882_v43 }
 0x1de   : > { %1012 = vmax.xlane.f32.xlu0 %v4988_v18  ;;  %v4995_v6 = vsel %vm4976_vm7, %v841_v47, %v4858_v20 }
 0x1df   : > { %1014 = vmax.xlane.f32.xlu1 %v4995_v6  ;;  %3443 = vmatpush.xpose.msk.msrb.mxu3 %vm706_vm1, %v4766_v58  ;;  %v945_v58 = vsel %vm929_vm9, 16843009, %v4188_v8  ;;  %v909_v49 = vpack.c.b8 %v908_v61, %v908_v61 }
 0x1e0   : > { %3491 = vmatpush.xpose.msk.msrb.mxu0 %vm706_vm1, %v4798_v59  ;;  %3537 = vmatpush.xpose.msk.msrb.mxu1 %vm706_vm1, %v2667_v27  ;;  %v697_v59 = vld [vmem:[%s4818_s30 + $0x18] sm:$0xff]  ;;  %v7235_v27 = vld [vmem:[#allocation10_spill] sm:$0xff] }
 0x1e1   : > { %vm701_vm13 = vnez %v697_v59  ;;  %vm930_vm14 = vnez %v909_v49  ;;  %v2625_v59 = vpop.permute.xlu1 %2624 }
 0x1e2   : > { %v5029_v35 = vsel %vm701_vm13, 16843009, %v4188_v8 }
 0x1e3   : > { %3444 = vmatpush.xpose.msk.msrb.mxu3 %vm706_vm1, %v4746_v51  ;;  %v884_v38 = vunpack.c.0.s8 %v5029_v35 }
 0x1e4   : > { %3492 = vmatpush.xpose.msk.msrb.mxu0 %vm706_vm1, %v4739_v50  ;;  %3538 = vmatpush.xpose.msk.msrb.mxu1 %vm706_vm1, %v4806_v0  ;;  %v961_v50 = vunpack.c.0.s8 %v945_v58  ;;  %v910_v0 = vpack.c.b16 %v883_v53, %v883_v53  ;;  %v2011_v52 = vpop.permute.xlu2 %2010  ;;  %v7236_v58 = vmov 0  ;;  %v7238_v53 = vld [vmem:[#allocation11_spill] sm:$0xff] }
 0x1e5   : > { %v844_v14 = vpop.f32.mrf.mxu2 }
 0x1e6   : > { %v5019_v51 = vsel %vm5005_vm10, %v844_v14, %v4858_v20  ;;  %vm5033_vm2 = vcmp.ne.s32.totalorder %v961_v50, 0 }
 0x1e7   : > { %1016 = vmax.xlane.f32.xlu2 %v5019_v51  ;;  %3445 = vmatpush.xpose.msk.msrb.mxu3 %vm706_vm1, %v4703_v42  ;;  %v946_v42 = vsel %vm930_vm14, 16843009, %v4188_v8 }
 0x1e8   : > { %3493 = vmatpush.xpose.msk.msrb.mxu0 %vm706_vm1, %v4714_v46  ;;  %3539 = vmatpush.xpose.msk.msrb.mxu1 %vm706_vm1, %v4794_v29  ;;  %v911_v29 = vpack.c.b8 %v910_v0, %v910_v0 }
 0x1ea   : > { %vm931_vm3 = vnez %v911_v29 }
 0x1eb   : > { %3446 = vmatpush.xpose.msk.msrb.mxu3 %vm706_vm1, %v4673_v36 }
 0x1ec   : > { %3494 = vmatpush.xpose.msk.msrb.mxu0 %vm706_vm1, %v4649_v32  ;;  %3540 = vmatpush.xpose.msk.msrb.mxu1 %vm706_vm1, %v4764_v57  ;;  %v962_v32 = vunpack.c.0.s8 %v946_v42  ;;  %v912_v57 = vpack.c.b16 %v884_v38, %v884_v38  ;;  %v2623_v33 = vpop.permute.xlu2 %2622  ;;  %v2019_v42 = vpop.permute.xlu1 %2018 }
 0x1ed   : > { %v847_v46 = vpop.f32.mrf.mxu2 }
 0x1ee   : > { %v5046_v36 = vsel %vm5033_vm2, %v847_v46, %v4858_v20  ;;  %vm5057_vm5 = vcmp.ne.s32.totalorder %v962_v32, 0  ;;  %v913_v9 = vpack.c.b8 %v912_v57, %v912_v57  ;;  %v7239_v46 = vld [vmem:[#allocation15_spill] sm:$0xff]  ;;  %v7240_v32 = vld [vmem:[#allocation18_spill] sm:$0xff] }
 0x1ef   : > { %1018 = vmax.xlane.f32.xlu0 %v5046_v36  ;;  %3447 = vmatpush.xpose.msk.msrb.mxu3 %vm706_vm1, %v4611_v4  ;;  %v947_v4 = vsel %vm931_vm3, 16843009, %v4188_v8 }
 0x1f0   : > { %3495 = vmatpush.xpose.msk.msrb.mxu0 %vm706_vm1, %v4632_v26  ;;  %3541 = vmatpush.xpose.msk.msrb.mxu1 %vm706_vm1, %v4701_v45  ;;  %v885_v45 = vunpack.c.1.s8 %v5029_v35  ;;  %vm932_vm9 = vnez %v913_v9 }
 0x1f1   : > { %v948_v34 = vsel %vm932_vm9, 16843009, %v4188_v8 }
 0x1f2   : > { %v964_v12 = vunpack.c.0.s8 %v948_v34 }
 0x1f3   : > { %3448 = vmatpush.xpose.msk.msrb.mxu3 %vm706_vm1, %v4587_v11 }
 0x1f4   : > { %3496 = vmatpush.xpose.msk.msrb.mxu0 %vm706_vm1, %v4602_v16  ;;  %3542 = vmatpush.xpose.msk.msrb.mxu1 %vm706_vm1, %v4689_v40  ;;  %v963_v16 = vunpack.c.0.s8 %v947_v4  ;;  %v914_v40 = vpack.c.b16 %v885_v45, %v885_v45  ;;  %vm5095_vm3 = vcmp.ne.s32.totalorder %v964_v12, 0  ;;  %v2017_v49 = vpop.permute.xlu2 %2016  ;;  %v2631_v57 = vpop.permute.xlu1 %2630 }
 0x1f5   : > { %v850_v26 = vpop.f32.mrf.mxu2  ;;  %v7234_v44 = vsel %vm5095_vm3, 4294967295, %v7233_v44 }
 0x1f6   : > { %3449 = vmatmul.msk.f32.vlgmr.msrb.gmra.mxu3 %vm706_vm1, %v4562_v63  ;;  %v5072_v11 = vsel %vm5057_vm5, %v850_v26, %v4858_v20  ;;  %vm5078_vm13 = vcmp.ne.s32.totalorder %v963_v16, 0  ;;  %v2621_v63 = vpop.permute.xlu0 %2620  ;;  %v915_v55 = vpack.c.b8 %v914_v40, %v914_v40  ;;  %v7241_v26 = vld [vmem:[#allocation16_spill] sm:$0xff] }
 0x1f7   : > { %3497 = vmatmul.msk.f32.vlgmr.msrb.gmra.mxu0 %vm706_vm1, %v2011_v52  ;;  %1020 = vmax.xlane.f32.xlu1 %v5072_v11  ;;  %v7242_v52 = vld [vmem:[#allocation20_spill] sm:$0xff] }
 0x1f8   : > { %3543 = vmatpush.xpose.msk.msrb.mxu1 %vm706_vm1, %v4630_v24  ;;  %vm933_vm14 = vnez %v915_v55 }
 0x1f9   : > { %v949_v47 = vsel %vm933_vm14, 16843009, %v4188_v8 }
 0x1fa   : > { %v965_v61 = vunpack.c.0.s8 %v949_v47  ;;  %v7246_v47 = vld [vmem:[#allocation13_spill] sm:$0xff] }
 0x1fc   : > { %3544 = vmatpush.xpose.msk.msrb.mxu1 %vm706_vm1, %v7231_v31  ;;  %vm5110_vm9 = vcmp.ne.s32.totalorder %v965_v61, 0  ;;  %v2629_v29 = vpop.permute.xlu2 %2628  ;;  %v2025_v45 = vpop.permute.xlu1 %2024 }
 0x1fd   : > { %v853_v25 = vpop.f32.mrf.mxu2  ;;  %v7237_v58 = vsel %vm5110_vm9, 4294967295, %v7236_v58 }
 0x1fe   : > { %3450 = vmatmul.msk.f32.gmra.mxu3 %vm706_vm1, %v7232_v30  ;;  %v5090_v24 = vsel %vm5078_vm13, %v853_v25, %v4858_v20  ;;  %v2015_v43 = vpop.permute.xlu0 %2014  ;;  %v7244_v25 = vld [vmem:[#allocation8_spill] sm:$0xff] }
 0x1ff   : > { %3498 = vmatmul.msk.f32.gmra.mxu0 %vm706_vm1, %v2013_v15  ;;  %3545 = vmatmul.msk.f32.vlgmr.msrb.gmra.mxu1 %vm706_vm1, %v2621_v63  ;;  %v7243_v63 = vld [vmem:[#allocation6_spill] sm:$0xff]  ;;  %v7245_v30 = vld [vmem:[#allocation12_spill] sm:$0xff] }
 0x200   : > { %1022 = vmax.xlane.f32.xlu2 %v5090_v24 }
 0x204   : > { %v2023_v4 = vpop.permute.xlu2 %2022  ;;  %v2637_v31 = vpop.permute.xlu1 %2636 }
 0x205   : > { %v856_v60 = vpop.f32.mrf.mxu2 }
 0x206   : > { %3451 = vmatmul.msk.f32.gmra.mxu3 %vm706_vm1, %v7235_v27  ;;  %v5105_v41 = vsel %vm5095_vm3, %v856_v60, %v4858_v20  ;;  %v2627_v0 = vpop.permute.xlu0 %2626  ;;  %v7247_v27 = vld [vmem:[#allocation14_spill] sm:$0xff] }
 0x207   : > { %3499 = vmatmul.msk.f32.gmra.mxu0 %vm706_vm1, %v2015_v43  ;;  %3546 = vmatmul.msk.f32.gmra.mxu1 %vm706_vm1, %v2623_v33 }
 0x208   : > { %1024 = vmax.xlane.f32.xlu0 %v5105_v41 }
 0x20c   : > { %v2635_v16 = vpop.permute.xlu2 %2634  ;;  %v2031_v15 = vpop.permute.xlu1 %2030 }
 0x20d   : > { %v859_v14 = vpop.f32.mrf.mxu2 }
 0x20e   : > { %3452 = vmatmul.msk.f32.gmra.mxu3 %vm706_vm1, %v7238_v53  ;;  %v5119_v50 = vsel %vm5110_vm9, %v859_v14, %v4858_v20  ;;  %v2021_v38 = vpop.permute.xlu0 %2020  ;;  %v7248_v14 = vld [vmem:[#allocation17_spill] sm:$0xff]  ;;  %v886_v53 = vunpack.c.2.s8 %v5029_v35 }
 0x20f   : > { %3500 = vmatmul.msk.f32.gmra.mxu0 %vm706_vm1, %v2017_v49  ;;  %3547 = vmatmul.msk.f32.gmra.mxu1 %vm706_vm1, %v2625_v59 }
 0x210   : > { %1026 = vmax.xlane.f32.xlu1 %v5119_v50 }
 0x214   : > { %v2029_v34 = vpop.permute.xlu2 %2028  ;;  %v2643_v60 = vpop.permute.xlu1 %2642 }
 0x216   : > { %3453 = vmatmul.msk.f32.gmra.mxu3 %vm706_vm1, %v7239_v46  ;;  %v2633_v9 = vpop.permute.xlu0 %2632  ;;  %v887_v46 = vunpack.c.3.s8 %v5029_v35 }
 0x217   : > { %3501 = vmatmul.msk.f32.gmra.mxu0 %vm706_vm1, %v2019_v42  ;;  %3548 = vmatmul.msk.f32.gmra.mxu1 %vm706_vm1, %v2627_v0  ;;  %v916_v42 = vpack.c.b16 %v886_v53, %v886_v53 }
 0x21c   : > { %v2641_v12 = vpop.permute.xlu2 %2640  ;;  %v2037_v59 = vpop.permute.xlu1 %2036 }
 0x21e   : > { %3454 = vmatmul.msk.f32.gmra.mxu3 %vm706_vm1, %v7240_v32  ;;  %v2027_v40 = vpop.permute.xlu0 %2026 }
 0x21f   : > { %3502 = vmatmul.msk.f32.gmra.mxu0 %vm706_vm1, %v2021_v38  ;;  %3549 = vmatmul.msk.f32.gmra.mxu1 %vm706_vm1, %v2629_v29  ;;  %v917_v29 = vpack.c.b8 %v916_v42, %v916_v42 }
 0x221   : > { %vm934_vm14 = vnez %v917_v29 }
 0x224   : > { %v2035_v43 = vpop.permute.xlu2 %2034  ;;  %v2649_v32 = vpop.permute.xlu1 %2648 }
 0x226   : > { %3455 = vmatmul.msk.f32.gmra.mxu3 %vm706_vm1, %v7241_v26  ;;  %v2639_v55 = vpop.permute.xlu0 %2638  ;;  %v950_v26 = vsel %vm934_vm14, 16843009, %v4188_v8 }
 0x227   : > { %3503 = vmatmul.msk.f32.gmra.mxu0 %vm706_vm1, %v2023_v4  ;;  %3550 = vmatmul.msk.f32.gmra.mxu1 %vm706_vm1, %v2631_v57  ;;  %v7249_v57 = vld [vmem:[#allocation19_spill] sm:$0xff]  ;;  %v918_v4 = vpack.c.b16 %v887_v46, %v887_v46 }
 0x22c   : > { %v2647_v49 = vpop.permute.xlu2 %2646 }
 0x22e   : > { %3456 = vmatmul.msk.f32.gmra.mxu3 %vm706_vm1, %v7242_v52  ;;  %v2033_v33 = vpop.permute.xlu0 %2032  ;;  %v966_v52 = vunpack.c.0.s8 %v950_v26 }
 0x22f   : > { %3504 = vmatmul.msk.f32.gmra.mxu0 %vm706_vm1, %v2025_v45  ;;  %3551 = vmatmul.msk.f32.gmra.mxu1 %vm706_vm1, %v2633_v9  ;;  %v919_v9 = vpack.c.b8 %v918_v4, %v918_v4 }
 0x230   : > { %vm5182_vm3 = vcmp.ne.s32.totalorder %v966_v52, 0 }
 0x231   : > { %vm935_vm9 = vnez %v919_v9 }
 0x234   : > { %v2041_v38 = vpop.permute.xlu2 %2040 }
 0x236   : > { %3457 = vmatmul.msk.f32.gmra.mxu3 %vm706_vm1, %v7243_v63  ;;  %v2645_v61 = vpop.permute.xlu0 %2644 }
 0x237   : > { %3505 = vmatmul.msk.f32.gmra.mxu0 %vm706_vm1, %v2027_v40  ;;  %3552 = vmatmul.msk.f32.gmra.mxu1 %vm706_vm1, %v2635_v16  ;;  %v862_v16 = vpop.f32.mrf.mxu2 }
 0x23e   : > { %3458 = vmatmul.msk.f32.gmra.mxu3 %vm706_vm1, %v7244_v25  ;;  %v2039_v0 = vpop.permute.xlu0 %2038 }
 0x23f   : > { %3506 = vmatmul.msk.f32.gmra.mxu0 %vm706_vm1, %v2029_v34  ;;  %3553 = vmatmul.msk.f32.gmra.mxu1 %vm706_vm1, %v2637_v31  ;;  %v951_v31 = vsel %vm935_vm9, 16843009, %v4188_v8  ;;  %v5202_v8 = vsel %vm5182_vm3, %v862_v16, %v4858_v20 }
 0x246   : > { %3459 = vmatmul.msk.f32.gmra.mxu3 %vm706_vm1, %v7245_v30  ;;  %v2651_v45 = vpop.permute.xlu0 %2650  ;;  %v967_v30 = vunpack.c.0.s8 %v951_v31 }
 0x247   : > { %3507 = vmatmul.msk.f32.gmra.mxu0 %vm706_vm1, %v2031_v15  ;;  %3554 = vmatmul.msk.f32.gmra.mxu1 %vm706_vm1, %v2639_v55 }
 0x24e   : > { %3460 = vmatmul.msk.f32.gmra.mxu3 %vm706_vm1, %v7246_v47 }
 0x24f   : > { %3508 = vmatmul.msk.f32.gmra.mxu0 %vm706_vm1, %v2033_v33  ;;  %3555 = vmatmul.msk.f32.gmra.mxu1 %vm706_vm1, %v2641_v12  ;;  %v865_v12 = vpop.f32.mrf.mxu2 }
 0x256   : > { %3461 = vmatmul.msk.f32.gmra.mxu3 %vm706_vm1, %v7247_v27 }
 0x257   : > { %3509 = vmatmul.msk.f32.gmra.mxu0 %vm706_vm1, %v2035_v43  ;;  %3556 = vmatmul.msk.f32.gmra.mxu1 %vm706_vm1, %v2643_v60  ;;  %v1001_v60 = vpop.xlane.xlu0 %1000 }
 0x25e   : > { %3462 = vmatmul.msk.f32.gmra.mxu3 %vm706_vm1, %v7248_v14 }
 0x25f   : > { %3510 = vmatmul.msk.f32.gmra.mxu0 %vm706_vm1, %v2037_v59  ;;  %3557 = vmatmul.msk.f32.gmra.mxu1 %vm706_vm1, %v2645_v61  ;;  %v1003_v42 = vpop.xlane.xlu0 %1002 }
 0x266   : > { %3463 = vmatmul.msk.f32.gmra.mxu3 %vm706_vm1, %v4845_v19 }
 0x267   : > { %3511 = vmatmul.msk.f32.gmra.mxu0 %vm706_vm1, %v2039_v0  ;;  %3558 = vmatmul.msk.f32.gmra.mxu1 %vm706_vm1, %v2647_v49  ;;  %v1032_v49 = vsub.f32 %v4929_v5, %v1001_v60 }
 0x269   : > { %v1048_v53 = vmul.f32 1.442695, %v1032_v49 }
 0x26b   : > { %3849 = vpow2.f32 %v1048_v53 }
 0x26e   : > { %3464 = vmatmul.msk.f32.gmra.mxu3 %vm706_vm1, %v7249_v57  ;;  %v1005_v57 = vpop.xlane.xlu1 %1004 }
 0x26f   : > { %3512 = vmatmul.msk.f32.gmra.mxu0 %vm706_vm1, %v2041_v38  ;;  %3559 = vmatmul.msk.f32.gmra.mxu1 %vm706_vm1, %v2649_v32  ;;  %v1033_v38 = vsub.f32 %v4961_v54, %v1003_v42  ;;  %v1034_v54 = vsub.f32 %v4864_v10, %v1005_v57 }
 0x271   : > { %v1050_v4 = vmul.f32 1.442695, %v1033_v38  ;;  %v1052_v22 = vmul.f32 1.442695, %v1034_v54 }
 0x273   : > { %3851 = vpow2.f32 %v1050_v4 }
 0x274   : > { %v2155_v19 = vpop.f32.mrf.mxu0  ;;  %3853 = vpow2.f32 %v1052_v22 }
 0x275   : > { %v5178_v35 = vsel %vm4907_vm15, %v2155_v19, %v4858_v20  ;;  %v5247_v19 = vpop.eup %3849 }
 0x276   : > { %2219 = vmax.xlane.f32.xlu2 %v5178_v35 }
 0x277   : > { %3560 = vmatmul.msk.f32.gmra.mxu1 %vm706_vm1, %v2651_v45  ;;  %vm5205_vm1 = vcmp.ne.s32.totalorder %v967_v30, 0 }
 0x278   : > { %v5217_v61 = vsel %vm5205_vm1, %v865_v12, %v4858_v20 }
 0x279   : > { %v1545_v40 = vpop.f32.mrf.mxu3  ;;  %v5273_v31 = vpop.eup %3851 }
 0x27a   : > { %v5223_v14 = vsel %vm4907_vm15, %v1545_v40, %v4858_v20  ;;  %v5278_v30 = vpop.eup %3853 }
 0x27c   : > { %v2158_v34 = vpop.f32.mrf.mxu0  ;;  %v2765_v25 = vpop.f32.mrf.mxu1 }
 0x27d   : > { %v5190_v55 = vsel %vm4945_vm4, %v2158_v34, %v4858_v20  ;;  %v5195_v15 = vsel %vm4907_vm15, %v2765_v25, %v4858_v20  ;;  %v1007_v25 = vpop.xlane.xlu1 %1006 }
 0x27e   : > { %2221 = vmax.xlane.f32.xlu0 %v5190_v55  ;;  %2829 = vmax.xlane.f32.xlu1 %v5195_v15 }
 0x27f   : > { %1028 = vmax.xlane.f32.xlu2 %v5202_v8 }
 0x281   : > { %v1548_v33 = vpop.f32.mrf.mxu3 }
 0x282   : > { %v5212_v27 = vsel %vm4945_vm4, %v1548_v33, %v4858_v20 }
 0x284   : > { %v2768_v43 = vpop.f32.mrf.mxu1  ;;  %v2161_v59 = vpop.f32.mrf.mxu0 }
 0x285   : > { %v5231_v46 = vsel %vm4851_vm8, %v2161_v59, %v4858_v20  ;;  %v5242_v5 = vsel %vm4945_vm4, %v2768_v43, %v4858_v20  ;;  %v1035_v43 = vsub.f32 %v4891_v56, %v1007_v25  ;;  %v1009_v59 = vpop.xlane.xlu2 %1008 }
 0x286   : > { %1611 = vmax.xlane.f32.xlu1 %v5212_v27  ;;  %1030 = vmax.xlane.f32.xlu0 %v5217_v61 }
 0x287   : > { %1609 = vmax.xlane.f32.xlu2 %v5223_v14  ;;  %v1054_v53 = vmul.f32 1.442695, %v1035_v43 }
 0x289   : > { %v1551_v29 = vpop.f32.mrf.mxu3  ;;  %3855 = vpow2.f32 %v1054_v53 }
 0x28a   : > { %v5252_v26 = vsel %vm4851_vm8, %v1551_v29, %v4858_v20  ;;  %v1036_v29 = vsub.f32 %v4898_v37, %v1009_v59 }
 0x28c   : > { %v2771_v0 = vpop.f32.mrf.mxu1  ;;  %v2164_v32 = vpop.f32.mrf.mxu0 }
 0x28d   : > { %v5236_v13 = vsel %vm4851_vm8, %v2771_v0, %v4858_v20  ;;  %v5258_v9 = vsel %vm4871_vm11, %v2164_v32, %v4858_v20  ;;  %v1056_v32 = vmul.f32 1.442695, %v1036_v29  ;;  %v1011_v57 = vpop.xlane.xlu2 %1010  ;;  %vm7269_vm8 = vnez %v7234_v44 }
 0x28e   : > { %2223 = vmax.xlane.f32.xlu1 %v5231_v46  ;;  %2833 = vmax.xlane.f32.xlu0 %v5236_v13  ;;  %v1037_v37 = vsub.f32 %v4936_v39, %v1011_v57 }
 0x28f   : > { %2831 = vmax.xlane.f32.xlu2 %v5242_v5  ;;  %v5313_v4 = vpop.eup %3855  ;;  %3857 = vpow2.f32 %v1056_v32  ;;  %v1015_v32 = vpop.xlane.xlu1 %1014 }
 0x290   : > { %v1058_v1 = vmul.f32 1.442695, %v1037_v37  ;;  %v1039_v37 = vsub.f32 %v4995_v6, %v1015_v32 }
 0x291   : > { %v1554_v45 = vpop.f32.mrf.mxu3 }
 0x292   : > { %v5289_v60 = vsel %vm4871_vm11, %v1554_v45, %v4858_v20  ;;  %3859 = vpow2.f32 %v1058_v1 }
 0x294   : > { %v2774_v21 = vpop.f32.mrf.mxu1  ;;  %v2167_v52 = vpop.f32.mrf.mxu0 }
 0x295   : > { %v5266_v16 = vsel %vm4871_vm11, %v2774_v21, %v4858_v20  ;;  %v5271_v40 = vsel %vm4879_vm12, %v2167_v52, %v4858_v20  ;;  %v1017_v1 = vpop.xlane.xlu2 %1016  ;;  %vm7272_vm11 = vnez %v7237_v58 }
 0x296   : > { %1080 = vadd.xlane.f32.xlu1 %v5247_v19  ;;  %1613 = vmax.xlane.f32.xlu0 %v5252_v26  ;;  %v1040_v6 = vsub.f32 %v5019_v51, %v1017_v1 }
 0x297   : > { %2225 = vmax.xlane.f32.xlu2 %v5258_v9 }
 0x298   : > { %v1064_v28 = vmul.f32 1.442695, %v1040_v6 }
 0x299   : > { %v1557_v34 = vpop.f32.mrf.mxu3 }
 0x29a   : > { %v5283_v12 = vsel %vm4879_vm12, %v1557_v34, %v4858_v20  ;;  %v5339_v34 = vpop.eup %3857 }
 0x29b   : > { %v5344_v43 = vpop.eup %3859 }
 0x29c   : > { %v2777_v10 = vpop.f32.mrf.mxu1  ;;  %v2170_v33 = vpop.f32.mrf.mxu0 }
 0x29d   : > { %v5297_v0 = vsel %vm4916_vm0, %v2170_v33, %v4858_v20  ;;  %v5308_v56 = vsel %vm4879_vm12, %v2777_v10, %v4858_v20  ;;  %v1013_v33 = vpop.xlane.xlu0 %1012 }
 0x29e   : > { %2835 = vmax.xlane.f32.xlu1 %v5266_v16  ;;  %2227 = vmax.xlane.f32.xlu0 %v5271_v40 }
 0x29f   : > { %1082 = vadd.xlane.f32.xlu2 %v5273_v31 }
 0x2a1   : > { %v1560_v42 = vpop.f32.mrf.mxu3 }
 0x2a2   : > { %v5318_v21 = vsel %vm4916_vm0, %v1560_v42, %v4858_v20  ;;  %v1038_v42 = vsub.f32 %v4988_v18, %v1013_v33 }
 0x2a4   : > { %v2780_v49 = vpop.f32.mrf.mxu1  ;;  %v2173_v38 = vpop.f32.mrf.mxu0 }
 0x2a5   : > { %v5302_v62 = vsel %vm4916_vm0, %v2780_v49, %v4858_v20  ;;  %v5324_v54 = vsel %vm4970_vm6, %v2173_v38, %v4858_v20  ;;  %v1060_v38 = vmul.f32 1.442695, %v1038_v42  ;;  %v1019_v51 = vpop.xlane.xlu0 %1018 }
 0x2a6   : > { %1617 = vmax.xlane.f32.xlu1 %v5283_v12  ;;  %1084 = vadd.xlane.f32.xlu0 %v5278_v30 }
 0x2a7   : > { %1615 = vmax.xlane.f32.xlu2 %v5289_v60  ;;  %3861 = vpow2.f32 %v1060_v38 }
 0x2a9   : > { %v1563_v45 = vpop.f32.mrf.mxu3 }
 0x2aa   : > { %v5355_v53 = vsel %vm4970_vm6, %v1563_v45, %v4858_v20 }
 0x2ac   : > { %v2783_v3 = vpop.f32.mrf.mxu1  ;;  %v2176_v52 = vpop.f32.mrf.mxu0 }
 0x2ad   : > { %v5332_v22 = vsel %vm4970_vm6, %v2783_v3, %v4858_v20  ;;  %v5337_v10 = vsel %vm4976_vm7, %v2176_v52, %v4858_v20  ;;  %v1062_v52 = vmul.f32 1.442695, %v1039_v37  ;;  %v1021_v37 = vpop.xlane.xlu1 %1020 }
 0x2ae   : > { %2229 = vmax.xlane.f32.xlu1 %v5297_v0  ;;  %2839 = vmax.xlane.f32.xlu0 %v5302_v62 }
 0x2af   : > { %2837 = vmax.xlane.f32.xlu2 %v5308_v56  ;;  %3863 = vpow2.f32 %v1062_v52 }
 0x2b0   : > { %3865 = vpow2.f32 %v1064_v28  ;;  %v1041_v28 = vsub.f32 %v5046_v36, %v1019_v51  ;;  %v1042_v51 = vsub.f32 %v5072_v11, %v1021_v37 }
 0x2b1   : > { %v1566_v25 = vpop.f32.mrf.mxu3 }
 0x2b2   : > { %v5349_v59 = vsel %vm4976_vm7, %v1566_v25, %v4858_v20  ;;  %v5379_v25 = vpop.eup %3861 }
 0x2b3   : > { %7256 = vst [vmem:[#allocation10_spill] sm:$0xff] %v5379_v25 }
 0x2b4   : > { %v2786_v39 = vpop.f32.mrf.mxu1  ;;  %v2179_v49 = vpop.f32.mrf.mxu0 }
 0x2b5   : > { %v5363_v57 = vsel %vm5005_vm10, %v2179_v49, %v4858_v20  ;;  %v5374_v18 = vsel %vm4976_vm7, %v2786_v39, %v4858_v20  ;;  %v5405_v32 = vpop.eup %3863 }
 0x2b6   : > { %1086 = vadd.xlane.f32.xlu1 %v5313_v4  ;;  %1619 = vmax.xlane.f32.xlu0 %v5318_v21  ;;  %7254 = vst [vmem:[#allocation7_spill] sm:$0xff] %v5363_v57  ;;  %v5410_v1 = vpop.eup %3865 }
 0x2b7   : > { %2231 = vmax.xlane.f32.xlu2 %v5324_v54  ;;  %7260 = vst [vmem:[#allocation16_spill] sm:$0xff] %v5405_v32 }
 0x2b8   : > { %7261 = vst [vmem:[#allocation20_spill] sm:$0xff] %v5410_v1 }
 0x2b9   : > { %v1569_v3 = vpop.f32.mrf.mxu3 }
 0x2ba   : > { %v5384_v33 = vsel %vm5005_vm10, %v1569_v3, %v4858_v20 }
 0x2bc   : > { %v2789_v29 = vpop.f32.mrf.mxu1  ;;  %v2182_v45 = vpop.f32.mrf.mxu0 }
 0x2bd   : > { %v5368_v48 = vsel %vm5005_vm10, %v2789_v29, %v4858_v20  ;;  %v5390_v39 = vsel %vm5033_vm2, %v2182_v45, %v4858_v20  ;;  %v1023_v45 = vpop.xlane.xlu2 %1022 }
 0x2be   : > { %2841 = vmax.xlane.f32.xlu1 %v5332_v22  ;;  %2233 = vmax.xlane.f32.xlu0 %v5337_v10  ;;  %7255 = vst [vmem:[#allocation9_spill] sm:$0xff] %v5368_v48 }
 0x2bf   : > { %1088 = vadd.xlane.f32.xlu2 %v5339_v34  ;;  %7257 = vst [vmem:[#allocation11_spill] sm:$0xff] %v5390_v39 }
 0x2c1   : > { %v1572_v49 = vpop.f32.mrf.mxu3 }
 0x2c4   : > { %v2792_v7 = vpop.f32.mrf.mxu1  ;;  %v2185_v42 = vpop.f32.mrf.mxu0 }
 0x2c5   : > { %v5398_v29 = vsel %vm5033_vm2, %v2792_v7, %v4858_v20  ;;  %v5403_v38 = vsel %vm5057_vm5, %v2185_v42, %v4858_v20  ;;  %v5421_v42 = vsel %vm5033_vm2, %v1572_v49, %v4858_v20 }
 0x2c6   : > { %1623 = vmax.xlane.f32.xlu1 %v5349_v59  ;;  %1090 = vadd.xlane.f32.xlu0 %v5344_v43  ;;  %7258 = vst [vmem:[#allocation15_spill] sm:$0xff] %v5398_v29 }
 0x2c7   : > { %1621 = vmax.xlane.f32.xlu2 %v5355_v53  ;;  %7259 = vst [vmem:[#allocation18_spill] sm:$0xff] %v5403_v38 }
 0x2c8   : > { %7263 = vst [vmem:[#allocation8_spill] sm:$0xff] %v5421_v42 }
 0x2c9   : > { %v1575_v52 = vpop.f32.mrf.mxu3 }
 0x2ca   : > { %v5415_v7 = vsel %vm5057_vm5, %v1575_v52, %v4858_v20 }
 0x2cb   : > { %7262 = vst [vmem:[#allocation6_spill] sm:$0xff] %v5415_v7 }
 0x2cc   : > { %v2795_v3 = vpop.f32.mrf.mxu1  ;;  %v2188_v6 = vpop.f32.mrf.mxu0 }
 0x2cd   : > { %v5444_v49 = vsel %vm5057_vm5, %v2795_v3, %v4858_v20  ;;  %v1043_v3 = vsub.f32 %v5090_v24, %v1023_v45 }
 0x2ce   : > { %2235 = vmax.xlane.f32.xlu1 %v5363_v57  ;;  %2845 = vmax.xlane.f32.xlu0 %v5368_v48  ;;  %7266 = vst [vmem:[#allocation14_spill] sm:$0xff] %v5444_v49 }
 0x2cf   : > { %2843 = vmax.xlane.f32.xlu2 %v5374_v18 }
 0x2d1   : > { %v1578_v36 = vpop.f32.mrf.mxu3 }
 0x2d2   : > { %v5460_v23 = vsel %vm5078_vm13, %v1578_v36, %v4858_v20 }
 0x2d3   : > { %7268 = vst [vmem:[#allocation19_spill] sm:$0xff] %v5460_v23 }
 0x2d4   : > { %v2798_v52 = vpop.f32.mrf.mxu1 }
 0x2d5   : > { %v5438_v17 = vsel %vm5078_vm13, %v2798_v52, %v4858_v20 }
 0x2d6   : > { %1092 = vadd.xlane.f32.xlu1 %v5379_v25  ;;  %1625 = vmax.xlane.f32.xlu0 %v5384_v33  ;;  %v1066_v25 = vmul.f32 1.442695, %v1041_v28  ;;  %7265 = vst [vmem:[#allocation13_spill] sm:$0xff] %v5438_v17 }
 0x2d7   : > { %2237 = vmax.xlane.f32.xlu2 %v5390_v39 }
 0x2d8   : > { %3867 = vpow2.f32 %v1066_v25 }
 0x2d9   : > { %v1581_v37 = vpop.f32.mrf.mxu3 }
 0x2dc   : > { %v2801_v25 = vpop.f32.mrf.mxu1 }
 0x2de   : > { %2847 = vmax.xlane.f32.xlu1 %v5398_v29  ;;  %2239 = vmax.xlane.f32.xlu0 %v5403_v38  ;;  %v1025_v38 = vpop.xlane.xlu0 %1024  ;;  %v5426_v29 = vpop.xlane.xlu1 %1026 }
 0x2df   : > { %1094 = vadd.xlane.f32.xlu2 %v5405_v32 }
 0x2e6   : > { %1629 = vmax.xlane.f32.xlu1 %v5415_v7  ;;  %1096 = vadd.xlane.f32.xlu0 %v5410_v1  ;;  %v5433_v7 = vsel %vm5078_vm13, %v2188_v6, %v4858_v20  ;;  %v2191_v6 = vpop.f32.mrf.mxu0 }
 0x2e7   : > { %1627 = vmax.xlane.f32.xlu2 %v5421_v42  ;;  %7264 = vst [vmem:[#allocation12_spill] sm:$0xff] %v5433_v7  ;;  %v5455_v42 = vpop.eup %3867  ;;  %v5466_v11 = vsel %vm7269_vm8, %v2191_v6, %v4858_v20  ;;  %v5480_v6 = vsel %vm7269_vm8, %v2801_v25, %v4858_v20  ;;  %v1584_v25 = vpop.f32.mrf.mxu3 }
 0x2e8   : > { %7267 = vst [vmem:[#allocation17_spill] sm:$0xff] %v5455_v42 }
 0x2e9   : > { %v5428_v32 = vpop.xlane.xlu2 %2219  ;;  %7270 = vst [vmem:[#allocation21_spill] sm:$0xff] %v5466_v11 }
 0x2ea   : > { %7271 = vst [vmem:[#allocation22_spill] sm:$0xff] %v5480_v6 }
 0x2ee   : > { %2241 = vmax.xlane.f32.xlu1 %v5433_v7  ;;  %2851 = vmax.xlane.f32.xlu0 %v5438_v17  ;;  %v1068_v7 = vmul.f32 1.442695, %v1042_v51  ;;  %v2194_v36 = vpop.f32.mrf.mxu0 }
 0x2ef   : > { %2849 = vmax.xlane.f32.xlu2 %v5444_v49  ;;  %v5485_v24 = vsel %vm7272_vm11, %v2194_v36, %v4858_v20  ;;  %v5503_v36 = vsel %vm7272_vm11, %v1584_v25, %v4858_v20  ;;  %v1587_v58 = vpop.f32.mrf.mxu3 }
 0x2f0   : > { %3869 = vpow2.f32 %v1068_v7  ;;  %7273 = vst [vmem:[#allocation23_spill] sm:$0xff] %v5485_v24  ;;  %v2804_v7 = vpop.f32.mrf.mxu1 }
 0x2f1   : > { %v5449_v28 = vpop.xlane.xlu0 %2221  ;;  %v5451_v52 = vpop.xlane.xlu1 %2829  ;;  %7276 = vst [vmem:[#allocation26_spill] sm:$0xff] %v5503_v36 }
 0x2f2   : > { %v5453_v1 = vpop.xlane.xlu2 %1028 }
 0x2f6   : > { %1098 = vadd.xlane.f32.xlu1 %v5455_v42  ;;  %1631 = vmax.xlane.f32.xlu0 %v5460_v23  ;;  %v1070_v42 = vmul.f32 1.442695, %v1043_v3  ;;  %v5487_v45 = vpop.eup %3869 }
 0x2f7   : > { %2243 = vmax.xlane.f32.xlu2 %v5466_v11  ;;  %7274 = vst [vmem:[#allocation24_spill] sm:$0xff] %v5487_v45 }
 0x2f8   : > { %3871 = vpow2.f32 %v1070_v42  ;;  %v5509_v42 = vsel %vm7269_vm8, %v1581_v37, %v4858_v20  ;;  %v2807_v25 = vpop.f32.mrf.mxu1  ;;  %v2251_v37 = vsub.f32 %v5178_v35, %v5428_v32 }
 0x2f9   : > { %v5471_v51 = vpop.xlane.xlu1 %1611  ;;  %v5473_v2 = vpop.xlane.xlu0 %1030  ;;  %7277 = vst [vmem:[#allocation27_spill] sm:$0xff] %v5509_v42 }
 0x2fa   : > { %v5475_v17 = vpop.xlane.xlu2 %1609 }
 0x2fe   : > { %2853 = vmax.xlane.f32.xlu1 %v5480_v6  ;;  %2245 = vmax.xlane.f32.xlu0 %v5485_v24  ;;  %v5498_v49 = vpop.eup %3871  ;;  %v2197_v24 = vpop.f32.mrf.mxu0 }
 0x2ff   : > { %1100 = vadd.xlane.f32.xlu2 %v5487_v45  ;;  %7275 = vst [vmem:[#allocation25_spill] sm:$0xff] %v5498_v49  ;;  %v1044_v45 = vsub.f32 %v5105_v41, %v1025_v38  ;;  %v5524_v44 = vsel %vm5182_vm3, %v2197_v24, %v4858_v20  ;;  %v5529_v41 = vsel %vm5182_vm3, %v2807_v25, %v4858_v20 }
 0x300   : > { %7278 = vst [vmem:[#allocation28_spill] sm:$0xff] %v5524_v44  ;;  %v5535_v38 = vsel %vm7272_vm11, %v2804_v7, %v4858_v20 }
 0x301   : > { %v5492_v3 = vpop.xlane.xlu1 %2223  ;;  %v5494_v11 = vpop.xlane.xlu0 %2833  ;;  %v1072_v39 = vmul.f32 1.442695, %v1044_v45  ;;  %7279 = vst [vmem:[#allocation29_spill] sm:$0xff] %v5529_v41  ;;  %v1045_v45 = vsub.f32 %v5119_v50, %v5426_v29  ;;  %v1046_v50 = vsub.f32 %v5202_v8, %v5453_v1  ;;  %v5558_v29 = vsel %vm5182_vm3, %v1587_v58, %v4858_v20 }
 0x302   : > { %v5496_v23 = vpop.xlane.xlu2 %2831  ;;  %7280 = vst [vmem:[#allocation30_spill] sm:$0xff] %v5535_v38 }
 0x303   : > { %v1074_v35 = vmul.f32 1.442695, %v1045_v45  ;;  %7282 = vst [vmem:[#allocation32_spill] sm:$0xff] %v5558_v29  ;;  %v1641_v45 = vsub.f32 %v5223_v14, %v5475_v17  ;;  %v1076_v8 = vmul.f32 1.442695, %v1046_v50 }
 0x306   : > { %1635 = vmax.xlane.f32.xlu1 %v5503_v36  ;;  %1102 = vadd.xlane.f32.xlu0 %v5498_v49 }
 0x307   : > { %1633 = vmax.xlane.f32.xlu2 %v5509_v42 }
 0x309   : > { %v5514_v6 = vpop.xlane.xlu1 %1080  ;;  %v5516_v57 = vpop.xlane.xlu0 %1613 }
 0x30a   : > { %3873 = vrcp.f32 %v5514_v6  ;;  %v5519_v36 = vpop.xlane.xlu2 %2225  ;;  %vm1117_vm15 = vweird.f32 %v5514_v6  ;;  %v1121_v14 = vand.u32 2147483647, %v5514_v6 }
 0x30b   : > { %3875 = vpow2.f32 %v1072_v39  ;;  %v2200_v39 = vpop.f32.mrf.mxu0 }
 0x30c   : > { %vm1122_vm6 = vcmp.eq.f32.partialorder %v1121_v14, 8.507059e+37 }
 0x30e   : > { %2247 = vmax.xlane.f32.xlu1 %v5524_v44  ;;  %2857 = vmax.xlane.f32.xlu0 %v5529_v41  ;;  %v2267_v41 = vmul.f32 1.442695, %v2251_v37  ;;  %v5564_v37 = vsel %vm5205_vm1, %v2200_v39, %v4858_v20 }
 0x30f   : > { %2855 = vmax.xlane.f32.xlu2 %v5535_v38  ;;  %7283 = vst [vmem:[#allocation33_spill] sm:$0xff] %v5564_v37 }
 0x310   : > { %v3874_v24 = vpop.eup %3873 }
 0x311   : > { %v1113_v25 = vmul.f32 %v3874_v24, %v5514_v6  ;;  %v5544_v44 = vpop.xlane.xlu1 %2835  ;;  %v5546_v49 = vpop.xlane.xlu0 %2227  ;;  %vm1118_vm12 = vweird.f32 %v3874_v24 }
 0x312   : > { %v5548_v7 = vpop.xlane.xlu2 %1082  ;;  %v5551_v32 = vpop.eup %3875  ;;  %vm5585_vm0 = vmor %vm1117_vm15, %vm1118_vm12 }
 0x313   : > { %v1114_v42 = vsub.f32 1.0, %v1113_v25  ;;  %3877 = vrcp.f32 %v5548_v7  ;;  %7281 = vst [vmem:[#allocation31_spill] sm:$0xff] %v5551_v32  ;;  %v2810_v25 = vpop.f32.mrf.mxu1  ;;  %vm1132_vm7 = vweird.f32 %v5548_v7 }
 0x314   : > { %3879 = vpow2.f32 %v2267_v41  ;;  %v1657_v41 = vmul.f32 1.442695, %v1641_v45  ;;  %v1138_v45 = vand.u32 2147483648, %v5548_v7 }
 0x315   : > { %v1115_v38 = vmul.f32 %v3874_v24, %v1114_v42  ;;  %3881 = vpow2.f32 %v1074_v35 }
 0x316   : > { %1104 = vadd.xlane.f32.xlu1 %v5551_v32  ;;  %1637 = vmax.xlane.f32.xlu0 %v5558_v29  ;;  %v1123_v29 = vand.u32 2147483648, %v5514_v6  ;;  %v5593_v6 = vsel %vm5205_vm1, %v2810_v25, %v4858_v20 }
 0x317   : > { %2249 = vmax.xlane.f32.xlu2 %v5564_v37  ;;  %v1116_v58 = vadd.f32 %v3874_v24, %v1115_v38  ;;  %v2252_v38 = vsub.f32 %v5190_v55, %v5449_v28  ;;  %v1136_v55 = vand.u32 2147483647, %v5548_v7  ;;  %v2862_v28 = vsub.f32 %v5242_v5, %v5496_v23 }
 0x319   : > { %v3878_v63 = vpop.eup %3877  ;;  %v5570_v1 = vpop.xlane.xlu1 %1617  ;;  %v1120_v37 = vsel %vm5585_vm0, %v3874_v24, %v1116_v58  ;;  %v2861_v24 = vsub.f32 %v5195_v15, %v5451_v52  ;;  %v2269_v5 = vmul.f32 1.442695, %v2252_v38  ;;  %vm1137_vm2 = vcmp.eq.f32.partialorder %v1136_v55, 8.507059e+37 }
 0x31a   : > { %v5572_v42 = vpop.xlane.xlu0 %1084  ;;  %v1128_v39 = vmul.f32 %v3878_v63, %v5548_v7  ;;  %v5575_v32 = vpop.xlane.xlu2 %1615  ;;  %vm1133_vm4 = vweird.f32 %v3878_v63  ;;  %v2879_v52 = vmul.f32 1.442695, %v2862_v28 }
 0x31b   : > { %3883 = vrcp.f32 %v5572_v42  ;;  %v5581_v35 = vpop.eup %3879  ;;  %vm1134_vm10 = vmor %vm1132_vm7, %vm1133_vm4  ;;  %vm1147_vm13 = vweird.f32 %v5572_v42 }
 0x31c   : > { %v1129_v17 = vsub.f32 1.0, %v1128_v39  ;;  %7284 = vst [vmem:[#allocation34_spill] sm:$0xff] %v5581_v35  ;;  %3885 = vpow2.f32 %v1076_v8  ;;  %v5595_v39 = vpop.eup %3881  ;;  %v1124_v8 = vor.u32 1.1754944e-38, %v1123_v29 }
 0x31d   : > { %3887 = vpow2.f32 %v1657_v41 }
 0x31e   : > { %v1130_v48 = vmul.f32 %v3878_v63, %v1129_v17  ;;  %2859 = vmax.xlane.f32.xlu1 %v5593_v6  ;;  %2299 = vadd.xlane.f32.xlu0 %v5581_v35  ;;  %v1125_v58 = vsel %vm1122_vm6, %v1124_v8, %v1120_v37  ;;  %v1139_v17 = vor.u32 1.1754944e-38, %v1138_v45  ;;  %v2877_v37 = vmul.f32 1.442695, %v2861_v24 }
 0x31f   : > { %1106 = vadd.xlane.f32.xlu2 %v5595_v39  ;;  %v1352_v14 = vmul.f32 %v5247_v19, %v1125_v58  ;;  %3889 = vpow2.f32 %v2269_v5  ;;  %v1643_v19 = vsub.f32 %v5252_v26, %v5516_v57  ;;  %v2254_v5 = vsub.f32 %v5258_v9, %v5519_v36 }
 0x320   : > { %v1131_v25 = vadd.f32 %v3878_v63, %v1130_v48  ;;  %v1590_v48 = vpop.f32.mrf.mxu3  ;;  %3891 = vpow2.f32 %v2879_v52 }
 0x321   : > { %v5609_v50 = vpop.xlane.xlu1 %2229  ;;  %v5613_v35 = vpop.eup %3883  ;;  %v5632_v28 = vsel %vm5205_vm1, %v1590_v48, %v4858_v20  ;;  %3893 = vpow2.f32 %v2877_v37  ;;  %v1661_v26 = vmul.f32 1.442695, %v1643_v19  ;;  %v1153_v37 = vand.u32 2147483648, %v5572_v42 }
 0x322   : > { %v5611_v41 = vpop.xlane.xlu0 %2839  ;;  %v1135_v23 = vsel %vm1134_vm10, %v3878_v63, %v1131_v25  ;;  %v5617_v29 = vpop.xlane.xlu2 %2837  ;;  %v1143_v38 = vmul.f32 %v5613_v35, %v5572_v42  ;;  %v1047_v63 = vsub.f32 %v5217_v61, %v5473_v2  ;;  %v1642_v61 = vsub.f32 %v5212_v27, %v5471_v51 }
 0x323   : > { %v5619_v15 = vpop.eup %3885  ;;  %v1140_v7 = vsel %vm1137_vm2, %v1139_v17, %v1135_v23  ;;  %v2863_v27 = vsub.f32 %v5236_v13, %v5494_v11  ;;  %v2253_v13 = vsub.f32 %v5231_v46, %v5492_v3  ;;  %vm1148_vm5 = vweird.f32 %v5613_v35 }
 0x324   : > { %v1353_v45 = vmul.f32 %v5273_v31, %v1140_v7  ;;  %v5623_v8 = vpop.eup %3887  ;;  %v1144_v20 = vsub.f32 1.0, %v1143_v38  ;;  %v1078_v2 = vmul.f32 1.442695, %v1047_v63  ;;  %v1659_v25 = vmul.f32 1.442695, %v1642_v61  ;;  %vm5682_vm3 = vmor %vm1147_vm13, %vm1148_vm5 }
 0x325   : > { %v5651_v57 = vpop.eup %3889  ;;  %v2881_v11 = vmul.f32 1.442695, %v2863_v27  ;;  %v2273_v7 = vmul.f32 1.442695, %v2254_v5  ;;  %v1151_v46 = vand.u32 2147483647, %v5572_v42  ;;  %v2865_v27 = vsub.f32 %v5308_v56, %v5617_v29 }
 0x326   : > { %v3589_v55 = vpack.c.bf16 %v1353_v45, %v1352_v14  ;;  %1689 = vadd.xlane.f32.xlu1 %v5623_v8  ;;  %1108 = vadd.xlane.f32.xlu0 %v5619_v15  ;;  %v5655_v51 = vpop.eup %3891  ;;  %v1145_v58 = vmul.f32 %v5613_v35, %v1144_v20  ;;  %v2271_v38 = vmul.f32 1.442695, %v2253_v13  ;;  %v1645_v63 = vsub.f32 %v5283_v12, %v5570_v1 }
 0x327   : > { %1639 = vmax.xlane.f32.xlu2 %v5632_v28  ;;  %v5658_v17 = vpop.eup %3893  ;;  %vm1152_vm14 = vcmp.eq.f32.partialorder %v1151_v46, 8.507059e+37 }
 0x328   : > { %3590 = vst [vmem:[%s5641_s12] sm:$0xff] %v3589_v55   ;;  %v1146_v48 = vadd.f32 %v5613_v35, %v1145_v58  ;;  %v2864_v58 = vsub.f32 %v5266_v16, %v5544_v44 }
 0x329   : > { %v5644_v47 = vpop.xlane.xlu1 %1086 }
 0x32a   : > { %v5646_v31 = vpop.xlane.xlu0 %1619  ;;  %3895 = vrcp.f32 %v5644_v47  ;;  %v5649_v24 = vpop.xlane.xlu2 %2231  ;;  %v1168_v55 = vand.u32 2147483648, %v5644_v47  ;;  %v1150_v61 = vsel %vm5682_vm3, %v5613_v35, %v1146_v48  ;;  %v1166_v20 = vand.u32 2147483647, %v5644_v47 }
 0x32b   : > { %3897 = vpow2.f32 %v1078_v2  ;;  %vm1162_vm1 = vweird.f32 %v5644_v47  ;;  %v2883_v46 = vmul.f32 1.442695, %v2864_v58 }
 0x32c   : > { %3899 = vpow2.f32 %v1661_v26  ;;  %v1644_v26 = vsub.f32 %v5289_v60, %v5575_v32  ;;  %v1169_v60 = vor.u32 1.1754944e-38, %v1168_v55  ;;  %vm1167_vm11 = vcmp.eq.f32.partialorder %v1166_v20, 8.507059e+37 }
 0x32d   : > { %3901 = vpow2.f32 %v1659_v25  ;;  %v1154_v25 = vor.u32 1.1754944e-38, %v1153_v37 }
 0x32e   : > { %2301 = vadd.xlane.f32.xlu1 %v5651_v57  ;;  %2911 = vadd.xlane.f32.xlu0 %v5655_v51 }
 0x32f   : > { %2909 = vadd.xlane.f32.xlu2 %v5658_v17  ;;  %v1155_v5 = vsel %vm1152_vm14, %v1154_v25, %v1150_v61 }
 0x330   : > { %v3896_v23 = vpop.eup %3895  ;;  %v1354_v44 = vmul.f32 %v5278_v30, %v1155_v5 }
 0x331   : > { %v1158_v52 = vmul.f32 %v3896_v23, %v5644_v47  ;;  %v5670_v9 = vpop.xlane.xlu1 %2841  ;;  %v5680_v45 = vpop.eup %3897  ;;  %vm1163_vm9 = vweird.f32 %v3896_v23  ;;  %v1663_v47 = vmul.f32 1.442695, %v1644_v26 }
 0x332   : > { %v5672_v36 = vpop.xlane.xlu0 %2233  ;;  %v5675_v14 = vpop.xlane.xlu2 %1088  ;;  %vm1164_vm8 = vmor %vm1162_vm1, %vm1163_vm9 }
 0x333   : > { %v1159_v3 = vsub.f32 1.0, %v1158_v52  ;;  %3903 = vrcp.f32 %v5675_v14  ;;  %v5687_v19 = vpop.eup %3899  ;;  %vm1177_vm15 = vweird.f32 %v5675_v14 }
 0x334   : > { %3905 = vpow2.f32 %v2881_v11  ;;  %v5693_v2 = vpop.eup %3901 }
 0x335   : > { %v1160_v42 = vmul.f32 %v3896_v23, %v1159_v3  ;;  %3907 = vpow2.f32 %v2273_v7  ;;  %v2885_v7 = vmul.f32 1.442695, %v2865_v27  ;;  %v2255_v3 = vsub.f32 %v5271_v40, %v5546_v49 }
 0x336   : > { %1110 = vadd.xlane.f32.xlu1 %v5680_v45  ;;  %1693 = vadd.xlane.f32.xlu0 %v5687_v19  ;;  %3909 = vpow2.f32 %v2271_v38  ;;  %v1665_v49 = vmul.f32 1.442695, %v1645_v63 }
 0x337   : > { %v1161_v35 = vadd.f32 %v3896_v23, %v1160_v42  ;;  %1691 = vadd.xlane.f32.xlu2 %v5693_v2  ;;  %v2275_v40 = vmul.f32 1.442695, %v2255_v3 }
 0x339   : > { %v5706_v32 = vpop.eup %3903  ;;  %v1165_v13 = vsel %vm1164_vm8, %v3896_v23, %v1161_v35  ;;  %v5708_v11 = vpop.xlane.xlu1 %1623  ;;  %v1181_v35 = vand.u32 2147483647, %v5675_v14 }
 0x33a   : > { %v5710_v56 = vpop.xlane.xlu0 %1090  ;;  %v5712_v29 = vpop.eup %3905  ;;  %v1170_v48 = vsel %vm1167_vm11, %v1169_v60, %v1165_v13  ;;  %v1173_v52 = vmul.f32 %v5706_v32, %v5675_v14  ;;  %vm1178_vm12 = vweird.f32 %v5706_v32  ;;  %v2866_v60 = vsub.f32 %v5302_v62, %v5611_v41 }
 0x33b   : > { %v5716_v16 = vpop.xlane.xlu2 %1621  ;;  %v1355_v23 = vmul.f32 %v5313_v4, %v1170_v48  ;;  %3911 = vrcp.f32 %v5710_v56  ;;  %v5721_v37 = vpop.eup %3907  ;;  %v1646_v4 = vsub.f32 %v5318_v21, %v5646_v31  ;;  %v1183_v21 = vand.u32 2147483648, %v5675_v14  ;;  %vm5754_vm0 = vmor %vm1177_vm15, %vm1178_vm12 }
 0x33c   : > { %v1174_v38 = vsub.f32 1.0, %v1173_v52  ;;  %v5727_v61 = vpop.eup %3909  ;;  %3913 = vpow2.f32 %v1663_v47  ;;  %v1198_v47 = vand.u32 2147483648, %v5710_v56  ;;  %v2257_v62 = vsub.f32 %v5324_v54, %v5649_v24 }
 0x33d   : > { %v3594_v55 = vpack.c.bf16 %v1355_v23, %v1354_v44  ;;  %3915 = vpow2.f32 %v2885_v7  ;;  %v1667_v27 = vmul.f32 1.442695, %v1646_v4  ;;  %v1196_v44 = vand.u32 2147483647, %v5710_v56 }
 0x33e   : > { %v1175_v30 = vmul.f32 %v5706_v32, %v1174_v38  ;;  %2913 = vadd.xlane.f32.xlu1 %v5712_v29  ;;  %2305 = vadd.xlane.f32.xlu0 %v5721_v37  ;;  %3917 = vpow2.f32 %v2883_v46  ;;  %v1184_v41 = vor.u32 1.1754944e-38, %v1183_v21  ;;  %v2256_v7 = vsub.f32 %v5297_v0, %v5609_v50 }
 0x33f   : > { %3746 = vst [vmem:[%s5641_s12 + $0x8] sm:$0xff] %v3594_v55   ;;  %2303 = vadd.xlane.f32.xlu2 %v5727_v61  ;;  %3919 = vpow2.f32 %v2275_v40  ;;  %vm1182_vm6 = vcmp.eq.f32.partialorder %v1181_v35, 8.507059e+37  ;;  %vm1192_vm7 = vweird.f32 %v5710_v56  ;;  %v1199_v46 = vor.u32 1.1754944e-38, %v1198_v47 }
 0x340   : > { %v1176_v20 = vadd.f32 %v5706_v32, %v1175_v30  ;;  %3921 = vpow2.f32 %v1665_v49  ;;  %v2887_v54 = vmul.f32 1.442695, %v2866_v60  ;;  %vm1197_vm2 = vcmp.eq.f32.partialorder %v1196_v44, 8.507059e+37 }
 0x341   : > { %v3912_v12 = vpop.eup %3911  ;;  %v5736_v1 = vpop.xlane.xlu1 %2235  ;;  %3923 = vpow2.f32 %v1667_v27  ;;  %v2279_v50 = vmul.f32 1.442695, %v2257_v62  ;;  %v1648_v13 = vsub.f32 %v5349_v59, %v5708_v11 }
 0x342   : > { %v5738_v42 = vpop.xlane.xlu0 %2845  ;;  %v1188_v26 = vmul.f32 %v3912_v12, %v5710_v56  ;;  %v5746_v31 = vpop.eup %3913  ;;  %v1180_v52 = vsel %vm5754_vm0, %v5706_v32, %v1176_v20  ;;  %vm1193_vm4 = vweird.f32 %v3912_v12  ;;  %v2277_v56 = vmul.f32 1.442695, %v2256_v7 }
 0x343   : > { %v5743_v25 = vpop.xlane.xlu2 %2843  ;;  %v5750_v5 = vpop.eup %3915  ;;  %v1185_v23 = vsel %vm1182_vm6, %v1184_v41, %v1180_v52  ;;  %vm1194_vm10 = vmor %vm1192_vm7, %vm1193_vm4  ;;  %v1671_v44 = vmul.f32 1.442695, %v1648_v13 }
 0x344   : > { %v1189_v58 = vsub.f32 1.0, %v1188_v26  ;;  %v5759_v48 = vpop.eup %3917  ;;  %v1356_v4 = vmul.f32 %v5339_v34, %v1185_v23  ;;  %v2868_v26 = vsub.f32 %v5374_v18, %v5743_v25  ;;  %v2258_v18 = vsub.f32 %v5337_v10, %v5672_v36 }
 0x345   : > { %v5775_v63 = vpop.eup %3919 }
 0x346   : > { %v1190_v14 = vmul.f32 %v3912_v12, %v1189_v58  ;;  %1695 = vadd.xlane.f32.xlu1 %v5746_v31  ;;  %2917 = vadd.xlane.f32.xlu0 %v5750_v5  ;;  %v5780_v0 = vpop.eup %3921  ;;  %v2891_v25 = vmul.f32 1.442695, %v2868_v26  ;;  %v2281_v10 = vmul.f32 1.442695, %v2258_v18 }
 0x347   : > { %2915 = vadd.xlane.f32.xlu2 %v5759_v48  ;;  %v5784_v49 = vpop.eup %3923 }
 0x348   : > { %v1191_v32 = vadd.f32 %v3912_v12, %v1190_v14 }
 0x349   : > { %v5773_v3 = vpop.xlane.xlu1 %1092 }
 0x34a   : > { %v1626_v38 = vpop.xlane.xlu0 %1625  ;;  %v1195_v24 = vsel %vm1194_vm10, %v3912_v12, %v1191_v32  ;;  %3925 = vrcp.f32 %v5773_v3  ;;  %v1647_v12 = vsub.f32 %v5355_v53, %v5716_v16  ;;  %v1213_v32 = vand.u32 2147483648, %v5773_v3 }
 0x34b   : > { %v5778_v55 = vpop.xlane.xlu2 %2237  ;;  %v1200_v30 = vsel %vm1197_vm2, %v1199_v46, %v1195_v24  ;;  %3927 = vpow2.f32 %v2887_v54  ;;  %v1649_v36 = vsub.f32 %v5384_v33, %v1626_v38  ;;  %vm1207_vm13 = vweird.f32 %v5773_v3  ;;  %v7291_v24 = vld [vmem:[#allocation9_spill] sm:$0xff] }
 0x34c   : > { %v1357_v40 = vmul.f32 %v5344_v43, %v1200_v30  ;;  %3929 = vpow2.f32 %v2279_v50  ;;  %v2867_v43 = vsub.f32 %v5332_v22, %v5670_v9  ;;  %v1669_v21 = vmul.f32 1.442695, %v1647_v12  ;;  %v7299_v30 = vld [vmem:[#allocation14_spill] sm:$0xff] }
 0x34d   : > { %3931 = vpow2.f32 %v2277_v56  ;;  %v1673_v33 = vmul.f32 1.442695, %v1649_v36  ;;  %v1211_v46 = vand.u32 2147483647, %v5773_v3  ;;  %v2869_v50 = vsub.f32 %v7291_v24, %v5738_v42 }
 0x34e   : > { %v3599_v20 = vpack.c.bf16 %v1357_v40, %v1356_v4  ;;  %2307 = vadd.xlane.f32.xlu1 %v5775_v63  ;;  %1699 = vadd.xlane.f32.xlu0 %v5784_v49  ;;  %v2889_v22 = vmul.f32 1.442695, %v2867_v43  ;;  %v1214_v42 = vor.u32 1.1754944e-38, %v1213_v32  ;;  %v7295_v43 = vld [vmem:[#allocation7_spill] sm:$0xff]  ;;  %v7297_v32 = vld [vmem:[#allocation16_spill] sm:$0xff] }
 0x34f   : > { %1697 = vadd.xlane.f32.xlu2 %v5780_v0  ;;  %vm1212_vm14 = vcmp.eq.f32.partialorder %v1211_v46, 8.507059e+37  ;;  %v2893_v13 = vmul.f32 1.442695, %v2869_v50 }
 0x350   : > { %v5793_v34 = vpop.eup %3925  ;;  %3747 = vst [vmem:[%s5641_s12 + $0x10] sm:$0xff] %v3599_v20   ;;  %v7294_v20 = vld [vmem:[#allocation11_spill] sm:$0xff] }
 0x351   : > { %v1203_v53 = vmul.f32 %v5793_v34, %v5773_v3  ;;  %v5800_v16 = vpop.xlane.xlu1 %2847  ;;  %v5809_v60 = vpop.eup %3927  ;;  %vm1208_vm5 = vweird.f32 %v5793_v34  ;;  %v2260_v26 = vsub.f32 %v7294_v20, %v5778_v55 }
 0x352   : > { %v5802_v27 = vpop.xlane.xlu0 %2239  ;;  %v5811_v9 = vpop.eup %3929  ;;  %vm5839_vm3 = vmor %vm1207_vm13, %vm1208_vm5 }
 0x353   : > { %v5804_v35 = vpop.xlane.xlu2 %1094  ;;  %v1204_v58 = vsub.f32 1.0, %v1203_v53  ;;  %v5815_v47 = vpop.eup %3931  ;;  %v2259_v53 = vsub.f32 %v7295_v43, %v5736_v1  ;;  %v2285_v36 = vmul.f32 1.442695, %v2260_v26 }
 0x354   : > { %3933 = vrcp.f32 %v5804_v35  ;;  %v1228_v56 = vand.u32 2147483648, %v5804_v35  ;;  %v1226_v12 = vand.u32 2147483647, %v5804_v35  ;;  %vm1222_vm1 = vweird.f32 %v5804_v35 }
 0x355   : > { %3935 = vpow2.f32 %v1669_v21  ;;  %v1205_v52 = vmul.f32 %v5793_v34, %v1204_v58 }
 0x356   : > { %2919 = vadd.xlane.f32.xlu1 %v5809_v60  ;;  %2311 = vadd.xlane.f32.xlu0 %v5811_v9  ;;  %3937 = vpow2.f32 %v2891_v25  ;;  %v1229_v25 = vor.u32 1.1754944e-38, %v1228_v56  ;;  %vm1227_vm11 = vcmp.eq.f32.partialorder %v1226_v12, 8.507059e+37 }
 0x357   : > { %2309 = vadd.xlane.f32.xlu2 %v5815_v47  ;;  %3939 = vpow2.f32 %v2889_v22  ;;  %v1206_v11 = vadd.f32 %v5793_v34, %v1205_v52 }
 0x358   : > { %3941 = vpow2.f32 %v2281_v10 }
 0x359   : > { %v5822_v62 = vpop.xlane.xlu1 %1629  ;;  %v1210_v3 = vsel %vm5839_vm3, %v5793_v34, %v1206_v11  ;;  %v7296_v11 = vld [vmem:[#allocation10_spill] sm:$0xff] }
 0x35a   : > { %v3934_v14 = vpop.eup %3933  ;;  %v5824_v59 = vpop.xlane.xlu0 %1096  ;;  %v1215_v18 = vsel %vm1212_vm14, %v1214_v42, %v1210_v3  ;;  %v7300_v3 = vld [vmem:[#allocation15_spill] sm:$0xff] }
 0x35b   : > { %v1218_v41 = vmul.f32 %v3934_v14, %v5804_v35  ;;  %v1628_v7 = vpop.xlane.xlu2 %1627  ;;  %v5830_v23 = vpop.eup %3935  ;;  %3943 = vrcp.f32 %v5824_v59  ;;  %vm1223_vm9 = vweird.f32 %v3934_v14  ;;  %v2283_v35 = vmul.f32 1.442695, %v2259_v53 }
 0x35c   : > { %v5835_v54 = vpop.eup %3937  ;;  %3945 = vpow2.f32 %v1671_v44  ;;  %vm1224_vm8 = vmor %vm1222_vm1, %vm1223_vm9  ;;  %vm1237_vm15 = vweird.f32 %v5824_v59 }
 0x35d   : > { %v1219_v38 = vsub.f32 1.0, %v1218_v41  ;;  %v5844_v4 = vpop.eup %3939  ;;  %3947 = vpow2.f32 %v1673_v33  ;;  %v1358_v41 = vmul.f32 %v7296_v11, %v1215_v18 }
 0x35e   : > { %1701 = vadd.xlane.f32.xlu1 %v5830_v23  ;;  %2923 = vadd.xlane.f32.xlu0 %v5835_v54  ;;  %v5858_v21 = vpop.eup %3941  ;;  %3949 = vpow2.f32 %v2893_v13 }
 0x35f   : > { %v1220_v40 = vmul.f32 %v3934_v14, %v1219_v38  ;;  %2921 = vadd.xlane.f32.xlu2 %v5844_v4  ;;  %3951 = vpow2.f32 %v2285_v36 }
 0x360   : > { %3953 = vpow2.f32 %v2283_v35  ;;  %v7304_v35 = vld [vmem:[#allocation6_spill] sm:$0xff] }
 0x361   : > { %v1221_v34 = vadd.f32 %v3934_v14, %v1220_v40  ;;  %v5860_v58 = vpop.xlane.xlu1 %2241  ;;  %v5864_v55 = vpop.eup %3943  ;;  %v2870_v40 = vsub.f32 %v7300_v3, %v5800_v16  ;;  %v7302_v16 = vld [vmem:[#allocation18_spill] sm:$0xff]  ;;  %v1651_v11 = vsub.f32 %v7304_v35, %v5822_v62 }
 0x362   : > { %v5862_v22 = vpop.xlane.xlu0 %2851  ;;  %v5866_v1 = vpop.eup %3945  ;;  %v1233_v38 = vmul.f32 %v5864_v55, %v5824_v59  ;;  %vm1238_vm12 = vweird.f32 %v5864_v55 }
 0x363   : > { %v1225_v52 = vsel %vm1224_vm8, %v3934_v14, %v1221_v34  ;;  %v2850_v10 = vpop.xlane.xlu2 %2849  ;;  %v5870_v46 = vpop.eup %3947  ;;  %v7298_v14 = vld [vmem:[#allocation8_spill] sm:$0xff]  ;;  %v2895_v34 = vmul.f32 1.442695, %v2870_v40  ;;  %v1677_v3 = vmul.f32 1.442695, %v1651_v11  ;;  %vm5917_vm0 = vmor %vm1237_vm15, %vm1238_vm12  ;;  %v7314_v40 = vld [vmem:[#allocation17_spill] sm:$0xff] }
 0x364   : > { %v1230_v44 = vsel %vm1227_vm11, %v1229_v25, %v1225_v52  ;;  %v1650_v50 = vsub.f32 %v7298_v14, %v1628_v7  ;;  %v2871_v56 = vsub.f32 %v7299_v30, %v2850_v10  ;;  %v1234_v12 = vsub.f32 1.0, %v1233_v38  ;;  %v5887_v53 = vpop.eup %3949  ;;  %v7303_v10 = vld [vmem:[#allocation19_spill] sm:$0xff]  ;;  %v7312_v11 = vld [vmem:[#allocation12_spill] sm:$0xff] }
 0x365   : > { %v1359_v33 = vmul.f32 %v7297_v32, %v1230_v44  ;;  %7301 = vst [vmem:[#allocation9_spill] sm:$0xff] %v5887_v53  ;;  %v5889_v18 = vpop.eup %3951  ;;  %v2261_v52 = vsub.f32 %v7302_v16, %v5802_v27  ;;  %v1243_v14 = vand.u32 2147483648, %v5824_v59  ;;  %v7310_v16 = vld [vmem:[#allocation13_spill] sm:$0xff] }
 0x366   : > { %2313 = vadd.xlane.f32.xlu1 %v5858_v21  ;;  %1705 = vadd.xlane.f32.xlu0 %v5870_v46  ;;  %v1675_v26 = vmul.f32 1.442695, %v1650_v50  ;;  %v2897_v43 = vmul.f32 1.442695, %v2871_v56  ;;  %v1235_v25 = vmul.f32 %v5864_v55, %v1234_v12  ;;  %v5892_v13 = vpop.eup %3953 }
 0x367   : > { %v3604_v24 = vpack.c.bf16 %v1359_v33, %v1358_v41  ;;  %1703 = vadd.xlane.f32.xlu2 %v5866_v1  ;;  %v2287_v38 = vmul.f32 1.442695, %v2261_v52  ;;  %v2872_v52 = vsub.f32 %v7310_v16, %v5862_v22 }
 0x368   : > { %v1236_v41 = vadd.f32 %v5864_v55, %v1235_v25  ;;  %v1244_v25 = vor.u32 1.1754944e-38, %v1243_v14 }
 0x369   : > { %3748 = vst [vmem:[%s5641_s12 + $0x18] sm:$0xff] %v3604_v24   ;;  %v5882_v42 = vpop.xlane.xlu1 %1098  ;;  %v1241_v24 = vand.u32 2147483647, %v5824_v59 }
 0x36a   : > { %v1632_v20 = vpop.xlane.xlu0 %1631  ;;  %3955 = vrcp.f32 %v5882_v42  ;;  %v1258_v12 = vand.u32 2147483648, %v5882_v42  ;;  %vm1252_vm7 = vweird.f32 %v5882_v42 }
 0x36b   : > { %v5885_v7 = vpop.xlane.xlu2 %2243  ;;  %3957 = vpow2.f32 %v1675_v26  ;;  %v1652_v36 = vsub.f32 %v7303_v10, %v1632_v20  ;;  %v1240_v26 = vsel %vm5917_vm0, %v5864_v55, %v1236_v41  ;;  %vm1242_vm6 = vcmp.eq.f32.partialorder %v1241_v24, 8.507059e+37  ;;  %v7311_v55 = vld [vmem:[#allocation21_spill] sm:$0xff] }
 0x36c   : > { %3959 = vpow2.f32 %v2897_v43  ;;  %v1256_v43 = vand.u32 2147483647, %v5882_v42  ;;  %v1245_v35 = vsel %vm1242_vm6, %v1244_v25, %v1240_v26  ;;  %v2262_v41 = vsub.f32 %v7312_v11, %v5860_v58 }
 0x36d   : > { %3961 = vpow2.f32 %v2895_v34  ;;  %v1679_v30 = vmul.f32 1.442695, %v1652_v36  ;;  %v2263_v36 = vsub.f32 %v7311_v55, %v5885_v7  ;;  %v1259_v22 = vor.u32 1.1754944e-38, %v1258_v12  ;;  %v7318_v55 = vld [vmem:[#allocation27_spill] sm:$0xff] }
 0x36e   : > { %2925 = vadd.xlane.f32.xlu1 %v5887_v53  ;;  %2317 = vadd.xlane.f32.xlu0 %v5889_v18  ;;  %vm1257_vm2 = vcmp.eq.f32.partialorder %v1256_v43, 8.507059e+37  ;;  %v2899_v7 = vmul.f32 1.442695, %v2872_v52 }
 0x36f   : > { %2315 = vadd.xlane.f32.xlu2 %v5892_v13  ;;  %v2291_v12 = vmul.f32 1.442695, %v2263_v36 }
 0x370   : > { %v3956_v44 = vpop.eup %3955 }
 0x371   : > { %v1248_v27 = vmul.f32 %v3956_v44, %v5882_v42  ;;  %v5905_v32 = vpop.xlane.xlu1 %2853  ;;  %v5915_v56 = vpop.eup %3957  ;;  %vm1253_vm4 = vweird.f32 %v3956_v44 }
 0x372   : > { %v5907_v33 = vpop.xlane.xlu0 %2245  ;;  %7305 = vst [vmem:[#allocation11_spill] sm:$0xff] %v5915_v56  ;;  %v5922_v20 = vpop.eup %3959  ;;  %vm1254_vm10 = vmor %vm1252_vm7, %vm1253_vm4 }
 0x373   : > { %v5911_v50 = vpop.xlane.xlu2 %1100  ;;  %v1249_v62 = vsub.f32 1.0, %v1248_v27  ;;  %7308 = vst [vmem:[#allocation7_spill] sm:$0xff] %v5922_v20  ;;  %v5928_v34 = vpop.eup %3961 }
 0x374   : > { %3963 = vrcp.f32 %v5911_v50  ;;  %7309 = vst [vmem:[#allocation10_spill] sm:$0xff] %v5928_v34  ;;  %vm1267_vm13 = vweird.f32 %v5911_v50 }
 0x375   : > { %v1250_v59 = vmul.f32 %v3956_v44, %v1249_v62  ;;  %3965 = vpow2.f32 %v2287_v38 }
 0x376   : > { %1707 = vadd.xlane.f32.xlu1 %v5915_v56  ;;  %2929 = vadd.xlane.f32.xlu0 %v5922_v20  ;;  %3967 = vpow2.f32 %v1679_v30 }
 0x377   : > { %v1251_v10 = vadd.f32 %v3956_v44, %v1250_v59  ;;  %2927 = vadd.xlane.f32.xlu2 %v5928_v34  ;;  %3969 = vpow2.f32 %v1677_v3  ;;  %v7313_v3 = vld [vmem:[#allocation20_spill] sm:$0xff]  ;;  %v2289_v59 = vmul.f32 1.442695, %v2262_v41 }
 0x378   : > { %v1360_v58 = vmul.f32 %v7313_v3, %v1245_v35  ;;  %v7319_v35 = vld [vmem:[#allocation22_spill] sm:$0xff] }
 0x379   : > { %v1255_v38 = vsel %vm1254_vm10, %v3956_v44, %v1251_v10  ;;  %v5943_v24 = vpop.xlane.xlu1 %1635  ;;  %v2873_v11 = vsub.f32 %v7319_v35, %v5905_v32  ;;  %v1271_v32 = vand.u32 2147483647, %v5911_v50 }
 0x37a   : > { %v5941_v27 = vpop.eup %3963  ;;  %v5945_v42 = vpop.xlane.xlu0 %1102  ;;  %v1260_v14 = vsel %vm1257_vm2, %v1259_v22, %v1255_v38 }
 0x37b   : > { %v1263_v62 = vmul.f32 %v5941_v27, %v5911_v50  ;;  %v1634_v30 = vpop.xlane.xlu2 %1633  ;;  %v1361_v26 = vmul.f32 %v7314_v40, %v1260_v14  ;;  %3971 = vrcp.f32 %v5945_v42  ;;  %v5952_v44 = vpop.eup %3965  ;;  %vm1268_vm5 = vweird.f32 %v5941_v27 }
 0x37c   : > { %7315 = vst [vmem:[#allocation16_spill] sm:$0xff] %v5952_v44  ;;  %v5954_v25 = vpop.eup %3967  ;;  %3973 = vpow2.f32 %v2899_v7  ;;  %v1653_v36 = vsub.f32 %v7318_v55, %v1634_v30  ;;  %v1273_v30 = vand.u32 2147483648, %v5911_v50  ;;  %v2901_v40 = vmul.f32 1.442695, %v2873_v11  ;;  %vm5982_vm3 = vmor %vm1267_vm13, %vm1268_vm5 }
 0x37d   : > { %v1264_v43 = vsub.f32 1.0, %v1263_v62  ;;  %7316 = vst [vmem:[#allocation8_spill] sm:$0xff] %v5954_v25  ;;  %v3609_v16 = vpack.c.bf16 %v1361_v26, %v1360_v58  ;;  %v5956_v52 = vpop.eup %3969  ;;  %3975 = vpow2.f32 %v2291_v12  ;;  %v1286_v50 = vand.u32 2147483647, %v5945_v42 }
 0x37e   : > { %7317 = vst [vmem:[#allocation14_spill] sm:$0xff] %v5956_v52  ;;  %2319 = vadd.xlane.f32.xlu1 %v5952_v44  ;;  %1711 = vadd.xlane.f32.xlu0 %v5954_v25  ;;  %3977 = vpow2.f32 %v2289_v59  ;;  %v1681_v3 = vmul.f32 1.442695, %v1653_v36  ;;  %v1274_v11 = vor.u32 1.1754944e-38, %v1273_v30  ;;  %vm1272_vm14 = vcmp.eq.f32.partialorder %v1271_v32, 8.507059e+37 }
 0x37f   : > { %v1265_v10 = vmul.f32 %v5941_v27, %v1264_v43  ;;  %3749 = vst [vmem:[%s5641_s12 + $0x20] sm:$0xff] %v3609_v16   ;;  %1709 = vadd.xlane.f32.xlu2 %v5956_v52  ;;  %v7324_v43 = vld [vmem:[#allocation23_spill] sm:$0xff]  ;;  %vm1282_vm1 = vweird.f32 %v5945_v42  ;;  %vm1287_vm11 = vcmp.eq.f32.partialorder %v1286_v50, 8.507059e+37 }
 0x380   : > { %v2264_v16 = vsub.f32 %v7324_v43, %v5907_v33  ;;  %3979 = vpow2.f32 %v1681_v3 }
 0x381   : > { %v3972_v41 = vpop.eup %3971  ;;  %v5966_v22 = vpop.xlane.xlu1 %2247  ;;  %v1266_v7 = vadd.f32 %v5941_v27, %v1265_v10  ;;  %v1288_v10 = vand.u32 2147483648, %v5945_v42  ;;  %3981 = vpow2.f32 %v2901_v40  ;;  %v7327_v40 = vld [vmem:[#allocation32_spill] sm:$0xff] }
 0x382   : > { %v5968_v38 = vpop.xlane.xlu0 %2857  ;;  %v1278_v14 = vmul.f32 %v3972_v41, %v5945_v42  ;;  %v5976_v58 = vpop.eup %3973  ;;  %vm1283_vm9 = vweird.f32 %v3972_v41  ;;  %v7329_v42 = vld [vmem:[#allocation25_spill] sm:$0xff] }
 0x383   : > { %v5973_v62 = vpop.xlane.xlu2 %2855  ;;  %7320 = vst [vmem:[#allocation15_spill] sm:$0xff] %v5976_v58  ;;  %v5980_v12 = vpop.eup %3975  ;;  %v1270_v36 = vsel %vm5982_vm3, %v5941_v27, %v1266_v7  ;;  %vm1284_vm8 = vmor %vm1282_vm1, %vm1283_vm9  ;;  %v1289_v7 = vor.u32 1.1754944e-38, %v1288_v10 }
 0x384   : > { %v1279_v26 = vsub.f32 1.0, %v1278_v14  ;;  %7321 = vst [vmem:[#allocation18_spill] sm:$0xff] %v5980_v12  ;;  %v5989_v55 = vpop.eup %3977  ;;  %v7326_v14 = vld [vmem:[#allocation26_spill] sm:$0xff]  ;;  %v1275_v27 = vsel %vm1272_vm14, %v1274_v11, %v1270_v36 }
 0x385   : > { %7325 = vst [vmem:[#allocation19_spill] sm:$0xff] %v5989_v55  ;;  %v1654_v33 = vsub.f32 %v7326_v14, %v5943_v24 }
 0x386   : > { %v1280_v35 = vmul.f32 %v3972_v41, %v1279_v26  ;;  %2931 = vadd.xlane.f32.xlu1 %v5976_v58  ;;  %2323 = vadd.xlane.f32.xlu0 %v5980_v12  ;;  %v2293_v58 = vmul.f32 1.442695, %v2264_v16  ;;  %v6007_v11 = vpop.eup %3979  ;;  %v7332_v16 = vld [vmem:[#allocation28_spill] sm:$0xff] }
 0x387   : > { %2321 = vadd.xlane.f32.xlu2 %v5989_v55  ;;  %v1683_v30 = vmul.f32 1.442695, %v1654_v33  ;;  %7330 = vst [vmem:[#allocation6_spill] sm:$0xff] %v6007_v11  ;;  %v6009_v20 = vpop.eup %3981  ;;  %v2265_v50 = vsub.f32 %v7332_v16, %v5966_v22  ;;  %v7333_v33 = vld [vmem:[#allocation33_spill] sm:$0xff]  ;;  %v7334_v22 = vld [vmem:[#allocation30_spill] sm:$0xff] }
 0x388   : > { %v1281_v43 = vadd.f32 %v3972_v41, %v1280_v35  ;;  %v7328_v35 = vld [vmem:[#allocation24_spill] sm:$0xff]  ;;  %7331 = vst [vmem:[#allocation13_spill] sm:$0xff] %v6009_v20 }
 0x389   : > { %v6001_v26 = vpop.xlane.xlu1 %1104  ;;  %v1362_v14 = vmul.f32 %v7328_v35, %v1275_v27 }
 0x38a   : > { %v1638_v59 = vpop.xlane.xlu0 %1637  ;;  %v1285_v12 = vsel %vm1284_vm8, %v3972_v41, %v1281_v43  ;;  %3983 = vrcp.f32 %v6001_v26  ;;  %vm1297_vm15 = vweird.f32 %v6001_v26 }
 0x38b   : > { %v2250_v24 = vpop.xlane.xlu2 %2249  ;;  %v1290_v3 = vsel %vm1287_vm11, %v1289_v7, %v1285_v12  ;;  %v1655_v32 = vsub.f32 %v7327_v40, %v1638_v59  ;;  %3985 = vpow2.f32 %v2293_v58 }
 0x38c   : > { %v1363_v36 = vmul.f32 %v7329_v42, %v1290_v3  ;;  %3987 = vpow2.f32 %v1683_v30  ;;  %v2266_v43 = vsub.f32 %v7333_v33, %v2250_v24  ;;  %v2295_v30 = vmul.f32 1.442695, %v2265_v50 }
 0x38d   : > { %v1685_v10 = vmul.f32 1.442695, %v1655_v32  ;;  %v2874_v3 = vsub.f32 %v7334_v22, %v5973_v62  ;;  %v1301_v62 = vand.u32 2147483647, %v6001_v26  ;;  %v1303_v50 = vand.u32 2147483648, %v6001_v26 }
 0x38e   : > { %v3614_v41 = vpack.c.bf16 %v1363_v36, %v1362_v14  ;;  %1713 = vadd.xlane.f32.xlu1 %v6007_v11  ;;  %v2297_v24 = vmul.f32 1.442695, %v2266_v43  ;;  %v7337_v14 = vld [vmem:[#allocation29_spill] sm:$0xff] }
 0x38f   : > { %2933 = vadd.xlane.f32.xlu2 %v6009_v20  ;;  %3989 = vpow2.f32 %v1685_v10  ;;  %v2875_v42 = vsub.f32 %v7337_v14, %v5968_v38  ;;  %vm6057_vm0 = vcmp.eq.f32.partialorder %v1301_v62, 8.507059e+37  ;;  %v1304_v14 = vor.u32 1.1754944e-38, %v1303_v50 }
 0x390   : > { %v6015_v12 = vpop.eup %3983  ;;  %3750 = vst [vmem:[%s5641_s12 + $0x28] sm:$0xff] %v3614_v41   ;;  %v2903_v41 = vmul.f32 1.442695, %v2874_v3 }
 0x391   : > { %v1293_v27 = vmul.f32 %v6015_v12, %v6001_v26  ;;  %v2860_v7 = vpop.xlane.xlu1 %2859  ;;  %v6029_v32 = vpop.eup %3985  ;;  %v2905_v33 = vmul.f32 1.442695, %v2875_v42  ;;  %vm1298_vm12 = vweird.f32 %v6015_v12 }
 0x392   : > { %v6021_v58 = vpop.xlane.xlu0 %2299  ;;  %7335 = vst [vmem:[#allocation21_spill] sm:$0xff] %v6029_v32  ;;  %v6031_v35 = vpop.eup %3987  ;;  %v2876_v43 = vsub.f32 %v5593_v6, %v2860_v7  ;;  %vm6065_vm4 = vmor %vm1297_vm15, %vm1298_vm12 }
 0x393   : > { %v6023_v59 = vpop.xlane.xlu2 %1106  ;;  %3991 = vrcp.f32 %v6021_v58  ;;  %v1294_v40 = vsub.f32 1.0, %v1293_v27  ;;  %7336 = vst [vmem:[#allocation12_spill] sm:$0xff] %v6031_v35  ;;  %vm2336_vm10 = vweird.f32 %v6021_v58 }
 0x394   : > { %3993 = vrcp.f32 %v6023_v59  ;;  %v1316_v26 = vand.u32 2147483647, %v6023_v59  ;;  %v1318_v62 = vand.u32 2147483648, %v6023_v59  ;;  %vm1312_vm7 = vweird.f32 %v6023_v59 }
 0x395   : > { %v6035_v36 = vpop.eup %3989  ;;  %v1295_v10 = vmul.f32 %v6015_v12, %v1294_v40  ;;  %3995 = vpow2.f32 %v2295_v30 }
 0x396   : > { %7338 = vst [vmem:[#allocation20_spill] sm:$0xff] %v6035_v36  ;;  %2325 = vadd.xlane.f32.xlu1 %v6029_v32  ;;  %1717 = vadd.xlane.f32.xlu0 %v6035_v36  ;;  %3997 = vpow2.f32 %v2297_v24  ;;  %v1319_v36 = vor.u32 1.1754944e-38, %v1318_v62  ;;  %vm1317_vm13 = vcmp.eq.f32.partialorder %v1316_v26, 8.507059e+37 }
 0x397   : > { %1715 = vadd.xlane.f32.xlu2 %v6031_v35  ;;  %v1296_v3 = vadd.f32 %v6015_v12, %v1295_v10 }
 0x399   : > { %v6042_v16 = vpop.eup %3991  ;;  %v6048_v30 = vpop.xlane.xlu1 %1689 }
 0x39a   : > { %v3994_v38 = vpop.eup %3993  ;;  %v2332_v27 = vmul.f32 %v6042_v16, %v6021_v58  ;;  %v6050_v22 = vpop.xlane.xlu0 %1108  ;;  %3999 = vrcp.f32 %v6048_v30  ;;  %vm2337_vm2 = vweird.f32 %v6042_v16  ;;  %vm1726_vm14 = vweird.f32 %v6048_v30 }
 0x39b   : > { %v1308_v40 = vmul.f32 %v3994_v38, %v6023_v59  ;;  %v1640_v24 = vpop.xlane.xlu2 %1639  ;;  %4001 = vpow2.f32 %v2903_v41  ;;  %v6063_v10 = vpop.eup %3995  ;;  %v2907_v41 = vmul.f32 1.442695, %v2876_v43  ;;  %vm1313_vm6 = vweird.f32 %v3994_v38  ;;  %vm6106_vm3 = vmor %vm2336_vm10, %vm2337_vm2 }
 0x39c   : > { %v2333_v7 = vsub.f32 1.0, %v2332_v27  ;;  %v1656_v20 = vsub.f32 %v5632_v28, %v1640_v24  ;;  %4003 = vrcp.f32 %v6050_v22  ;;  %7341 = vst [vmem:[#allocation17_spill] sm:$0xff] %v6063_v10  ;;  %v6072_v27 = vpop.eup %3997  ;;  %v1300_v28 = vsel %vm6065_vm4, %v6015_v12, %v1296_v3  ;;  %vm1314_vm5 = vmor %vm1312_vm7, %vm1313_vm6 }
 0x39d   : > { %v1309_v42 = vsub.f32 1.0, %v1308_v40  ;;  %7344 = vst [vmem:[#allocation27_spill] sm:$0xff] %v6072_v27  ;;  %v2340_v43 = vand.u32 2147483647, %v6021_v58  ;;  %v2342_v24 = vand.u32 2147483648, %v6021_v58  ;;  %v1305_v59 = vsel %vm6057_vm0, %v1304_v14, %v1300_v28 }
 0x39e   : > { %v2334_v32 = vmul.f32 %v6042_v16, %v2333_v7  ;;  %v1687_v40 = vmul.f32 1.442695, %v1656_v20  ;;  %2329 = vadd.xlane.f32.xlu0 %v6072_v27  ;;  %vm1327_vm11 = vweird.f32 %v6050_v22 }
 0x39f   : > { %v1310_v50 = vmul.f32 %v3994_v38, %v1309_v42  ;;  %2327 = vadd.xlane.f32.xlu2 %v6063_v10  ;;  %v2343_v28 = vor.u32 1.1754944e-38, %v2342_v24  ;;  %vm2341_vm9 = vcmp.eq.f32.partialorder %v2340_v43, 8.507059e+37 }
 0x3a0   : > { %v6083_v7 = vpop.eup %3999  ;;  %v2335_v12 = vadd.f32 %v6042_v16, %v2334_v32  ;;  %4005 = vpow2.f32 %v1687_v40  ;;  %v1730_v40 = vand.u32 2147483647, %v6048_v30 }
 0x3a1   : > { %v1311_v35 = vadd.f32 %v3994_v38, %v1310_v50  ;;  %v6087_v20 = vpop.eup %4001  ;;  %4007 = vpow2.f32 %v2907_v41  ;;  %v1722_v3 = vmul.f32 %v6083_v7, %v6048_v30  ;;  %v6094_v42 = vpop.xlane.xlu1 %2301  ;;  %vm1727_vm8 = vweird.f32 %v6083_v7 }
 0x3a2   : > { %7345 = vst [vmem:[#allocation22_spill] sm:$0xff] %v6087_v20  ;;  %v6096_v50 = vpop.eup %4003  ;;  %4009 = vrcp.f32 %v6094_v42  ;;  %vm6126_vm1 = vcmp.eq.f32.partialorder %v1730_v40, 8.507059e+37  ;;  %v1331_v40 = vand.u32 2147483647, %v6050_v22  ;;  %vm2351_vm15 = vweird.f32 %v6094_v42  ;;  %vm6161_vm4 = vmor %vm1726_vm14, %vm1727_vm8 }
 0x3a3   : > { %v1315_v32 = vsel %vm1314_vm5, %v3994_v38, %v1311_v35  ;;  %v6100_v10 = vpop.xlane.xlu2 %2909  ;;  %4011 = vpow2.f32 %v2905_v33  ;;  %v1723_v41 = vsub.f32 1.0, %v1722_v3  ;;  %v1323_v35 = vmul.f32 %v6096_v50, %v6050_v22  ;;  %v7348_v38 = vld [vmem:[#allocation31_spill] sm:$0xff] }
 0x3a4   : > { %v1320_v6 = vsel %vm1317_vm13, %v1319_v36, %v1315_v32  ;;  %v1364_v26 = vmul.f32 %v7348_v38, %v1305_v59  ;;  %v2339_v33 = vsel %vm6106_vm3, %v6042_v16, %v2335_v12  ;;  %v6117_v36 = vpop.xlane.xlu0 %2911  ;;  %v1732_v32 = vand.u32 2147483648, %v6048_v30 }
 0x3a5   : > { %v1365_v62 = vmul.f32 %v5595_v39, %v1320_v6  ;;  %v1724_v58 = vmul.f32 %v6083_v7, %v1723_v41  ;;  %v1333_v3 = vand.u32 2147483648, %v6050_v22  ;;  %4013 = vrcp.f32 %v6100_v10 }
 0x3a6   : > { %v6123_v27 = vpop.eup %4005  ;;  %v2344_v24 = vsel %vm2341_vm9, %v2343_v28, %v2339_v33  ;;  %v1324_v12 = vsub.f32 1.0, %v1323_v35  ;;  %v2355_v6 = vand.u32 2147483647, %v6094_v42  ;;  %4015 = vrcp.f32 %v6117_v36  ;;  %2935 = vadd.xlane.f32.xlu0 %v6087_v20  ;;  %v7353_v28 = vld [vmem:[#allocation34_spill] sm:$0xff] }
 0x3a7   : > { %7349 = vst [vmem:[#allocation23_spill] sm:$0xff] %v6123_v27  ;;  %v3619_v59 = vpack.c.bf16 %v1365_v62, %v1364_v26  ;;  %v6130_v16 = vpop.eup %4007  ;;  %1719 = vadd.xlane.f32.xlu1 %v6123_v27  ;;  %v1725_v43 = vadd.f32 %v6083_v7, %v1724_v58  ;;  %v2357_v41 = vand.u32 2147483648, %v6094_v42  ;;  %v1733_v38 = vor.u32 1.1754944e-38, %v1732_v32 }
 0x3a8   : > { %7352 = vst [vmem:[#allocation26_spill] sm:$0xff] %v6130_v16  ;;  %v4010_v14 = vpop.eup %4009  ;;  %2939 = vadd.xlane.f32.xlu2 %v6130_v16  ;;  %v6145_v26 = vor.u32 1.1754944e-38, %v1333_v3  ;;  %v2950_v33 = vand.u32 2147483647, %v6100_v10  ;;  %v6150_v58 = vmul.f32 %v7353_v28, %v2344_v24  ;;  %vm1328_vm12 = vweird.f32 %v6096_v50 }
 0x3a9   : > { %3751 = vst [vmem:[%s5641_s12 + $0x30] sm:$0xff] %v3619_v59   ;;  %v6142_v35 = vpop.eup %4011  ;;  %v2347_v62 = vmul.f32 %v4010_v14, %v6094_v42  ;;  %vm2946_vm0 = vweird.f32 %v6100_v10  ;;  %v1325_v24 = vmul.f32 %v6096_v50, %v1324_v12  ;;  %vm6166_vm6 = vcmp.eq.f32.partialorder %v2355_v6, 8.507059e+37  ;;  %v6171_v20 = vpop.xlane.xlu1 %1110  ;;  %vm6206_vm14 = vmor %vm1327_vm11, %vm1328_vm12 }
 0x3aa   : > { %v1729_v27 = vsel %vm6161_vm4, %v6083_v7, %v1725_v43  ;;  %v2358_v30 = vor.u32 1.1754944e-38, %v2357_v41  ;;  %v2952_v55 = vand.u32 2147483648, %v6100_v10  ;;  %vm2352_vm7 = vweird.f32 %v4010_v14 }
 0x3ab   : > { %v6155_v59 = vpop.xlane.xlu2 %1691  ;;  %v4014_v32 = vpop.eup %4013  ;;  %v2348_v28 = vsub.f32 1.0, %v2347_v62  ;;  %vm6178_vm10 = vcmp.eq.f32.partialorder %v2950_v33, 8.507059e+37  ;;  %v2965_v62 = vand.u32 2147483647, %v6117_v36  ;;  %vm2961_vm2 = vweird.f32 %v6117_v36  ;;  %vm2353_vm5 = vmor %vm2351_vm15, %vm2352_vm7 }
 0x3ac   : > { %4017 = vrcp.f32 %v6155_v59  ;;  %v2942_v11 = vmul.f32 %v4014_v32, %v6100_v10  ;;  %v4016_v44 = vpop.eup %4015  ;;  %v6186_v7 = vpop.xlane.xlu0 %1693  ;;  %v1734_v43 = vsel %vm6126_vm1, %v1733_v38, %v1729_v27  ;;  %v6191_v41 = vadd.f32 %v6096_v50, %v1325_v24 }
 0x3ad   : > { %v2349_v12 = vmul.f32 %v4010_v14, %v2348_v28  ;;  %v2957_v52 = vmul.f32 %v4016_v44, %v6117_v36  ;;  %4019 = vrcp.f32 %v6171_v20  ;;  %v2967_v3 = vand.u32 2147483648, %v6117_v36 }
 0x3ae   : > { %v2943_v25 = vsub.f32 1.0, %v2942_v11  ;;  %vm2947_vm13 = vweird.f32 %v4014_v32  ;;  %v2953_v28 = vor.u32 1.1754944e-38, %v2952_v55  ;;  %vm2962_vm3 = vweird.f32 %v4016_v44 }
 0x3af   : > { %v2350_v33 = vadd.f32 %v4010_v14, %v2349_v12  ;;  %2937 = vadd.xlane.f32.xlu1 %v6142_v35  ;;  %v2958_v56 = vsub.f32 1.0, %v2957_v52  ;;  %vm6197_vm9 = vcmp.eq.f32.partialorder %v2965_v62, 8.507059e+37  ;;  %4021 = vrcp.f32 %v6186_v7  ;;  %vm2948_vm8 = vmor %vm2946_vm0, %vm2947_vm13 }
 0x3b0   : > { %v2944_v11 = vmul.f32 %v4014_v32, %v2943_v25  ;;  %vm6217_vm1 = vcmp.eq.f32.partialorder %v1331_v40, 8.507059e+37  ;;  %vm1741_vm11 = vweird.f32 %v6155_v59  ;;  %vm2963_vm12 = vmor %vm2961_vm2, %vm2962_vm3  ;;  %v1747_v10 = vand.u32 2147483648, %v6155_v59 }
 0x3b1   : > { %v2354_v53 = vsel %vm2353_vm5, %v4010_v14, %v2350_v33  ;;  %v2959_v55 = vmul.f32 %v4016_v44, %v2958_v56  ;;  %v1330_v14 = vsel %vm6206_vm14, %v6096_v50, %v6191_v41  ;;  %v1745_v56 = vand.u32 2147483647, %v6155_v59 }
 0x3b2   : > { %v4018_v34 = vpop.eup %4017  ;;  %v2359_v25 = vsel %vm6166_vm6, %v2358_v30, %v2354_v53  ;;  %v2945_v52 = vadd.f32 %v4014_v32, %v2944_v11  ;;  %v2968_v53 = vor.u32 1.1754944e-38, %v2967_v3  ;;  %v6248_v11 = vpop.xlane.xlu1 %2913  ;;  %v1748_v27 = vor.u32 1.1754944e-38, %v1747_v10 }
 0x3b3   : > { %v1737_v39 = vmul.f32 %v4018_v34, %v6155_v59  ;;  %v2572_v22 = vmul.f32 %v5651_v57, %v2359_v25  ;;  %v4020_v16 = vpop.eup %4019  ;;  %v2960_v30 = vadd.f32 %v4016_v44, %v2959_v55  ;;  %v6227_v50 = vpop.xlane.xlu2 %2303  ;;  %vm1742_vm15 = vweird.f32 %v4018_v34 }
 0x3b4   : > { %v2949_v24 = vsel %vm2948_vm8, %v4014_v32, %v2945_v52  ;;  %v1338_v62 = vmul.f32 %v4020_v16, %v6171_v20  ;;  %vm6243_vm0 = vcmp.eq.f32.partialorder %v1745_v56, 8.507059e+37  ;;  %4023 = vrcp.f32 %v6227_v50  ;;  %vm1743_vm4 = vmor %vm1741_vm11, %vm1742_vm15 }
 0x3b5   : > { %v1738_v12 = vsub.f32 1.0, %v1737_v39  ;;  %v3669_v40 = vpack.c.bf16 %v2572_v22, %v6150_v58  ;;  %v2954_v57 = vsel %vm6178_vm10, %v2953_v28, %v2949_v24  ;;  %v2964_v41 = vsel %vm2963_vm12, %v4016_v44, %v2960_v30  ;;  %v6238_v3 = vpop.eup %4021 }
 0x3b6   : > { %v3181_v32 = vmul.f32 %v5658_v17, %v2954_v57  ;;  %v2969_v58 = vsel %vm6197_vm9, %v2968_v53, %v2964_v41  ;;  %v1339_v36 = vsub.f32 1.0, %v1338_v62  ;;  %v1348_v28 = vand.u32 2147483648, %v6171_v20 }
 0x3b7   : > { %v1739_v33 = vmul.f32 %v4018_v34, %v1738_v12  ;;  %3761 = vst [vmem:[%s5641_s12 + $0x80] sm:$0xff] %v3669_v40   ;;  %v3182_v17 = vmul.f32 %v5655_v51, %v2969_v58  ;;  %v1752_v42 = vmul.f32 %v6238_v3, %v6186_v7  ;;  %vm1343_vm6 = vweird.f32 %v4020_v16  ;;  %v6258_v51 = vpop.xlane.xlu0 %2305 }
 0x3b8   : > { %v1340_v25 = vmul.f32 %v4020_v16, %v1339_v36  ;;  %v1346_v52 = vand.u32 2147483647, %v6171_v20  ;;  %4025 = vrcp.f32 %v6248_v11  ;;  %v1961_v53 = vmul.f32 %v5623_v8, %v1734_v43 }
 0x3b9   : > { %v1740_v44 = vadd.f32 %v4018_v34, %v1739_v33  ;;  %v3709_v55 = vpack.c.bf16 %v3182_v17, %v3181_v32  ;;  %v1753_v22 = vsub.f32 1.0, %v1752_v42  ;;  %vm1342_vm7 = vweird.f32 %v6171_v20 }
 0x3ba   : > { %v1341_v59 = vadd.f32 %v4020_v16, %v1340_v25  ;;  %v1335_v24 = vsel %vm6217_vm1, %v6145_v26, %v1330_v14  ;;  %vm1344_vm10 = vmor %vm1342_vm7, %vm1343_vm6  ;;  %v1349_v30 = vor.u32 1.1754944e-38, %v1348_v28  ;;  %v4024_v40 = vpop.eup %4023  ;;  %vm1347_vm2 = vcmp.eq.f32.partialorder %v1346_v52, 8.507059e+37 }
 0x3bb   : > { %v1744_v39 = vsel %vm1743_vm4, %v4018_v34, %v1740_v44  ;;  %3769 = vst [vmem:[%s5641_s12 + $0xc0] sm:$0xff] %v3709_v55   ;;  %v1754_v12 = vmul.f32 %v6238_v3, %v1753_v22  ;;  %v1760_v43 = vand.u32 2147483647, %v6186_v7  ;;  %4027 = vrcp.f32 %v6258_v51  ;;  %v6274_v14 = vpop.xlane.xlu2 %2915 }
 0x3bc   : > { %v1749_v56 = vsel %vm6243_vm0, %v1748_v27, %v1744_v39  ;;  %v1345_v8 = vsel %vm1344_vm10, %v4020_v16, %v1341_v59  ;;  %v1762_v38 = vand.u32 2147483648, %v6186_v7  ;;  %v2362_v26 = vmul.f32 %v4024_v40, %v6227_v50 }
 0x3bd   : > { %v1962_v34 = vmul.f32 %v5693_v2, %v1749_v56  ;;  %v1350_v57 = vsel %vm1347_vm2, %v1349_v30, %v1345_v8  ;;  %v1366_v2 = vmul.f32 %v5619_v15, %v1335_v24  ;;  %v1755_v62 = vadd.f32 %v6238_v3, %v1754_v12 }
 0x3be   : > { %v1367_v10 = vmul.f32 %v5680_v45, %v1350_v57  ;;  %vm1757_vm5 = vweird.f32 %v6238_v3  ;;  %v6280_v16 = vpop.eup %4025  ;;  %vm1756_vm13 = vweird.f32 %v6186_v7  ;;  %v2363_v32 = vsub.f32 1.0, %v2362_v26  ;;  %v6296_v7 = vpop.xlane.xlu1 %1695 }
 0x3bf   : > { %v3629_v20 = vpack.c.bf16 %v1962_v34, %v1961_v53  ;;  %vm6284_vm3 = vcmp.eq.f32.partialorder %v1760_v43, 8.507059e+37  ;;  %v2370_v15 = vand.u32 2147483647, %v6227_v50  ;;  %v2972_v45 = vmul.f32 %v6280_v16, %v6248_v11  ;;  %vm6291_vm9 = vmor %vm1756_vm13, %vm1757_vm5  ;;  %v6307_v39 = vpop.xlane.xlu0 %2917 }
 0x3c0   : > { %v3624_v41 = vpack.c.bf16 %v1367_v10, %v1366_v2  ;;  %v1763_v6 = vor.u32 1.1754944e-38, %v1762_v38  ;;  %v2364_v36 = vmul.f32 %v4024_v40, %v2363_v32  ;;  %vm2366_vm14 = vweird.f32 %v6227_v50 }
 0x3c1   : > { %3753 = vst [vmem:[%s5641_s12 + $0x40] sm:$0xff] %v3629_v20   ;;  %vm2367_vm1 = vweird.f32 %v4024_v40  ;;  %v4028_v17 = vpop.eup %4027  ;;  %v1759_v44 = vsel %vm6291_vm9, %v6238_v3, %v1755_v62  ;;  %v2372_v28 = vand.u32 2147483648, %v6227_v50  ;;  %v2973_v42 = vsub.f32 1.0, %v2972_v45 }
 0x3c2   : > { %3752 = vst [vmem:[%s5641_s12 + $0x38] sm:$0xff] %v3624_v41   ;;  %4029 = vrcp.f32 %v6274_v14  ;;  %v2365_v27 = vadd.f32 %v4024_v40, %v2364_v36  ;;  %v2980_v25 = vand.u32 2147483647, %v6248_v11  ;;  %v2982_v52 = vand.u32 2147483648, %v6248_v11  ;;  %vm6309_vm8 = vmor %vm2366_vm14, %vm2367_vm1 }
 0x3c3   : > { %v2377_v55 = vmul.f32 %v4028_v17, %v6258_v51  ;;  %vm6313_vm11 = vcmp.eq.f32.partialorder %v2370_v15, 8.507059e+37  ;;  %v2974_v50 = vmul.f32 %v6280_v16, %v2973_v42  ;;  %v2385_v53 = vand.u32 2147483647, %v6258_v51  ;;  %v6332_v20 = vpop.xlane.xlu2 %1697 }
 0x3c4   : > { %4031 = vrcp.f32 %v6296_v7  ;;  %v1764_v56 = vsel %vm6284_vm3, %v1763_v6, %v1759_v44  ;;  %v2369_v59 = vsel %vm6309_vm8, %v4024_v40, %v2365_v27  ;;  %v2387_v34 = vand.u32 2147483648, %v6258_v51 }
 0x3c5   : > { %v2378_v24 = vsub.f32 1.0, %v2377_v55  ;;  %v2373_v30 = vor.u32 1.1754944e-38, %v2372_v28  ;;  %vm2976_vm12 = vweird.f32 %v6248_v11  ;;  %vm2381_vm15 = vweird.f32 %v6258_v51 }
 0x3c6   : > { %4033 = vrcp.f32 %v6307_v39  ;;  %vm6328_vm0 = vcmp.eq.f32.partialorder %v2980_v25, 8.507059e+37  ;;  %v2983_v8 = vor.u32 1.1754944e-38, %v2982_v52  ;;  %vm2382_vm4 = vweird.f32 %v4028_v17  ;;  %v6360_v36 = vpop.xlane.xlu1 %2307 }
 0x3c7   : > { %v2379_v43 = vmul.f32 %v4028_v17, %v2378_v24  ;;  %v6335_v57 = vmul.f32 %v5687_v19, %v1764_v56  ;;  %v2374_v38 = vsel %vm6313_vm11, %v2373_v30, %v2369_v59  ;;  %v2975_v26 = vadd.f32 %v6280_v16, %v2974_v50  ;;  %vm2383_vm10 = vmor %vm2381_vm15, %vm2382_vm4  ;;  %v6373_v52 = vpop.xlane.xlu0 %1699 }
 0x3c8   : > { %v4030_v40 = vpop.eup %4029  ;;  %vm2977_vm6 = vweird.f32 %v6280_v16  ;;  %vm6341_vm7 = vcmp.eq.f32.partialorder %v2385_v53, 8.507059e+37  ;;  %v2388_v62 = vor.u32 1.1754944e-38, %v2387_v34  ;;  %vm2991_vm2 = vweird.f32 %v6274_v14 }
 0x3c9   : > { %v2380_v2 = vadd.f32 %v4028_v17, %v2379_v43  ;;  %v2987_v32 = vmul.f32 %v4030_v40, %v6274_v14  ;;  %v2995_v19 = vand.u32 2147483647, %v6274_v14  ;;  %v2997_v33 = vand.u32 2147483648, %v6274_v14  ;;  %vm6355_vm5 = vmor %vm2976_vm12, %vm2977_vm6 }
 0x3ca   : > { %v4032_v41 = vpop.eup %4031  ;;  %4035 = vrcp.f32 %v6332_v20  ;;  %v2573_v15 = vmul.f32 %v5727_v61, %v2374_v38  ;;  %v2979_v28 = vsel %vm6355_vm5, %v6280_v16, %v2975_v26  ;;  %vm2992_vm13 = vweird.f32 %v4030_v40 }
 0x3cb   : > { %v2384_v58 = vsel %vm2383_vm10, %v4028_v17, %v2380_v2  ;;  %v2988_v6 = vsub.f32 1.0, %v2987_v32  ;;  %v1767_v51 = vmul.f32 %v4032_v41, %v6296_v7  ;;  %v1775_v11 = vand.u32 2147483647, %v6296_v7  ;;  %vm2993_vm14 = vmor %vm2991_vm2, %vm2992_vm13 }
 0x3cc   : > { %v6362_v44 = vpop.eup %4033  ;;  %v2389_v61 = vsel %vm6341_vm7, %v2388_v62, %v2384_v58  ;;  %vm6375_vm3 = vcmp.eq.f32.partialorder %v2995_v19, 8.507059e+37  ;;  %vm1772_vm9 = vweird.f32 %v4032_v41  ;;  %v1777_v16 = vand.u32 2147483648, %v6296_v7 }
 0x3cd   : > { %v2574_v42 = vmul.f32 %v5721_v37, %v2389_v61  ;;  %v2989_v17 = vmul.f32 %v4030_v40, %v2988_v6  ;;  %v1768_v27 = vsub.f32 1.0, %v1767_v51  ;;  %v3002_v25 = vmul.f32 %v6362_v44, %v6307_v39 }
 0x3ce   : > { %4037 = vrcp.f32 %v6360_v36  ;;  %v2984_v56 = vsel %vm6328_vm0, %v2983_v8, %v2979_v28  ;;  %v2998_v59 = vor.u32 1.1754944e-38, %v2997_v33  ;;  %vm1771_vm1 = vweird.f32 %v6296_v7  ;;  %v6415_v58 = vpop.xlane.xlu1 %2919 }
 0x3cf   : > { %v3674_v22 = vpack.c.bf16 %v2574_v42, %v2573_v15  ;;  %v2990_v3 = vadd.f32 %v4030_v40, %v2989_v17  ;;  %v1769_v37 = vmul.f32 %v4032_v41, %v1768_v27  ;;  %v3003_v50 = vsub.f32 1.0, %v3002_v25  ;;  %vm1773_vm11 = vmor %vm1771_vm1, %vm1772_vm9 }
 0x3d0   : > { %v6381_v53 = vpop.eup %4035  ;;  %4039 = vrcp.f32 %v6373_v52  ;;  %vm1776_vm8 = vcmp.eq.f32.partialorder %v1775_v11, 8.507059e+37  ;;  %v1778_v8 = vor.u32 1.1754944e-38, %v1777_v16  ;;  %vm3006_vm12 = vweird.f32 %v6307_v39  ;;  %v6441_v16 = vpop.xlane.xlu0 %2311 }
 0x3d1   : > { %3762 = vst [vmem:[%s5641_s12 + $0x88] sm:$0xff] %v3674_v22   ;;  %v2994_v24 = vsel %vm2993_vm14, %v4030_v40, %v2990_v3  ;;  %v1770_v34 = vadd.f32 %v4032_v41, %v1769_v37  ;;  %v1782_v30 = vmul.f32 %v6381_v53, %v6332_v20  ;;  %v3004_v14 = vmul.f32 %v6362_v44, %v3003_v50 }
 0x3d2   : > { %v2999_v12 = vsel %vm6375_vm3, %v2998_v59, %v2994_v24  ;;  %v3183_v7 = vmul.f32 %v5712_v29, %v2984_v56  ;;  %v3010_v10 = vand.u32 2147483647, %v6307_v39  ;;  %v3012_v62 = vand.u32 2147483648, %v6307_v39  ;;  %v6408_v29 = vpop.xlane.xlu2 %2309 }
 0x3d3   : > { %v3184_v43 = vmul.f32 %v5759_v48, %v2999_v12  ;;  %v1774_v40 = vsel %vm1773_vm11, %v4032_v41, %v1770_v34  ;;  %v1783_v38 = vsub.f32 1.0, %v1782_v30  ;;  %v1792_v32 = vand.u32 2147483648, %v6332_v20 }
 0x3d4   : > { %v6400_v26 = vpop.eup %4037  ;;  %v1779_v2 = vsel %vm1776_vm8, %v1778_v8, %v1774_v40  ;;  %vm1787_vm15 = vweird.f32 %v6381_v53  ;;  %v3005_v41 = vadd.f32 %v6362_v44, %v3004_v14  ;;  %vm3007_vm0 = vweird.f32 %v6362_v44 }
 0x3d5   : > { %v3714_v19 = vpack.c.bf16 %v3184_v43, %v3183_v7  ;;  %v1964_v33 = vmul.f32 %v5746_v31, %v1779_v2  ;;  %v1784_v15 = vmul.f32 %v6381_v53, %v1783_v38  ;;  %vm1786_vm4 = vweird.f32 %v6332_v20  ;;  %vm6432_vm7 = vmor %vm3006_vm12, %vm3007_vm0 }
 0x3d6   : > { %v4040_v48 = vpop.eup %4039  ;;  %v2392_v45 = vmul.f32 %v6400_v26, %v6360_v36  ;;  %v1790_v51 = vand.u32 2147483647, %v6332_v20  ;;  %v3013_v61 = vor.u32 1.1754944e-38, %v3012_v62  ;;  %vm6422_vm6 = vmor %vm1786_vm4, %vm1787_vm15  ;;  %v1793_v42 = vor.u32 1.1754944e-38, %v1792_v32 }
 0x3d7   : > { %3770 = vst [vmem:[%s5641_s12 + $0xc8] sm:$0xff] %v3714_v19   ;;  %v3634_v31 = vpack.c.bf16 %v1964_v33, %v6335_v57  ;;  %v1785_v6 = vadd.f32 %v6381_v53, %v1784_v15  ;;  %v1797_v28 = vmul.f32 %v4040_v48, %v6373_v52  ;;  %4041 = vrcp.f32 %v6408_v29 }
 0x3d8   : > { %v2393_v17 = vsub.f32 1.0, %v2392_v45  ;;  %v2400_v27 = vand.u32 2147483647, %v6360_v36  ;;  %v2402_v25 = vand.u32 2147483648, %v6360_v36  ;;  %v3009_v22 = vsel %vm6432_vm7, %v6362_v44, %v3005_v41  ;;  %v6489_v45 = vpop.xlane.xlu0 %2923 }
 0x3d9   : > { %3754 = vst [vmem:[%s5641_s12 + $0x48] sm:$0xff] %v3634_v31   ;;  %v1789_v20 = vsel %vm6422_vm6, %v6381_v53, %v1785_v6  ;;  %v1798_v55 = vsub.f32 1.0, %v1797_v28  ;;  %v1807_v3 = vand.u32 2147483648, %v6373_v52  ;;  %4043 = vrcp.f32 %v6415_v58 }
 0x3da   : > { %v2394_v39 = vmul.f32 %v6400_v26, %v2393_v17  ;;  %vm1791_vm10 = vcmp.eq.f32.partialorder %v1790_v51, 8.507059e+37  ;;  %vm1802_vm2 = vweird.f32 %v4040_v48  ;;  %v1805_v50 = vand.u32 2147483647, %v6373_v52  ;;  %v6461_v43 = vpop.xlane.xlu2 %2921 }
 0x3db   : > { %v1799_v37 = vmul.f32 %v4040_v48, %v1798_v55  ;;  %vm3011_vm5 = vcmp.eq.f32.partialorder %v3010_v10, 8.507059e+37  ;;  %v1794_v53 = vsel %vm1791_vm10, %v1793_v42, %v1789_v20  ;;  %vm2396_vm13 = vweird.f32 %v6360_v36  ;;  %v6468_v10 = vpop.xlane.xlu1 %1701 }
 0x3dc   : > { %v3014_v56 = vsel %vm3011_vm5, %v3013_v61, %v3009_v22  ;;  %vm6451_vm3 = vcmp.eq.f32.partialorder %v2400_v27, 8.507059e+37  ;;  %vm1801_vm9 = vweird.f32 %v6373_v52  ;;  %4045 = vrcp.f32 %v6441_v16 }
 0x3dd   : > { %v1800_v44 = vadd.f32 %v4040_v48, %v1799_v37  ;;  %v4042_v24 = vpop.eup %4041  ;;  %v2395_v34 = vadd.f32 %v6400_v26, %v2394_v39  ;;  %vm2397_vm14 = vweird.f32 %v6400_v26  ;;  %v2403_v30 = vor.u32 1.1754944e-38, %v2402_v25  ;;  %vm1803_vm1 = vmor %vm1801_vm9, %vm1802_vm2 }
 0x3de   : > { %v1808_v12 = vor.u32 1.1754944e-38, %v1807_v3  ;;  %v1965_v8 = vmul.f32 %v5780_v0, %v1794_v53  ;;  %vm1806_vm8 = vcmp.eq.f32.partialorder %v1805_v50, 8.507059e+37  ;;  %v2407_v7 = vmul.f32 %v4042_v24, %v6408_v29  ;;  %vm6474_vm12 = vmor %vm2396_vm13, %vm2397_vm14 }
 0x3df   : > { %v1804_v14 = vsel %vm1803_vm1, %v4040_v48, %v1800_v44  ;;  %v4044_v40 = vpop.eup %4043  ;;  %v6464_v52 = vmul.f32 %v5750_v5, %v3014_v56  ;;  %vm2411_vm11 = vweird.f32 %v6408_v29  ;;  %v2415_v2 = vand.u32 2147483647, %v6408_v29 }
 0x3e0   : > { %v1809_v38 = vsel %vm1806_vm8, %v1808_v12, %v1804_v14  ;;  %v2408_v32 = vsub.f32 1.0, %v2407_v7  ;;  %v2417_v5 = vand.u32 2147483648, %v6408_v29  ;;  %v3017_v19 = vmul.f32 %v4044_v40, %v6415_v58 }
 0x3e1   : > { %v1966_v62 = vmul.f32 %v5784_v49, %v1809_v38  ;;  %v2399_v33 = vsel %vm6474_vm12, %v6400_v26, %v2395_v34  ;;  %vm2412_vm15 = vweird.f32 %v4042_v24  ;;  %v3025_v15 = vand.u32 2147483647, %v6415_v58 }
 0x3e2   : > { %4047 = vrcp.f32 %v6461_v43  ;;  %v6486_v36 = vpop.eup %4045  ;;  %v2409_v41 = vmul.f32 %v4042_v24, %v2408_v32  ;;  %v3018_v49 = vsub.f32 1.0, %v3017_v19  ;;  %vm6491_vm0 = vcmp.eq.f32.partialorder %v2415_v2, 8.507059e+37  ;;  %vm2413_vm7 = vmor %vm2411_vm11, %vm2412_vm15  ;;  %v6519_v56 = vpop.xlane.xlu2 %1703 }
 0x3e3   : > { %v3639_v48 = vpack.c.bf16 %v1966_v62, %v1965_v8  ;;  %4049 = vrcp.f32 %v6468_v10  ;;  %vm3021_vm4 = vweird.f32 %v6415_v58  ;;  %v3027_v26 = vand.u32 2147483648, %v6415_v58  ;;  %v6534_v7 = vpop.xlane.xlu1 %2313 }
 0x3e4   : > { %v2422_v6 = vmul.f32 %v6486_v36, %v6441_v16  ;;  %v2410_v51 = vadd.f32 %v4042_v24, %v2409_v41  ;;  %v2418_v28 = vor.u32 1.1754944e-38, %v2417_v5  ;;  %v3019_v61 = vmul.f32 %v4044_v40, %v3018_v49 }
 0x3e5   : > { %3755 = vst [vmem:[%s5641_s12 + $0x50] sm:$0xff] %v3639_v48   ;;  %vm3022_vm6 = vweird.f32 %v4044_v40  ;;  %v2404_v11 = vsel %vm6451_vm3, %v2403_v30, %v2399_v33  ;;  %vm2426_vm10 = vweird.f32 %v6441_v16  ;;  %4051 = vrcp.f32 %v6489_v45  ;;  %v6554_v48 = vpop.xlane.xlu0 %1705 }
 0x3e6   : > { %v2423_v42 = vsub.f32 1.0, %v2422_v6  ;;  %v2414_v17 = vsel %vm2413_vm7, %v4042_v24, %v2410_v51  ;;  %v3020_v57 = vadd.f32 %v4044_v40, %v3019_v61  ;;  %vm3026_vm2 = vcmp.eq.f32.partialorder %v3025_v15, 8.507059e+37  ;;  %vm3023_vm5 = vmor %vm3021_vm4, %vm3022_vm6 }
 0x3e7   : > { %v2430_v20 = vand.u32 2147483647, %v6441_v16  ;;  %v2419_v25 = vsel %vm6491_vm0, %v2418_v28, %v2414_v17  ;;  %v3028_v55 = vor.u32 1.1754944e-38, %v3027_v26  ;;  %v2432_v22 = vand.u32 2147483648, %v6441_v16 }
 0x3e8   : > { %v4048_v27 = vpop.eup %4047  ;;  %v2424_v29 = vmul.f32 %v6486_v36, %v2423_v42  ;;  %v2575_v3 = vmul.f32 %v5775_v63, %v2404_v11  ;;  %v2576_v37 = vmul.f32 %v5815_v47, %v2419_v25  ;;  %v3024_v50 = vsel %vm3023_vm5, %v4044_v40, %v3020_v57 }
 0x3e9   : > { %v6514_v39 = vpop.eup %4049  ;;  %v3032_v53 = vmul.f32 %v4048_v27, %v6461_v43  ;;  %v3029_v59 = vsel %vm3026_vm2, %v3028_v55, %v3024_v50  ;;  %v3040_v58 = vand.u32 2147483647, %v6461_v43  ;;  %v3042_v44 = vand.u32 2147483648, %v6461_v43 }
 0x3ea   : > { %v1812_v24 = vmul.f32 %v6514_v39, %v6468_v10  ;;  %v3679_v34 = vpack.c.bf16 %v2576_v37, %v2575_v3  ;;  %v3186_v30 = vmul.f32 %v5809_v60, %v3029_v59  ;;  %vm6526_vm13 = vcmp.eq.f32.partialorder %v2430_v20, 8.507059e+37  ;;  %v6578_v17 = vpop.xlane.xlu2 %2315 }
 0x3eb   : > { %v3033_v47 = vsub.f32 1.0, %v3032_v53  ;;  %vm3036_vm3 = vweird.f32 %v6461_v43  ;;  %v4052_v12 = vpop.eup %4051  ;;  %v2425_v8 = vadd.f32 %v6486_v36, %v2424_v29  ;;  %vm2427_vm9 = vweird.f32 %v6486_v36  ;;  %v6590_v37 = vpop.xlane.xlu1 %2925 }
 0x3ec   : > { %v1813_v14 = vsub.f32 1.0, %v1812_v24  ;;  %4053 = vrcp.f32 %v6519_v56  ;;  %3763 = vst [vmem:[%s5641_s12 + $0x90] sm:$0xff] %v3679_v34   ;;  %v3719_v60 = vpack.c.bf16 %v3186_v30, %v6464_v52  ;;  %vm3037_vm14 = vweird.f32 %v4048_v27  ;;  %vm6548_vm8 = vmor %vm2426_vm10, %vm2427_vm9 }
 0x3ed   : > { %v3034_v40 = vmul.f32 %v4048_v27, %v3033_v47  ;;  %v3047_v38 = vmul.f32 %v4052_v12, %v6489_v45  ;;  %vm6539_vm1 = vcmp.eq.f32.partialorder %v3040_v58, 8.507059e+37  ;;  %v3043_v0 = vor.u32 1.1754944e-38, %v3042_v44  ;;  %vm3038_vm11 = vmor %vm3036_vm3, %vm3037_vm14 }
 0x3ee   : > { %v1814_v62 = vmul.f32 %v6514_v39, %v1813_v14  ;;  %v1820_v32 = vand.u32 2147483647, %v6468_v10  ;;  %3771 = vst [vmem:[%s5641_s12 + $0xd0] sm:$0xff] %v3719_v60   ;;  %v1822_v19 = vand.u32 2147483648, %v6468_v10  ;;  %v3055_v15 = vand.u32 2147483647, %v6489_v45 }
 0x3ef   : > { %v3035_v52 = vadd.f32 %v4048_v27, %v3034_v40  ;;  %v3048_v33 = vsub.f32 1.0, %v3047_v38  ;;  %v2429_v41 = vsel %vm6548_vm8, %v6486_v36, %v2425_v8  ;;  %vm1817_vm12 = vweird.f32 %v6514_v39 }
 0x3f0   : > { %v3057_v16 = vand.u32 2147483648, %v6489_v45  ;;  %4055 = vrcp.f32 %v6534_v7  ;;  %v1815_v31 = vadd.f32 %v6514_v39, %v1814_v62  ;;  %vm3052_vm15 = vweird.f32 %v4052_v12 }
 0x3f1   : > { %v3039_v49 = vsel %vm3038_vm11, %v4048_v27, %v3035_v52  ;;  %v3049_v26 = vmul.f32 %v4052_v12, %v3048_v33  ;;  %v2433_v51 = vor.u32 1.1754944e-38, %v2432_v22  ;;  %vm1816_vm0 = vweird.f32 %v6468_v10 }
 0x3f2   : > { %v4054_v6 = vpop.eup %4053  ;;  %v3044_v28 = vsel %vm6539_vm1, %v3043_v0, %v3039_v49  ;;  %vm3051_vm4 = vweird.f32 %v6489_v45  ;;  %vm6569_vm6 = vmor %vm1816_vm0, %vm1817_vm12  ;;  %vm6573_vm7 = vcmp.eq.f32.partialorder %v1820_v32, 8.507059e+37  ;;  %v1823_v61 = vor.u32 1.1754944e-38, %v1822_v19 }
 0x3f3   : > { %v3050_v11 = vadd.f32 %v4052_v12, %v3049_v26  ;;  %v1827_v42 = vmul.f32 %v4054_v6, %v6519_v56  ;;  %v2434_v57 = vsel %vm6526_vm13, %v2433_v51, %v2429_v41  ;;  %vm3053_vm10 = vmor %vm3051_vm4, %vm3052_vm15  ;;  %vm3056_vm2 = vcmp.eq.f32.partialorder %v3055_v15, 8.507059e+37  ;;  %v6627_v41 = vpop.xlane.xlu2 %2927 }
 0x3f4   : > { %v3058_v10 = vor.u32 1.1754944e-38, %v3057_v16  ;;  %4057 = vrcp.f32 %v6554_v48  ;;  %v3187_v45 = vmul.f32 %v5844_v4, %v3044_v28  ;;  %v1819_v20 = vsel %vm6569_vm6, %v6514_v39, %v1815_v31 }
 0x3f5   : > { %v3054_v27 = vsel %vm3053_vm10, %v4052_v12, %v3050_v11  ;;  %v1828_v25 = vsub.f32 1.0, %v1827_v42  ;;  %v1835_v22 = vand.u32 2147483647, %v6519_v56  ;;  %v1837_v3 = vand.u32 2147483648, %v6519_v56  ;;  %v6647_v42 = vpop.xlane.xlu1 %1707 }
 0x3f6   : > { %v4056_v55 = vpop.eup %4055  ;;  %v3059_v29 = vsel %vm3056_vm2, %v3058_v10, %v3054_v27  ;;  %4059 = vrcp.f32 %v6578_v17  ;;  %vm1832_vm5 = vweird.f32 %v4054_v6  ;;  %v6595_v39 = vmul.f32 %v5811_v9, %v2434_v57 }
 0x3f7   : > { %v3188_v50 = vmul.f32 %v5835_v54, %v3059_v29  ;;  %v1829_v53 = vmul.f32 %v4054_v6, %v1828_v25  ;;  %v2437_v4 = vmul.f32 %v4056_v55, %v6534_v7  ;;  %v1824_v59 = vsel %vm6573_vm7, %v1823_v61, %v1819_v20  ;;  %v6602_v54 = vpop.xlane.xlu0 %2317 }
 0x3f8   : > { %vm1831_vm13 = vweird.f32 %v6519_v56  ;;  %v2445_v58 = vand.u32 2147483647, %v6534_v7  ;;  %4061 = vrcp.f32 %v6590_v37  ;;  %vm1836_vm9 = vcmp.eq.f32.partialorder %v1835_v22, 8.507059e+37 }
 0x3f9   : > { %v3724_v44 = vpack.c.bf16 %v3188_v50, %v3187_v45  ;;  %v1830_v24 = vadd.f32 %v4054_v6, %v1829_v53  ;;  %v2438_v34 = vsub.f32 1.0, %v2437_v4  ;;  %vm1833_vm3 = vmor %vm1831_vm13, %vm1832_vm5  ;;  %v1838_v9 = vor.u32 1.1754944e-38, %v1837_v3 }
 0x3fa   : > { %v6604_v30 = vpop.eup %4057  ;;  %vm2441_vm14 = vweird.f32 %v6534_v7  ;;  %v2447_v63 = vand.u32 2147483648, %v6534_v7  ;;  %vm2442_vm1 = vweird.f32 %v4056_v55  ;;  %v1967_v14 = vmul.f32 %v5830_v23, %v1824_v59 }
 0x3fb   : > { %3772 = vst [vmem:[%s5641_s12 + $0xd8] sm:$0xff] %v3724_v44   ;;  %v1834_v56 = vsel %vm1833_vm3, %v4054_v6, %v1830_v24  ;;  %v2439_v47 = vmul.f32 %v4056_v55, %v2438_v34  ;;  %v1842_v12 = vmul.f32 %v6604_v30, %v6554_v48  ;;  %vm6612_vm8 = vcmp.eq.f32.partialorder %v2445_v58, 8.507059e+37  ;;  %vm2443_vm11 = vmor %vm2441_vm14, %vm2442_vm1 }
 0x3fc   : > { %v4060_v8 = vpop.eup %4059  ;;  %v1839_v60 = vsel %vm1836_vm9, %v1838_v9, %v1834_v56  ;;  %4063 = vrcp.f32 %v6602_v54  ;;  %v2448_v32 = vor.u32 1.1754944e-38, %v2447_v63  ;;  %vm1846_vm12 = vweird.f32 %v6554_v48  ;;  %v6697_v63 = vpop.xlane.xlu2 %1709 }
 0x3fd   : > { %v1968_v38 = vmul.f32 %v5866_v1, %v1839_v60  ;;  %v2440_v2 = vadd.f32 %v4056_v55, %v2439_v47  ;;  %v1843_v0 = vsub.f32 1.0, %v1842_v12  ;;  %v2452_v62 = vmul.f32 %v4060_v8, %v6578_v17 }
 0x3fe   : > { %v1850_v23 = vand.u32 2147483647, %v6554_v48  ;;  %v1852_v5 = vand.u32 2147483648, %v6554_v48  ;;  %v6624_v52 = vpop.eup %4061  ;;  %vm2456_vm15 = vweird.f32 %v6578_v17  ;;  %v2460_v16 = vand.u32 2147483647, %v6578_v17 }
 0x3ff   : > { %v3644_v19 = vpack.c.bf16 %v1968_v38, %v1967_v14  ;;  %v2444_v33 = vsel %vm2443_vm11, %v4056_v55, %v2440_v2  ;;  %v1844_v1 = vmul.f32 %v6604_v30, %v1843_v0  ;;  %v2453_v15 = vsub.f32 1.0, %v2452_v62  ;;  %v6665_v22 = vpop.xlane.xlu0 %2929  ;;  %v6711_v62 = vpop.xlane.xlu1 %2319 }
 0x400   : > { %v2449_v7 = vsel %vm6612_vm8, %v2448_v32, %v2444_v33  ;;  %v3062_v49 = vmul.f32 %v6624_v52, %v6590_v37  ;;  %vm2457_vm0 = vweird.f32 %v4060_v8  ;;  %v2462_v6 = vand.u32 2147483648, %v6578_v17 }
 0x401   : > { %3756 = vst [vmem:[%s5641_s12 + $0x58] sm:$0xff] %v3644_v19   ;;  %v2578_v31 = vmul.f32 %v5858_v21, %v2449_v7  ;;  %v2454_v26 = vmul.f32 %v4060_v8, %v2453_v15  ;;  %vm1847_vm4 = vweird.f32 %v6604_v30  ;;  %vm6639_vm6 = vcmp.eq.f32.partialorder %v1850_v23, 8.507059e+37  ;;  %vm6651_vm7 = vmor %vm2456_vm15, %vm2457_vm0 }
 0x402   : > { %v4064_v51 = vpop.eup %4063  ;;  %v3063_v43 = vsub.f32 1.0, %v3062_v49  ;;  %4065 = vrcp.f32 %v6627_v41  ;;  %v1845_v61 = vadd.f32 %v6604_v30, %v1844_v1  ;;  %v1853_v57 = vor.u32 1.1754944e-38, %v1852_v5  ;;  %vm6671_vm2 = vmor %vm1846_vm12, %vm1847_vm4 }
 0x403   : > { %v3684_v36 = vpack.c.bf16 %v2578_v31, %v6595_v39  ;;  %v2455_v21 = vadd.f32 %v4060_v8, %v2454_v26  ;;  %v2467_v11 = vmul.f32 %v4064_v51, %v6602_v54  ;;  %vm6655_vm10 = vcmp.eq.f32.partialorder %v2460_v16, 8.507059e+37 }
 0x404   : > { %v3064_v20 = vmul.f32 %v6624_v52, %v3063_v43  ;;  %v3070_v27 = vand.u32 2147483647, %v6590_v37  ;;  %v2463_v55 = vor.u32 1.1754944e-38, %v2462_v6  ;;  %v3072_v29 = vand.u32 2147483648, %v6590_v37  ;;  %v6749_v10 = vpop.xlane.xlu2 %2321 }
 0x405   : > { %3764 = vst [vmem:[%s5641_s12 + $0x98] sm:$0xff] %v3684_v36   ;;  %v2459_v25 = vsel %vm6651_vm7, %v4060_v8, %v2455_v21  ;;  %v2468_v17 = vsub.f32 1.0, %v2467_v11  ;;  %vm3067_vm5 = vweird.f32 %v6624_v52  ;;  %v2475_v50 = vand.u32 2147483647, %v6602_v54  ;;  %v7423_v36 = vld [vmem:[#allocation10_spill] sm:$0xff] }
 0x406   : > { %v2477_v53 = vand.u32 2147483648, %v6602_v54  ;;  %4067 = vrcp.f32 %v6647_v42  ;;  %v1849_v4 = vsel %vm6671_vm2, %v6604_v30, %v1845_v61  ;;  %v3065_v39 = vadd.f32 %v6624_v52, %v3064_v20 }
 0x407   : > { %v2469_v59 = vmul.f32 %v4064_v51, %v2468_v17  ;;  %vm2472_vm13 = vweird.f32 %v4064_v51  ;;  %v2464_v58 = vsel %vm6655_vm10, %v2463_v55, %v2459_v25  ;;  %vm3066_vm3 = vweird.f32 %v6590_v37  ;;  %v6727_v7 = vpop.xlane.xlu0 %1711 }
 0x408   : > { %v4066_v48 = vpop.eup %4065  ;;  %vm6686_vm9 = vcmp.eq.f32.partialorder %v3070_v27, 8.507059e+37  ;;  %4069 = vrcp.f32 %v6665_v22  ;;  %vm6691_vm14 = vmor %vm3066_vm3, %vm3067_vm5  ;;  %v3073_v34 = vor.u32 1.1754944e-38, %v3072_v29  ;;  %vm2471_vm1 = vweird.f32 %v6602_v54 }
 0x409   : > { %v2470_v30 = vadd.f32 %v4064_v51, %v2469_v59  ;;  %v3077_v9 = vmul.f32 %v4066_v48, %v6627_v41  ;;  %v1854_v37 = vsel %vm6639_vm6, %v1853_v57, %v1849_v4  ;;  %vm2473_vm8 = vmor %vm2471_vm1, %vm2472_vm13  ;;  %vm2476_vm11 = vcmp.eq.f32.partialorder %v2475_v50, 8.507059e+37 }
 0x40a   : > { %v2478_v56 = vor.u32 1.1754944e-38, %v2477_v53  ;;  %v3085_v47 = vand.u32 2147483647, %v6627_v41  ;;  %v2579_v12 = vmul.f32 %v5892_v13, %v2464_v58  ;;  %v3069_v8 = vsel %vm6691_vm14, %v6624_v52, %v3065_v39  ;;  %v7424_v53 = vld [vmem:[#allocation11_spill] sm:$0xff]  ;;  %v7439_v39 = vld [vmem:[#allocation16_spill] sm:$0xff] }
 0x40b   : > { %v2474_v14 = vsel %vm2473_vm8, %v4064_v51, %v2470_v30  ;;  %v3078_v54 = vsub.f32 1.0, %v3077_v9  ;;  %vm3081_vm12 = vweird.f32 %v6627_v41  ;;  %v3087_v38 = vand.u32 2147483648, %v6627_v41  ;;  %v7420_v51 = vld [vmem:[#allocation9_spill] sm:$0xff]  ;;  %v6780_v30 = vpop.xlane.xlu1 %2931 }
 0x40c   : > { %v4068_v60 = vpop.eup %4067  ;;  %v2479_v40 = vsel %vm2476_vm11, %v2478_v56, %v2474_v14  ;;  %4071 = vrcp.f32 %v6697_v63  ;;  %vm3082_vm15 = vweird.f32 %v4066_v48  ;;  %v6716_v23 = vmul.f32 %v5870_v46, %v1854_v37 }
 0x40d   : > { %v2580_v2 = vmul.f32 %v5889_v18, %v2479_v40  ;;  %v3079_v0 = vmul.f32 %v4066_v48, %v3078_v54  ;;  %v1857_v13 = vmul.f32 %v4068_v60, %v6647_v42  ;;  %v3074_v5 = vsel %vm6686_vm9, %v3073_v34, %v3069_v8  ;;  %vm3083_vm4 = vmor %vm3081_vm12, %vm3082_vm15 }
 0x40e   : > { %v6713_v32 = vpop.eup %4069  ;;  %vm6720_vm0 = vcmp.eq.f32.partialorder %v3085_v47, 8.507059e+37  ;;  %v1865_v18 = vand.u32 2147483647, %v6647_v42  ;;  %v3088_v46 = vor.u32 1.1754944e-38, %v3087_v38  ;;  %vm1861_vm6 = vweird.f32 %v6647_v42 }
 0x40f   : > { %v3689_v19 = vpack.c.bf16 %v2580_v2, %v2579_v12  ;;  %v3080_v33 = vadd.f32 %v4066_v48, %v3079_v0  ;;  %v1858_v1 = vsub.f32 1.0, %v1857_v13  ;;  %v3092_v15 = vmul.f32 %v6713_v32, %v6665_v22  ;;  %v6802_v38 = vpop.xlane.xlu0 %2323 }
 0x410   : > { %v1867_v16 = vand.u32 2147483648, %v6647_v42  ;;  %4073 = vrcp.f32 %v6711_v62  ;;  %vm1862_vm7 = vweird.f32 %v4068_v60  ;;  %v3189_v28 = vmul.f32 %v7420_v51, %v3074_v5 }
 0x411   : > { %3765 = vst [vmem:[%s5641_s12 + $0xa0] sm:$0xff] %v3689_v19   ;;  %v3084_v49 = vsel %vm3083_vm4, %v4066_v48, %v3080_v33  ;;  %v1859_v31 = vmul.f32 %v4068_v60, %v1858_v1  ;;  %v3093_v26 = vsub.f32 1.0, %v3092_v15  ;;  %vm6740_vm10 = vcmp.eq.f32.partialorder %v1865_v18, 8.507059e+37  ;;  %vm1863_vm2 = vmor %vm1861_vm6, %vm1862_vm7 }
 0x412   : > { %v6735_v6 = vpop.eup %4071  ;;  %v3089_v41 = vsel %vm6720_vm0, %v3088_v46, %v3084_v49  ;;  %4075 = vrcp.f32 %v6727_v7  ;;  %v3100_v11 = vand.u32 2147483647, %v6665_v22  ;;  %v1868_v45 = vor.u32 1.1754944e-38, %v1867_v16 }
 0x413   : > { %v3190_v61 = vmul.f32 %v7423_v36, %v3089_v41  ;;  %v1860_v21 = vadd.f32 %v4068_v60, %v1859_v31  ;;  %v1872_v57 = vmul.f32 %v6735_v6, %v6697_v63  ;;  %vm3096_vm5 = vweird.f32 %v6665_v22 }
 0x414   : > { %v3102_v20 = vand.u32 2147483648, %v6665_v22  ;;  %v1880_v27 = vand.u32 2147483647, %v6697_v63  ;;  %v3094_v29 = vmul.f32 %v6713_v32, %v3093_v26  ;;  %vm1876_vm13 = vweird.f32 %v6697_v63 }
 0x415   : > { %v3729_v25 = vpack.c.bf16 %v3190_v61, %v3189_v28  ;;  %v1864_v55 = vsel %vm1863_vm2, %v4068_v60, %v1860_v21  ;;  %v1873_v17 = vsub.f32 1.0, %v1872_v57  ;;  %v1882_v42 = vand.u32 2147483648, %v6697_v63  ;;  %v6847_v21 = vpop.xlane.xlu1 %1713 }
 0x416   : > { %v6757_v3 = vpop.eup %4073  ;;  %v1869_v50 = vsel %vm6740_vm10, %v1868_v45, %v1864_v55  ;;  %4077 = vrcp.f32 %v6749_v10  ;;  %vm6766_vm3 = vcmp.eq.f32.partialorder %v3100_v11, 8.507059e+37  ;;  %v2490_v58 = vand.u32 2147483647, %v6711_v62 }
 0x417   : > { %3773 = vst [vmem:[%s5641_s12 + $0xe0] sm:$0xff] %v3729_v25   ;;  %v1970_v4 = vmul.f32 %v7424_v53, %v1869_v50  ;;  %v1874_v59 = vmul.f32 %v6735_v6, %v1873_v17  ;;  %v2482_v48 = vmul.f32 %v6757_v3, %v6711_v62  ;;  %vm3097_vm9 = vweird.f32 %v6713_v32  ;;  %v6859_v50 = vpop.xlane.xlu0 %1717 }
 0x418   : > { %v4076_v44 = vpop.eup %4075  ;;  %v3103_v24 = vor.u32 1.1754944e-38, %v3102_v20  ;;  %vm1877_vm14 = vweird.f32 %v6735_v6  ;;  %vm6776_vm1 = vcmp.eq.f32.partialorder %v1880_v27, 8.507059e+37  ;;  %v3095_v37 = vadd.f32 %v6713_v32, %v3094_v29  ;;  %vm6808_vm0 = vmor %vm3096_vm5, %vm3097_vm9 }
 0x419   : > { %v3649_v9 = vpack.c.bf16 %v1970_v4, %v6716_v23  ;;  %v1875_v56 = vadd.f32 %v6735_v6, %v1874_v59  ;;  %v2483_v47 = vsub.f32 1.0, %v2482_v48  ;;  %v1883_v12 = vor.u32 1.1754944e-38, %v1882_v42  ;;  %vm6791_vm11 = vmor %vm1876_vm13, %vm1877_vm14  ;;  %v7440_v48 = vld [vmem:[#allocation19_spill] sm:$0xff] }
 0x41a   : > { %vm2486_vm8 = vweird.f32 %v6711_v62  ;;  %v2492_v8 = vand.u32 2147483648, %v6711_v62  ;;  %v1887_v14 = vmul.f32 %v4076_v44, %v6727_v7  ;;  %vm6796_vm12 = vcmp.eq.f32.partialorder %v2490_v58, 8.507059e+37  ;;  %v7437_v62 = vld [vmem:[#allocation14_spill] sm:$0xff] }
 0x41b   : > { %3757 = vst [vmem:[%s5641_s12 + $0x60] sm:$0xff] %v3649_v9   ;;  %v2484_v60 = vmul.f32 %v6757_v3, %v2483_v47  ;;  %vm1891_vm15 = vweird.f32 %v6727_v7  ;;  %4079 = vrcp.f32 %v6780_v30  ;;  %v1879_v0 = vsel %vm6791_vm11, %v6735_v6, %v1875_v56 }
 0x41c   : > { %v4078_v2 = vpop.eup %4077  ;;  %v1888_v13 = vsub.f32 1.0, %v1887_v14  ;;  %v1895_v23 = vand.u32 2147483647, %v6727_v7  ;;  %v1897_v5 = vand.u32 2147483648, %v6727_v7  ;;  %v3099_v52 = vsel %vm6808_vm0, %v6713_v32, %v3095_v37  ;;  %v6828_v32 = vpop.xlane.xlu2 %2933 }
 0x41d   : > { %v2485_v18 = vadd.f32 %v6757_v3, %v2484_v60  ;;  %vm2487_vm4 = vweird.f32 %v6757_v3  ;;  %v2497_v22 = vmul.f32 %v4078_v2, %v6749_v10  ;;  %v2493_v19 = vor.u32 1.1754944e-38, %v2492_v8  ;;  %v7441_v8 = vld [vmem:[#allocation7_spill] sm:$0xff]  ;;  %v6900_v31 = vpop.xlane.xlu1 %2325 }
 0x41e   : > { %v1889_v33 = vmul.f32 %v4076_v44, %v1888_v13  ;;  %vm1892_vm6 = vweird.f32 %v4076_v44  ;;  %4081 = vrcp.f32 %v6802_v38  ;;  %v1884_v1 = vsel %vm6776_vm1, %v1883_v12, %v1879_v0  ;;  %vm6834_vm7 = vmor %vm2486_vm8, %vm2487_vm4  ;;  %v7442_v13 = vld [vmem:[#allocation15_spill] sm:$0xff] }
 0x41f   : > { %v2498_v15 = vsub.f32 1.0, %v2497_v22  ;;  %v2505_v46 = vand.u32 2147483647, %v6749_v10  ;;  %v2507_v16 = vand.u32 2147483648, %v6749_v10  ;;  %v3104_v49 = vsel %vm6766_vm3, %v3103_v24, %v3099_v52  ;;  %vm1893_vm2 = vmor %vm1891_vm15, %vm1892_vm6 }
 0x420   : > { %v1890_v26 = vadd.f32 %v4076_v44, %v1889_v33  ;;  %vm1896_vm10 = vcmp.eq.f32.partialorder %v1895_v23, 8.507059e+37  ;;  %v1898_v6 = vor.u32 1.1754944e-38, %v1897_v5  ;;  %v2489_v28 = vsel %vm6834_vm7, %v6757_v3, %v2485_v18 }
 0x421   : > { %v4080_v51 = vpop.eup %4079  ;;  %v2499_v41 = vmul.f32 %v4078_v2, %v2498_v15  ;;  %vm2501_vm5 = vweird.f32 %v6749_v10  ;;  %vm2502_vm13 = vweird.f32 %v4078_v2  ;;  %v1971_v43 = vmul.f32 %v7437_v62, %v1884_v1  ;;  %v7438_v10 = vld [vmem:[#allocation8_spill] sm:$0xff]  ;;  %v6913_v62 = vpop.xlane.xlu0 %2329 }
 0x422   : > { %v1894_v36 = vsel %vm1893_vm2, %v4076_v44, %v1890_v26  ;;  %v3107_v61 = vmul.f32 %v4080_v51, %v6780_v30  ;;  %4083 = vrcp.f32 %v6828_v32  ;;  %vm2506_vm3 = vcmp.eq.f32.partialorder %v2505_v46, 8.507059e+37  ;;  %vm2503_vm9 = vmor %vm2501_vm5, %vm2502_vm13 }
 0x423   : > { %v1899_v11 = vsel %vm1896_vm10, %v1898_v6, %v1894_v36  ;;  %v2500_v57 = vadd.f32 %v4078_v2, %v2499_v41  ;;  %v2508_v45 = vor.u32 1.1754944e-38, %v2507_v16  ;;  %v2494_v7 = vsel %vm6796_vm12, %v2493_v19, %v2489_v28 }
 0x424   : > { %v6849_v20 = vpop.eup %4081  ;;  %v1972_v27 = vmul.f32 %v7438_v10, %v1899_v11  ;;  %v3108_v25 = vsub.f32 1.0, %v3107_v61  ;;  %v3117_v55 = vand.u32 2147483648, %v6780_v30  ;;  %v3115_v17 = vand.u32 2147483647, %v6780_v30  ;;  %v6875_v60 = vpop.xlane.xlu2 %1715 }
 0x425   : > { %v2504_v29 = vsel %vm2503_vm9, %v4078_v2, %v2500_v57  ;;  %v2512_v3 = vmul.f32 %v6849_v20, %v6802_v38  ;;  %4085 = vrcp.f32 %v6847_v21  ;;  %vm3112_vm14 = vweird.f32 %v4080_v51 }
 0x426   : > { %v3654_v42 = vpack.c.bf16 %v1972_v27, %v1971_v43  ;;  %v2509_v53 = vsel %vm2506_vm3, %v2508_v45, %v2504_v29  ;;  %v3109_v4 = vmul.f32 %v4080_v51, %v3108_v25  ;;  %v2581_v59 = vmul.f32 %v7439_v39, %v2494_v7 }
 0x427   : > { %v2582_v58 = vmul.f32 %v7440_v48, %v2509_v53  ;;  %vm3111_vm1 = vweird.f32 %v6780_v30  ;;  %v2513_v44 = vsub.f32 1.0, %v2512_v3  ;;  %v3118_v9 = vor.u32 1.1754944e-38, %v3117_v55  ;;  %v7451_v3 = vld [vmem:[#allocation18_spill] sm:$0xff]  ;;  %v7474_v48 = vld [vmem:[#allocation23_spill] sm:$0xff] }
 0x428   : > { %v6864_v24 = vpop.eup %4083  ;;  %3758 = vst [vmem:[%s5641_s12 + $0x68] sm:$0xff] %v3654_v42   ;;  %v3110_v34 = vadd.f32 %v4080_v51, %v3109_v4  ;;  %v2520_v37 = vand.u32 2147483647, %v6802_v38  ;;  %4087 = vrcp.f32 %v6859_v50  ;;  %vm3113_vm8 = vmor %vm3111_vm1, %vm3112_vm14  ;;  %v2522_v12 = vand.u32 2147483648, %v6802_v38 }
 0x429   : > { %v3694_v56 = vpack.c.bf16 %v2582_v58, %v2581_v59  ;;  %v2514_v47 = vmul.f32 %v6849_v20, %v2513_v44  ;;  %v3122_v30 = vmul.f32 %v6864_v24, %v6828_v32  ;;  %v3191_v14 = vmul.f32 %v7441_v8, %v3104_v49  ;;  %v7458_v8 = vld [vmem:[#allocation6_spill] sm:$0xff]  ;;  %v6991_v5 = vpop.xlane.xlu0 %2935 }
 0x42a   : > { %v3114_v54 = vsel %vm3113_vm8, %v4080_v51, %v3110_v34  ;;  %vm3116_vm11 = vcmp.eq.f32.partialorder %v3115_v17, 8.507059e+37  ;;  %vm2516_vm12 = vweird.f32 %v6802_v38  ;;  %vm2517_vm15 = vweird.f32 %v6849_v20 }
 0x42b   : > { %v4086_v40 = vpop.eup %4085  ;;  %3766 = vst [vmem:[%s5641_s12 + $0xa8] sm:$0xff] %v3694_v56   ;;  %v3119_v2 = vsel %vm3116_vm11, %v3118_v9, %v3114_v54  ;;  %v2515_v63 = vadd.f32 %v6849_v20, %v2514_v47  ;;  %v3123_v0 = vsub.f32 1.0, %v3122_v30  ;;  %vm6881_vm0 = vcmp.eq.f32.partialorder %v2520_v37, 8.507059e+37  ;;  %vm6894_vm6 = vmor %vm2516_vm12, %vm2517_vm15  ;;  %v6969_v56 = vpop.xlane.xlu1 %1719 }
 0x42c   : > { %v3192_v23 = vmul.f32 %v7442_v13, %v3119_v2  ;;  %v3132_v52 = vand.u32 2147483648, %v6828_v32  ;;  %v1902_v18 = vmul.f32 %v4086_v40, %v6847_v21  ;;  %v2523_v22 = vor.u32 1.1754944e-38, %v2522_v12  ;;  %v6938_v17 = vpop.xlane.xlu2 %2327 }
 0x42d   : > { %vm3126_vm4 = vweird.f32 %v6828_v32  ;;  %v3130_v19 = vand.u32 2147483647, %v6828_v32  ;;  %4089 = vrcp.f32 %v6875_v60  ;;  %v1910_v16 = vand.u32 2147483647, %v6847_v21 }
 0x42e   : > { %v6890_v33 = vpop.eup %4087  ;;  %v3734_v1 = vpack.c.bf16 %v3192_v23, %v3191_v14  ;;  %v1903_v46 = vsub.f32 1.0, %v1902_v18  ;;  %v1912_v49 = vand.u32 2147483648, %v6847_v21  ;;  %v2519_v26 = vsel %vm6894_vm6, %v6849_v20, %v2515_v63 }
 0x42f   : > { %v3124_v6 = vmul.f32 %v6864_v24, %v3123_v0  ;;  %v1932_v38 = vmul.f32 %v6890_v33, %v6859_v50  ;;  %v1942_v51 = vand.u32 2147483648, %v6859_v50  ;;  %v6910_v28 = vor.u32 1.1754944e-38, %v3132_v52 }
 0x430   : > { %3774 = vst [vmem:[%s5641_s12 + $0xe8] sm:$0xff] %v3734_v1   ;;  %v1904_v41 = vmul.f32 %v4086_v40, %v1903_v46  ;;  %vm1906_vm7 = vweird.f32 %v6847_v21  ;;  %vm1907_vm10 = vweird.f32 %v4086_v40  ;;  %vm3127_vm2 = vweird.f32 %v6864_v24 }
 0x431   : > { %v1933_v43 = vsub.f32 1.0, %v1932_v38  ;;  %v1940_v36 = vand.u32 2147483647, %v6859_v50  ;;  %4091 = vrcp.f32 %v6900_v31  ;;  %v2524_v61 = vsel %vm6881_vm0, %v2523_v22, %v2519_v26  ;;  %vm6927_vm13 = vmor %vm1906_vm7, %vm1907_vm10  ;;  %v7463_v26 = vld [vmem:[#allocation12_spill] sm:$0xff] }
 0x432   : > { %v1905_v11 = vadd.f32 %v4086_v40, %v1904_v41  ;;  %vm6920_vm5 = vcmp.eq.f32.partialorder %v1910_v16, 8.507059e+37  ;;  %v1913_v45 = vor.u32 1.1754944e-38, %v1912_v49  ;;  %v6925_v20 = vadd.f32 %v6864_v24, %v3124_v6  ;;  %vm6954_vm14 = vmor %vm3126_vm4, %vm3127_vm2 }
 0x433   : > { %v4090_v21 = vpop.eup %4089  ;;  %v1934_v10 = vmul.f32 %v6890_v33, %v1933_v43  ;;  %vm1936_vm3 = vweird.f32 %v6859_v50  ;;  %v1943_v27 = vor.u32 1.1754944e-38, %v1942_v51  ;;  %v1925_v29 = vand.u32 2147483647, %v6875_v60 }
 0x434   : > { %v1909_v25 = vsel %vm6927_vm13, %v4086_v40, %v1905_v11  ;;  %v1917_v55 = vmul.f32 %v4090_v21, %v6875_v60  ;;  %4093 = vrcp.f32 %v6913_v62  ;;  %v6941_v42 = vmul.f32 %v7451_v3, %v2524_v61  ;;  %v7026_v7 = vpop.xlane.xlu2 %2939 }
 0x435   : > { %vm6943_vm9 = vcmp.eq.f32.partialorder %v1940_v36, 8.507059e+37  ;;  %v1927_v4 = vand.u32 2147483648, %v6875_v60  ;;  %v2535_v39 = vand.u32 2147483647, %v6900_v31  ;;  %v2537_v59 = vand.u32 2147483648, %v6900_v31 }
 0x436   : > { %v1914_v58 = vsel %vm6920_vm5, %v1913_v45, %v1909_v25  ;;  %vm1937_vm1 = vweird.f32 %v6890_v33  ;;  %v1918_v44 = vsub.f32 1.0, %v1917_v55  ;;  %vm1921_vm8 = vweird.f32 %v6875_v60 }
 0x437   : > { %v4092_v34 = vpop.eup %4091  ;;  %v3129_v9 = vsel %vm6954_vm14, %v6864_v24, %v6925_v20  ;;  %v1935_v37 = vadd.f32 %v6890_v33, %v1934_v10  ;;  %vm2531_vm11 = vweird.f32 %v6900_v31  ;;  %4095 = vrcp.f32 %v6938_v17  ;;  %vm6985_vm4 = vmor %vm1936_vm3, %vm1937_vm1 }
 0x438   : > { %v1919_v47 = vmul.f32 %v4090_v21, %v1918_v44  ;;  %vm1922_vm12 = vweird.f32 %v4090_v21  ;;  %vm6971_vm15 = vcmp.eq.f32.partialorder %v1925_v29, 8.507059e+37  ;;  %v2527_v30 = vmul.f32 %v4092_v34, %v6900_v31 }
 0x439   : > { %v1973_v14 = vmul.f32 %v7458_v8, %v1914_v58  ;;  %v1928_v54 = vor.u32 1.1754944e-38, %v1927_v4  ;;  %vm6977_vm0 = vcmp.eq.f32.partialorder %v2535_v39, 8.507059e+37  ;;  %v2538_v2 = vor.u32 1.1754944e-38, %v2537_v59  ;;  %vm1923_vm7 = vmor %vm1921_vm8, %vm1922_vm12 }
 0x43a   : > { %v4094_v63 = vpop.eup %4093  ;;  %v1920_v13 = vadd.f32 %v4090_v21, %v1919_v47  ;;  %v2528_v23 = vsub.f32 1.0, %v2527_v30  ;;  %vm2561_vm6 = vweird.f32 %v6913_v62  ;;  %4097 = vrcp.f32 %v6969_v56  ;;  %v7471_v30 = vld [vmem:[#allocation27_spill] sm:$0xff] }
 0x43b   : > { %v1939_v52 = vsel %vm6985_vm4, %v6890_v33, %v1935_v37  ;;  %v2557_v50 = vmul.f32 %v4094_v63, %v6913_v62  ;;  %v2565_v18 = vand.u32 2147483647, %v6913_v62  ;;  %v2567_v22 = vand.u32 2147483648, %v6913_v62 }
 0x43c   : > { %v1924_v1 = vsel %vm1923_vm7, %v4090_v21, %v1920_v13  ;;  %v2529_v15 = vmul.f32 %v4092_v34, %v2528_v23  ;;  %vm2532_vm10 = vweird.f32 %v4092_v34  ;;  %vm2546_vm2 = vweird.f32 %v6938_v17 }
 0x43d   : > { %v4096_v46 = vpop.eup %4095  ;;  %v1929_v16 = vsel %vm6971_vm15, %v1928_v54, %v1924_v1  ;;  %v2558_v33 = vsub.f32 1.0, %v2557_v50  ;;  %v2550_v49 = vand.u32 2147483647, %v6938_v17  ;;  %4099 = vrcp.f32 %v6991_v5  ;;  %vm2533_vm5 = vmor %vm2531_vm11, %vm2532_vm10 }
 0x43e   : > { %v7009_v60 = vsel %vm6943_vm9, %v1943_v27, %v1939_v52  ;;  %v1974_v6 = vmul.f32 %v7463_v26, %v1929_v16  ;;  %v2530_v38 = vadd.f32 %v4092_v34, %v2529_v15  ;;  %v2542_v51 = vmul.f32 %v4096_v46, %v6938_v17 }
 0x43f   : > { %v2559_v41 = vmul.f32 %v4094_v63, %v2558_v33  ;;  %vm2562_vm13 = vweird.f32 %v4094_v63  ;;  %vm7015_vm3 = vcmp.eq.f32.partialorder %v2565_v18, 8.507059e+37  ;;  %v2568_v36 = vor.u32 1.1754944e-38, %v2567_v22 }
 0x440   : > { %v4098_v61 = vpop.eup %4097  ;;  %vm7021_vm9 = vcmp.eq.f32.partialorder %v3130_v19, 8.507059e+37  ;;  %v3659_v57 = vpack.c.bf16 %v1974_v6, %v1973_v14  ;;  %v2534_v45 = vsel %vm2533_vm5, %v4092_v34, %v2530_v38  ;;  %v2543_v21 = vsub.f32 1.0, %v2542_v51  ;;  %v7470_v19 = vld [vmem:[#allocation21_spill] sm:$0xff]  ;;  %vm2563_vm8 = vmor %vm2561_vm6, %vm2562_vm13  ;;  %v7047_v34 = vpop.xlane.xlu1 %2937  ;;  %v7476_v38 = vld [vmem:[#allocation22_spill] sm:$0xff] }
 0x441   : > { %v2552_v31 = vand.u32 2147483648, %v6938_v17  ;;  %v2539_v10 = vsel %vm6977_vm0, %v2538_v2, %v2534_v45  ;;  %v2560_v27 = vadd.f32 %v4094_v63, %v2559_v41  ;;  %vm7030_vm1 = vcmp.eq.f32.partialorder %v2550_v49, 8.507059e+37  ;;  %v7472_v17 = vld [vmem:[#allocation17_spill] sm:$0xff] }
 0x442   : > { %v1947_v32 = vmul.f32 %v4098_v61, %v6969_v56  ;;  %3759 = vst [vmem:[%s5641_s12 + $0x70] sm:$0xff] %v3659_v57   ;;  %v2584_v55 = vmul.f32 %v7470_v19, %v2539_v10  ;;  %v2544_v29 = vmul.f32 %v4096_v46, %v2543_v21  ;;  %vm2547_vm11 = vweird.f32 %v4096_v46 }
 0x443   : > { %v1957_v3 = vand.u32 2147483648, %v6969_v56  ;;  %v4100_v53 = vpop.eup %4099  ;;  %v2564_v4 = vsel %vm2563_vm8, %v4094_v63, %v2560_v27  ;;  %vm1951_vm12 = vweird.f32 %v6969_v56  ;;  %4101 = vrcp.f32 %v7026_v7  ;;  %vm2548_vm15 = vmor %vm2546_vm2, %vm2547_vm11 }
 0x444   : > { %v1948_v39 = vsub.f32 1.0, %v1947_v32  ;;  %v3699_v59 = vpack.c.bf16 %v2584_v55, %v6941_v42  ;;  %v2569_v58 = vsel %vm7015_vm3, %v2568_v36, %v2564_v4  ;;  %v2545_v44 = vadd.f32 %v4096_v46, %v2544_v29  ;;  %v7477_v29 = vld [vmem:[#allocation26_spill] sm:$0xff] }
 0x445   : > { %v3137_v62 = vmul.f32 %v4100_v53, %v6991_v5  ;;  %v2553_v37 = vor.u32 1.1754944e-38, %v2552_v31  ;;  %vm1952_vm0 = vweird.f32 %v4098_v61  ;;  %v1955_v12 = vand.u32 2147483647, %v6969_v56 }
 0x446   : > { %v1949_v47 = vmul.f32 %v4098_v61, %v1948_v39  ;;  %3767 = vst [vmem:[%s5641_s12 + $0xb0] sm:$0xff] %v3699_v59   ;;  %v2586_v8 = vmul.f32 %v7471_v30, %v2569_v58  ;;  %v2549_v42 = vsel %vm2548_vm15, %v4096_v46, %v2545_v44  ;;  %v1958_v14 = vor.u32 1.1754944e-38, %v1957_v3  ;;  %vm1953_vm4 = vmor %vm1951_vm12, %vm1952_vm0  ;;  %v7473_v46 = vld [vmem:[#allocation20_spill] sm:$0xff] }
 0x447   : > { %v3138_v54 = vsub.f32 1.0, %v3137_v62  ;;  %v2554_v40 = vsel %vm7030_vm1, %v2553_v37, %v2549_v42  ;;  %v3147_v63 = vand.u32 2147483648, %v6991_v5  ;;  %4103 = vrcp.f32 %v7047_v34 }
 0x448   : > { %v1950_v2 = vadd.f32 %v4098_v61, %v1949_v47  ;;  %v2585_v0 = vmul.f32 %v7472_v17, %v2554_v40  ;;  %vm3142_vm6 = vweird.f32 %v4100_v53  ;;  %v3145_v23 = vand.u32 2147483647, %v6991_v5 }
 0x449   : > { %v3139_v13 = vmul.f32 %v4100_v53, %v3138_v54  ;;  %v4102_v52 = vpop.eup %4101  ;;  %v3134_v50 = vsel %vm7021_vm9, %v6910_v28, %v3129_v9  ;;  %vm1956_vm7 = vcmp.eq.f32.partialorder %v1955_v12, 8.507059e+37  ;;  %vm3141_vm10 = vweird.f32 %v6991_v5  ;;  %v7475_v5 = vld [vmem:[#allocation13_spill] sm:$0xff] }
 0x44a   : > { %v1954_v18 = vsel %vm1953_vm4, %v4098_v61, %v1950_v2  ;;  %v3704_v56 = vpack.c.bf16 %v2586_v8, %v2585_v0  ;;  %v3167_v15 = vmul.f32 %v4102_v52, %v7026_v7  ;;  %v1975_v16 = vmul.f32 %v7473_v46, %v7009_v60  ;;  %vm3143_vm14 = vmor %vm3141_vm10, %vm3142_vm6 }
 0x44b   : > { %v1959_v22 = vsel %vm1956_vm7, %v1958_v14, %v1954_v18  ;;  %v3140_v1 = vadd.f32 %v4100_v53, %v3139_v13  ;;  %v3148_v24 = vor.u32 1.1754944e-38, %v3147_v63  ;;  %vm3146_vm2 = vcmp.eq.f32.partialorder %v3145_v23, 8.507059e+37 }
 0x44c   : > { %v1976_v33 = vmul.f32 %v7474_v48, %v1959_v22  ;;  %3768 = vst [vmem:[%s5641_s12 + $0xb8] sm:$0xff] %v3704_v56   ;;  %v3168_v28 = vsub.f32 1.0, %v3167_v15  ;;  %v3193_v49 = vmul.f32 %v7475_v5, %v3134_v50  ;;  %vm3172_vm5 = vweird.f32 %v4102_v52 }
 0x44d   : > { %v3144_v20 = vsel %vm3143_vm14, %v4100_v53, %v3140_v1  ;;  %v4104_v9 = vpop.eup %4103  ;;  %vm3171_vm13 = vweird.f32 %v7026_v7  ;;  %v3177_v43 = vand.u32 2147483648, %v7026_v7  ;;  %v3175_v11 = vand.u32 2147483647, %v7026_v7 }
 0x44e   : > { %v3664_v26 = vpack.c.bf16 %v1976_v33, %v1975_v16  ;;  %v3149_v6 = vsel %vm3146_vm2, %v3148_v24, %v3144_v20  ;;  %v3169_v41 = vmul.f32 %v4102_v52, %v3168_v28  ;;  %v3152_v60 = vmul.f32 %v4104_v9, %v7047_v34  ;;  %vm3173_vm3 = vmor %vm3171_vm13, %vm3172_vm5 }
 0x44f   : > { %v3194_v51 = vmul.f32 %v7476_v38, %v3149_v6  ;;  %v3162_v45 = vand.u32 2147483648, %v7047_v34  ;;  %vm3157_vm9 = vweird.f32 %v4104_v9  ;;  %v3160_v10 = vand.u32 2147483647, %v7047_v34 }
 0x450   : > { %3760 = vst [vmem:[%s5641_s12 + $0x78] sm:$0xff] %v3664_v26   ;;  %v3170_v61 = vadd.f32 %v4102_v52, %v3169_v41  ;;  %v3153_v57 = vsub.f32 1.0, %v3152_v60  ;;  %v3178_v27 = vor.u32 1.1754944e-38, %v3177_v43  ;;  %vm3176_vm1 = vcmp.eq.f32.partialorder %v3175_v11, 8.507059e+37 }
 0x451   : > { %v3739_v36 = vpack.c.bf16 %v3194_v51, %v3193_v49  ;;  %vm3156_vm8 = vweird.f32 %v7047_v34  ;;  %v3163_v32 = vor.u32 1.1754944e-38, %v3162_v45  ;;  %vm3161_vm12 = vcmp.eq.f32.partialorder %v3160_v10, 8.507059e+37 }
 0x452   : > { %v3174_v21 = vsel %vm3173_vm3, %v4102_v52, %v3170_v61  ;;  %v3154_v31 = vmul.f32 %v4104_v9, %v3153_v57  ;;  %vm3158_vm11 = vmor %vm3156_vm8, %vm3157_vm9 }
 0x453   : > { %3775 = vst [vmem:[%s5641_s12 + $0xf0] sm:$0xff] %v3739_v36   ;;  %v3179_v25 = vsel %vm3176_vm1, %v3178_v27, %v3174_v21 }
 0x454   : > { %v3155_v7 = vadd.f32 %v4104_v9, %v3154_v31  ;;  %v3196_v3 = vmul.f32 %v7477_v29, %v3179_v25 }
 0x456   : > { %v3159_v19 = vsel %vm3158_vm11, %v4104_v9, %v3155_v7 }
 0x457   : > { %v3164_v55 = vsel %vm3161_vm12, %v3163_v32, %v3159_v19 }
 0x458   : > { %v3195_v53 = vmul.f32 %v6142_v35, %v3164_v55 }
 0x45a   : > { %v3744_v4 = vpack.c.bf16 %v3196_v3, %v3195_v53 }
 0x45c   : > { %3776 = vst [vmem:[%s5641_s12 + $0xf8] sm:$0xff] %v3744_v4  }
 0x45d   : > { %4132 = shalt.err (!%p4129_p5)
}
 0x45e   : > { %s4190_s8 = smov 64   ;;  %s4191_s12 = smov 4  }
 0x45f   : > { %3785 = dma.vmem_to_hbm [thread:$0]  (%p4272_p4), %s3246_s27, 4096, %s3248_s19, %s3231_s20, %s4190_s8, %s4190_s8, %s4191_s12  }
 0x460 PF: > { %p3791_p6 = scmp.ge.s32.totalorder %s4183_s29, 2  ;;  %s3262_s17 = sand.u32 1, %s4163_s24  }
 0x461   : > { %s3263_s18 = scalar_lea.sflag [#allocation4], %s3262_s17 }
 0x462   : > { %p3788_p7 = pnand %p3791_p6, %p4279_p8 }
 0x464   : > { %p3789_p9 = pneg %p3788_p7 }
 0x466   : > { %4158 = dma.done.wait (%p3789_p9), %s3263_s18, 4096  }
 0x467   : > { %4160 = vsyncadd (%p3789_p9), %s3263_s18, 4294963200  ;;  %s20_s29 = sadd.s32 1, %s4183_s29   ;;  %s7478_s24 = smov %s4167_s25 }
 0x468   : > { %p17_p10 = scmp.ge.s32.totalorder %s20_s29, 4   ;;  %s7479_s25 = smov %s4171_s26 }
 0x469   : > { %s7480_s26 = smov %s4285_s14  ;;  %s7481_s27 = smov %s4179_s28 }
 0x46a   : > { %s7482_s28 = smov %s7484_s9  ;;  %19 = sbr.rel (!%p17_p10) target bundleno = 4 (0x4), region = 96 }
 0x46f   :  { %3269 = vsyncpa [#allocation4], 1 }
 0x470   :  { %3271 = vsyncpa [#allocation4 + $0x1], 1 }

</bundles_post_ra>
